<compile_context>
chip_gen: v5e
topology: v5e:2x2
jax: 0.10.0
libtpu: 0.0.40
codegen_flags: <defaults>
</compile_context>

<pallas_src>
import jax
import jax.numpy as jnp
from jax.experimental import pallas as pl
from jax.experimental.pallas import tpu as pltpu

TILE_R = 1024                       # rows per tile (sublane-major)
LANES = 512                         # lane-dense last dim (multiple of 128 -> unmasked vst)
TILE_ELEMS = TILE_R * LANES         # 524288 elems = 2 MiB f32 per tile
MIN_PALLAS_ELEMS = 2 * TILE_ELEMS   # below this, let XLA fuse w*x+b directly


def _linreg_kernel(w_ref, b_ref, x_ref, o_ref):
    # w_ref / b_ref: (1, 1) f32 scalars in SMEM; x_ref / o_ref: (TILE_R, LANES) VMEM tiles.
    w = w_ref[0, 0]
    b = b_ref[0, 0]
    xv = x_ref[...].astype(jnp.float32)          # cast in-register (f32 math on all gens)
    o_ref[...] = (w * xv + b).astype(o_ref.dtype)


def linear_regression_forward(x: jax.Array, weights: jax.Array, bias: jax.Array) -> jax.Array:
    """Computes weights * x + bias (scalar weight/bias broadcast over x)."""
    orig_shape = x.shape
    # torch promotion: float32 params * x -> at least float32 output.
    out_dtype = jnp.promote_types(x.dtype, jnp.float32)

    w2d = weights.reshape(1, 1).astype(jnp.float32)
    b2d = bias.reshape(1, 1).astype(jnp.float32)

    n = x.size
    if n < MIN_PALLAS_ELEMS:
        # Small input: pallas_call launch + any pad/slice copies exceed kernel
        # time; the fused XLA elementwise op is already at roofline.
        y = w2d[0, 0] * x.astype(out_dtype) + b2d[0, 0]
        return y.reshape(orig_shape)

    # Pad the flat view only to a multiple of LANES (<= 511 wasted elements).
    rows = pl.cdiv(n, LANES)
    n_pad = rows * LANES
    flat = x.reshape(-1)
    if n_pad != n:
        flat = jnp.pad(flat, (0, n_pad - n))
    x2d = flat.reshape(rows, LANES)

    # Ragged last row-block: Pallas clamps the edge DMA and discards OOB writes.
    num_tiles = pl.cdiv(rows, TILE_R)

    x_bytes = n_pad * x2d.dtype.itemsize
    out_bytes = n_pad * jnp.dtype(out_dtype).itemsize

    out2d = pl.pallas_call(
        _linreg_kernel,
        out_shape=jax.ShapeDtypeStruct((rows, LANES), out_dtype),
        grid=(num_tiles,),
        in_specs=[
            pl.BlockSpec(memory_space=pltpu.SMEM),            # weights scalar (1,1)
            pl.BlockSpec(memory_space=pltpu.SMEM),            # bias scalar (1,1)
            pl.BlockSpec((TILE_R, LANES), lambda i: (i, 0)),  # lane-dense input tile
        ],
        out_specs=pl.BlockSpec((TILE_R, LANES), lambda i: (i, 0)),
        compiler_params=pltpu.CompilerParams(
            dimension_semantics=("parallel",),       # shard tile loop across TCs on v7x
            vmem_limit_bytes=32 * 1024 * 1024,       # 8 MiB live footprint << limit everywhere
            allow_input_fusion=[False, False, True], # fuse pad/reshape producer into x DMA
        ),
        cost_estimate=pl.CostEstimate(
            flops=2 * n_pad,                         # one mul + one add per element
            transcendentals=0,
            bytes_accessed=x_bytes + out_bytes,      # one read + one write pass
        ),
    )(w2d, b2d, x2d)

    # Strip padding (only if any) and restore the original shape.
    if n_pad != n:
        return out2d.reshape(-1)[:n].reshape(orig_shape)
    return out2d.reshape(orig_shape)


if __name__ == "__main__":
    key = jax.random.PRNGKey(0)
    kw, kb, kx1, kx2, kx3 = jax.random.split(key, 5)

    # Deterministic parameter init (matches nn.Parameter(torch.randn(1)) shapes).
    weights = jax.random.normal(kw, (1,), dtype=jnp.float32)
    bias = jax.random.normal(kb, (1,), dtype=jnp.float32)

    fwd = jax.jit(linear_regression_forward)

    # 1) Aligned input: exactly 4 tiles -> zero-copy path, even TC split on v7x.
    N1 = 4 * TILE_ELEMS  # 2_097_152
    x1 = jax.random.normal(kx1, (N1, 1), dtype=jnp.float32)
    y1 = jax.block_until_ready(fwd(x1, weights, bias))
    assert y1.shape == x1.shape
    assert jnp.allclose(y1, weights * x1 + bias, atol=1e-5), "mismatch (aligned pallas path)"

    # 2) Unaligned input: exercises 512-pad + ragged last row-block.
    N2 = 1_500_000
    x2 = jax.random.normal(kx2, (N2, 1), dtype=jnp.float32)
    y2 = jax.block_until_ready(fwd(x2, weights, bias))
    assert y2.shape == x2.shape
    assert jnp.allclose(y2, weights * x2 + bias, atol=1e-5), "mismatch (ragged pallas path)"

    # 3) Tiny input: fast path (same semantics, no pallas launch overhead).
    x3 = jax.random.normal(kx3, (8, 1), dtype=jnp.float32)
    y3 = jax.block_until_ready(fwd(x3, weights, bias))
    assert jnp.allclose(y3, weights * x3 + bias, atol=1e-6), "mismatch (tiny path)"

    print("KERNEL_OK")
</pallas_src>

<mosaic_0001>
module attributes {stable_mosaic.version = 11 : i64} {
  func.func @_linreg_kernel(%arg0: i32, %arg1: memref<1x1xf32, #tpu.memory_space<smem>>, %arg2: memref<1x1xf32, #tpu.memory_space<smem>>, %arg3: memref<1024x512xf32, #tpu.memory_space<vmem>>, %arg4: memref<1024x512xf32, #tpu.memory_space<vmem>>) attributes {dimension_semantics = [#tpu.dimension_semantics<parallel>], iteration_bounds = array<i64: 4>, scalar_prefetch = 0 : i64, scratch_operands = 0 : i64, tpu.core_type = #tpu.core_type<tc>, window_params = [{transform_indices = @transform_0, window_bounds = array<i64: 1, 1>}, {transform_indices = @transform_1, window_bounds = array<i64: 1, 1>}, {transform_indices = @transform_2, window_bounds = array<i64: 1024, 512>}, {transform_indices = @transform_3, window_bounds = array<i64: 1024, 512>}]} {
    %c0 = arith.constant 0 : index
    %c0_0 = arith.constant 0 : index
    %0 = memref.load %arg1[%c0, %c0_0] : memref<1x1xf32, #tpu.memory_space<smem>>
    %c0_1 = arith.constant 0 : index
    %c0_2 = arith.constant 0 : index
    %1 = memref.load %arg2[%c0_1, %c0_2] : memref<1x1xf32, #tpu.memory_space<smem>>
    %c0_3 = arith.constant 0 : index
    %c0_4 = arith.constant 0 : index
    %2 = vector.load %arg3[%c0_3, %c0_4] : memref<1024x512xf32, #tpu.memory_space<vmem>>, vector<1024x512xf32>
    %3 = vector.broadcast %0 : f32 to vector<1024x512xf32>
    %4 = arith.mulf %3, %2 : vector<1024x512xf32>
    %5 = vector.broadcast %1 : f32 to vector<1024x512xf32>
    %6 = arith.addf %4, %5 : vector<1024x512xf32>
    %c0_5 = arith.constant 0 : index
    %c0_6 = arith.constant 0 : index
    %7 = vector.load %arg4[%c0_5, %c0_6] : memref<1024x512xf32, #tpu.memory_space<vmem>>, vector<1024x512xf32>
    tpu.vector_store %arg4[%c0_5, %c0_6], %6 {strides = array<i32>} : memref<1024x512xf32, #tpu.memory_space<vmem>>, vector<1024x512xf32>,
    return
  }
  func.func @transform_0(%arg0: i32) -> (i32, i32) {
    %c0_i32 = arith.constant 0 : i32
    %c0_i32_0 = arith.constant 0 : i32
    %c0_i32_1 = arith.constant 0 : i32
    return %c0_i32, %c0_i32_0 : i32, i32
  }
  func.func @transform_1(%arg0: i32) -> (i32, i32) {
    %c0_i32 = arith.constant 0 : i32
    %c0_i32_0 = arith.constant 0 : i32
    %c0_i32_1 = arith.constant 0 : i32
    return %c0_i32, %c0_i32_0 : i32, i32
  }
  func.func @transform_2(%arg0: i32) -> (i32, i32) {
    %c0_i32 = arith.constant 0 : i32
    %c0_i32_0 = arith.constant 0 : i32
    return %arg0, %c0_i32 : i32, i32
  }
  func.func @transform_3(%arg0: i32) -> (i32, i32) {
    %c0_i32 = arith.constant 0 : i32
    %c0_i32_0 = arith.constant 0 : i32
    return %arg0, %c0_i32 : i32, i32
  }
}

</mosaic_0001>

<bundles_post_ra>
// kernel: linear_regression_forward.1
= control target key start
LH: loop header
LB: loop body
LE: loop exit
PB: predicated region body
PF: predicated region fallthrough
CT: control target
= control target key end

     0   :  { %s2348_s16 = smov 0   ;;  %s4421_s0 = inlined_call_operand.<no memory space> [shape: f32[1,1], index: 0, kind: input, shape index: {}]   ;;  %s4422_s1 = inlined_call_operand.<no memory space> [shape: f32[1,1], index: 1, kind: input, shape index: {}]   ;;  %s4423_s2 = inlined_call_operand.vmem [shape: f32[4096,512], index: 2, kind: input, shape index: {}]   ;;  %s4424_s3 = inlined_call_operand.vmem [shape: f32[4096,512], index: 3, kind: output, shape index: {}]  }
   0x1   :  { %8 = sst [smem:[#allocation2]] %s4421_s0 }
   0x2   :  { %9 = sst [smem:[#allocation3]] %s4422_s1 }
   0x3 LB: > { %s2291_s17 = sadd.s32 4294967295, %s2320_s16   ;;  %p2295_p0 = scmp.ge.s32.totalorder %s2320_s16, 1  ;;  %s2320_s16 = sphi %s2348_s16, %s15_s16  }
   0x4   : > { %p141_p1 = scmp.lt.s32.totalorder %s2320_s16, 5 }
   0x6   : > { %p142_p2 = pnand %p2295_p0, %p141_p1 }
   0x7   : > { %s2296_s0 = sshll.u32 (!%p142_p2), %s2291_s17, 7  ;;  %s181_s18 = sld [smem:[#allocation2]] (!%p142_p2) }
   0x8   : > { %145 = sbr.rel (%p142_p2) target bundleno = 533 (0x215), region = 32  ;;  %p168_p3 = scmp.lt.s32.totalorder (!%p142_p2), %s2296_s0, 511 }
   0x9   : > { %s182_s19 = sld [smem:[#allocation3]] (!%p142_p2) }
   0xd   : > { %s4426_s0 = smov (!%p168_p3, %s2296_s0), 511  ;;  %v2361_v0 = vstv %s181_s18 }
   0xe   : > { %s2304_s1 = sshll.u32 %s4426_s0, 5 }
   0xf   : > { %s2359_s22 = scalar_lea.vmem %s4423_s2, %s2304_s1  ;;  %v2364_v2 = vstv %s182_s19  ;;  %s2377_s25 = scalar_lea.vmem %s4424_s3, %s2304_s1 }
  0x10   : > { %v183_v1 = vld [vmem:[%s2359_s22] sm:$0xff]  ;;  %v184_v3 = vld [vmem:[%s2359_s22 + $0x8] sm:$0xff]  ;;  %v185_v4 = vld [vmem:[%s2359_s22 + $0x10] sm:$0xff] }
  0x11   : > { %v696_v5 = vmul.f32 %v2361_v0, %v183_v1  ;;  %v697_v6 = vmul.f32 %v2361_v0, %v184_v3  ;;  %v698_v7 = vmul.f32 %v2361_v0, %v185_v4  ;;  %v186_v8 = vld [vmem:[%s2359_s22 + $0x18] sm:$0xff]  ;;  %v187_v9 = vld [vmem:[%s2359_s22 + $0x20] sm:$0xff]  ;;  %v188_v10 = vld [vmem:[%s2359_s22 + $0x28] sm:$0xff] }
  0x12   : > { %v699_v11 = vmul.f32 %v2361_v0, %v186_v8  ;;  %v700_v12 = vmul.f32 %v2361_v0, %v187_v9  ;;  %v701_v13 = vmul.f32 %v2361_v0, %v188_v10  ;;  %v189_v14 = vld [vmem:[%s2359_s22 + $0x30] sm:$0xff]  ;;  %v190_v15 = vld [vmem:[%s2359_s22 + $0x38] sm:$0xff]  ;;  %v191_v16 = vld [vmem:[%s2359_s22 + $0x40] sm:$0xff] }
  0x13   : > { %v1209_v17 = vadd.f32 %v2364_v2, %v696_v5  ;;  %v1210_v18 = vadd.f32 %v2364_v2, %v697_v6  ;;  %v1211_v19 = vadd.f32 %v2364_v2, %v698_v7  ;;  %v702_v20 = vmul.f32 %v2361_v0, %v189_v14  ;;  %v192_v21 = vld [vmem:[%s2359_s22 + $0x48] sm:$0xff]  ;;  %v193_v24 = vld [vmem:[%s2359_s22 + $0x50] sm:$0xff]  ;;  %v194_v27 = vld [vmem:[%s2359_s22 + $0x58] sm:$0xff] }
  0x14   : > { %v1212_v22 = vadd.f32 %v2364_v2, %v699_v11  ;;  %v703_v23 = vmul.f32 %v2361_v0, %v190_v15  ;;  %v1213_v25 = vadd.f32 %v2364_v2, %v700_v12  ;;  %v704_v26 = vmul.f32 %v2361_v0, %v191_v16  ;;  %v195_v30 = vld [vmem:[%s2359_s22 + $0x60] sm:$0xff]  ;;  %v196_v33 = vld [vmem:[%s2359_s22 + $0x68] sm:$0xff]  ;;  %v197_v36 = vld [vmem:[%s2359_s22 + $0x70] sm:$0xff] }
  0x15   : > { %1721 = vst [vmem:[%s2377_s25] sm:$0xff] %v1209_v17  ;;  %v1214_v28 = vadd.f32 %v2364_v2, %v701_v13  ;;  %v705_v29 = vmul.f32 %v2361_v0, %v192_v21  ;;  %v1215_v31 = vadd.f32 %v2364_v2, %v702_v20  ;;  %v706_v32 = vmul.f32 %v2361_v0, %v193_v24  ;;  %v198_v39 = vld [vmem:[%s2359_s22 + $0x78] sm:$0xff]  ;;  %v199_v42 = vld [vmem:[%s2359_s22 + $0x80] sm:$0xff]  ;;  %v200_v45 = vld [vmem:[%s2359_s22 + $0x88] sm:$0xff] }
  0x16   : > { %1722 = vst [vmem:[%s2377_s25 + $0x8] sm:$0xff] %v1210_v18  ;;  %v1216_v34 = vadd.f32 %v2364_v2, %v703_v23  ;;  %v707_v35 = vmul.f32 %v2361_v0, %v194_v27  ;;  %v1217_v37 = vadd.f32 %v2364_v2, %v704_v26  ;;  %v708_v38 = vmul.f32 %v2361_v0, %v195_v30  ;;  %v201_v48 = vld [vmem:[%s2359_s22 + $0x90] sm:$0xff]  ;;  %v202_v51 = vld [vmem:[%s2359_s22 + $0x98] sm:$0xff]  ;;  %v203_v54 = vld [vmem:[%s2359_s22 + $0xa0] sm:$0xff] }
  0x17   : > { %1723 = vst [vmem:[%s2377_s25 + $0x10] sm:$0xff] %v1211_v19  ;;  %v1218_v40 = vadd.f32 %v2364_v2, %v705_v29  ;;  %v709_v41 = vmul.f32 %v2361_v0, %v196_v33  ;;  %v1219_v43 = vadd.f32 %v2364_v2, %v706_v32  ;;  %v710_v44 = vmul.f32 %v2361_v0, %v197_v36  ;;  %v204_v57 = vld [vmem:[%s2359_s22 + $0xa8] sm:$0xff]  ;;  %v205_v60 = vld [vmem:[%s2359_s22 + $0xb0] sm:$0xff]  ;;  %v206_v63 = vld [vmem:[%s2359_s22 + $0xb8] sm:$0xff] }
  0x18   : > { %1724 = vst [vmem:[%s2377_s25 + $0x18] sm:$0xff] %v1212_v22  ;;  %v1220_v46 = vadd.f32 %v2364_v2, %v707_v35  ;;  %v711_v47 = vmul.f32 %v2361_v0, %v198_v39  ;;  %v1221_v49 = vadd.f32 %v2364_v2, %v708_v38  ;;  %v712_v50 = vmul.f32 %v2361_v0, %v199_v42  ;;  %v207_v4 = vld [vmem:[%s2359_s22 + $0xc0] sm:$0xff]  ;;  %v208_v7 = vld [vmem:[%s2359_s22 + $0xc8] sm:$0xff]  ;;  %v209_v10 = vld [vmem:[%s2359_s22 + $0xd0] sm:$0xff] }
  0x19   : > { %1725 = vst [vmem:[%s2377_s25 + $0x20] sm:$0xff] %v1213_v25  ;;  %v1222_v52 = vadd.f32 %v2364_v2, %v709_v41  ;;  %v713_v53 = vmul.f32 %v2361_v0, %v200_v45  ;;  %v1223_v55 = vadd.f32 %v2364_v2, %v710_v44  ;;  %v714_v56 = vmul.f32 %v2361_v0, %v201_v48  ;;  %v210_v13 = vld [vmem:[%s2359_s22 + $0xd8] sm:$0xff]  ;;  %v211_v16 = vld [vmem:[%s2359_s22 + $0xe0] sm:$0xff]  ;;  %v212_v19 = vld [vmem:[%s2359_s22 + $0xe8] sm:$0xff] }
  0x1a   : > { %1726 = vst [vmem:[%s2377_s25 + $0x28] sm:$0xff] %v1214_v28  ;;  %v1224_v58 = vadd.f32 %v2364_v2, %v711_v47  ;;  %v715_v59 = vmul.f32 %v2361_v0, %v202_v51  ;;  %v1225_v61 = vadd.f32 %v2364_v2, %v712_v50  ;;  %v716_v62 = vmul.f32 %v2361_v0, %v203_v54  ;;  %v213_v22 = vld [vmem:[%s2359_s22 + $0xf0] sm:$0xff]  ;;  %v214_v25 = vld [vmem:[%s2359_s22 + $0xf8] sm:$0xff]  ;;  %v215_v28 = vld [vmem:[%s2359_s22 + $0x100] sm:$0xff] }
  0x1b   : > { %1727 = vst [vmem:[%s2377_s25 + $0x30] sm:$0xff] %v1215_v31  ;;  %v1226_v1 = vadd.f32 %v2364_v2, %v713_v53  ;;  %v717_v3 = vmul.f32 %v2361_v0, %v204_v57  ;;  %v1227_v5 = vadd.f32 %v2364_v2, %v714_v56  ;;  %v718_v6 = vmul.f32 %v2361_v0, %v205_v60  ;;  %v216_v31 = vld [vmem:[%s2359_s22 + $0x108] sm:$0xff] }
  0x1c   : > { %1728 = vst [vmem:[%s2377_s25 + $0x38] sm:$0xff] %v1216_v34  ;;  %v1228_v8 = vadd.f32 %v2364_v2, %v715_v59  ;;  %v719_v9 = vmul.f32 %v2361_v0, %v206_v63  ;;  %v1229_v11 = vadd.f32 %v2364_v2, %v716_v62  ;;  %v720_v12 = vmul.f32 %v2361_v0, %v207_v4  ;;  %v217_v34 = vld [vmem:[%s2359_s22 + $0x110] sm:$0xff] }
  0x1d   : > { %1729 = vst [vmem:[%s2377_s25 + $0x40] sm:$0xff] %v1217_v37  ;;  %v1230_v14 = vadd.f32 %v2364_v2, %v717_v3  ;;  %v721_v15 = vmul.f32 %v2361_v0, %v208_v7  ;;  %v1231_v17 = vadd.f32 %v2364_v2, %v718_v6  ;;  %v722_v18 = vmul.f32 %v2361_v0, %v209_v10  ;;  %v218_v37 = vld [vmem:[%s2359_s22 + $0x118] sm:$0xff] }
  0x1e   : > { %1730 = vst [vmem:[%s2377_s25 + $0x48] sm:$0xff] %v1218_v40  ;;  %v1232_v20 = vadd.f32 %v2364_v2, %v719_v9  ;;  %v723_v21 = vmul.f32 %v2361_v0, %v210_v13  ;;  %v1233_v23 = vadd.f32 %v2364_v2, %v720_v12  ;;  %v724_v24 = vmul.f32 %v2361_v0, %v211_v16  ;;  %v219_v40 = vld [vmem:[%s2359_s22 + $0x120] sm:$0xff] }
  0x1f   : > { %1731 = vst [vmem:[%s2377_s25 + $0x50] sm:$0xff] %v1219_v43  ;;  %v1234_v26 = vadd.f32 %v2364_v2, %v721_v15  ;;  %v725_v27 = vmul.f32 %v2361_v0, %v212_v19  ;;  %v1235_v29 = vadd.f32 %v2364_v2, %v722_v18  ;;  %v726_v30 = vmul.f32 %v2361_v0, %v213_v22  ;;  %v220_v43 = vld [vmem:[%s2359_s22 + $0x128] sm:$0xff] }
  0x20   : > { %1732 = vst [vmem:[%s2377_s25 + $0x58] sm:$0xff] %v1220_v46  ;;  %v1236_v32 = vadd.f32 %v2364_v2, %v723_v21  ;;  %v727_v33 = vmul.f32 %v2361_v0, %v214_v25  ;;  %v1237_v35 = vadd.f32 %v2364_v2, %v724_v24  ;;  %v728_v36 = vmul.f32 %v2361_v0, %v215_v28  ;;  %v221_v46 = vld [vmem:[%s2359_s22 + $0x130] sm:$0xff] }
  0x21   : > { %1733 = vst [vmem:[%s2377_s25 + $0x60] sm:$0xff] %v1221_v49  ;;  %v1238_v38 = vadd.f32 %v2364_v2, %v725_v27  ;;  %v729_v39 = vmul.f32 %v2361_v0, %v216_v31  ;;  %v1239_v41 = vadd.f32 %v2364_v2, %v726_v30  ;;  %v730_v42 = vmul.f32 %v2361_v0, %v217_v34  ;;  %v222_v49 = vld [vmem:[%s2359_s22 + $0x138] sm:$0xff] }
  0x22   : > { %1734 = vst [vmem:[%s2377_s25 + $0x68] sm:$0xff] %v1222_v52  ;;  %v1240_v44 = vadd.f32 %v2364_v2, %v727_v33  ;;  %v731_v45 = vmul.f32 %v2361_v0, %v218_v37  ;;  %v1241_v47 = vadd.f32 %v2364_v2, %v728_v36  ;;  %v732_v48 = vmul.f32 %v2361_v0, %v219_v40  ;;  %v223_v52 = vld [vmem:[%s2359_s22 + $0x140] sm:$0xff] }
  0x23   : > { %1735 = vst [vmem:[%s2377_s25 + $0x70] sm:$0xff] %v1223_v55  ;;  %v1242_v50 = vadd.f32 %v2364_v2, %v729_v39  ;;  %v733_v51 = vmul.f32 %v2361_v0, %v220_v43  ;;  %v1243_v53 = vadd.f32 %v2364_v2, %v730_v42  ;;  %v734_v54 = vmul.f32 %v2361_v0, %v221_v46  ;;  %v224_v55 = vld [vmem:[%s2359_s22 + $0x148] sm:$0xff] }
  0x24   : > { %1736 = vst [vmem:[%s2377_s25 + $0x78] sm:$0xff] %v1224_v58  ;;  %v1244_v56 = vadd.f32 %v2364_v2, %v731_v45  ;;  %v735_v57 = vmul.f32 %v2361_v0, %v222_v49  ;;  %v225_v58 = vld [vmem:[%s2359_s22 + $0x150] sm:$0xff]  ;;  %v1245_v59 = vadd.f32 %v2364_v2, %v732_v48  ;;  %v736_v60 = vmul.f32 %v2361_v0, %v223_v52 }
  0x25   : > { %1737 = vst [vmem:[%s2377_s25 + $0x80] sm:$0xff] %v1225_v61  ;;  %v226_v61 = vld [vmem:[%s2359_s22 + $0x158] sm:$0xff]  ;;  %v1246_v62 = vadd.f32 %v2364_v2, %v733_v51  ;;  %v737_v63 = vmul.f32 %v2361_v0, %v224_v55  ;;  %v1247_v3 = vadd.f32 %v2364_v2, %v734_v54  ;;  %v738_v4 = vmul.f32 %v2361_v0, %v225_v58 }
  0x26   : > { %1738 = vst [vmem:[%s2377_s25 + $0x88] sm:$0xff] %v1226_v1  ;;  %v227_v1 = vld [vmem:[%s2359_s22 + $0x160] sm:$0xff]  ;;  %v1248_v6 = vadd.f32 %v2364_v2, %v735_v57  ;;  %v739_v7 = vmul.f32 %v2361_v0, %v226_v61  ;;  %v1249_v9 = vadd.f32 %v2364_v2, %v736_v60 }
  0x27   : > { %1739 = vst [vmem:[%s2377_s25 + $0x90] sm:$0xff] %v1227_v5  ;;  %v228_v5 = vld [vmem:[%s2359_s22 + $0x168] sm:$0xff]  ;;  %v740_v10 = vmul.f32 %v2361_v0, %v227_v1  ;;  %v1250_v12 = vadd.f32 %v2364_v2, %v737_v63  ;;  %v1251_v15 = vadd.f32 %v2364_v2, %v738_v4 }
  0x28   : > { %1740 = vst [vmem:[%s2377_s25 + $0x98] sm:$0xff] %v1228_v8  ;;  %v229_v8 = vld [vmem:[%s2359_s22 + $0x170] sm:$0xff]  ;;  %v741_v13 = vmul.f32 %v2361_v0, %v228_v5  ;;  %v1252_v18 = vadd.f32 %v2364_v2, %v739_v7 }
  0x29   : > { %1741 = vst [vmem:[%s2377_s25 + $0xa0] sm:$0xff] %v1229_v11  ;;  %v230_v11 = vld [vmem:[%s2359_s22 + $0x178] sm:$0xff]  ;;  %v742_v16 = vmul.f32 %v2361_v0, %v229_v8  ;;  %v1253_v21 = vadd.f32 %v2364_v2, %v740_v10 }
  0x2a   : > { %1742 = vst [vmem:[%s2377_s25 + $0xa8] sm:$0xff] %v1230_v14  ;;  %v231_v14 = vld [vmem:[%s2359_s22 + $0x180] sm:$0xff]  ;;  %v743_v19 = vmul.f32 %v2361_v0, %v230_v11  ;;  %v1254_v24 = vadd.f32 %v2364_v2, %v741_v13 }
  0x2b   : > { %1743 = vst [vmem:[%s2377_s25 + $0xb0] sm:$0xff] %v1231_v17  ;;  %v232_v17 = vld [vmem:[%s2359_s22 + $0x188] sm:$0xff]  ;;  %v744_v22 = vmul.f32 %v2361_v0, %v231_v14  ;;  %v1255_v27 = vadd.f32 %v2364_v2, %v742_v16 }
  0x2c   : > { %1744 = vst [vmem:[%s2377_s25 + $0xb8] sm:$0xff] %v1232_v20  ;;  %v233_v20 = vld [vmem:[%s2359_s22 + $0x190] sm:$0xff]  ;;  %v745_v25 = vmul.f32 %v2361_v0, %v232_v17  ;;  %v1256_v30 = vadd.f32 %v2364_v2, %v743_v19 }
  0x2d   : > { %1745 = vst [vmem:[%s2377_s25 + $0xc0] sm:$0xff] %v1233_v23  ;;  %v234_v23 = vld [vmem:[%s2359_s22 + $0x198] sm:$0xff]  ;;  %v746_v28 = vmul.f32 %v2361_v0, %v233_v20  ;;  %v1257_v33 = vadd.f32 %v2364_v2, %v744_v22 }
  0x2e   : > { %1746 = vst [vmem:[%s2377_s25 + $0xc8] sm:$0xff] %v1234_v26  ;;  %v235_v26 = vld [vmem:[%s2359_s22 + $0x1a0] sm:$0xff]  ;;  %v747_v31 = vmul.f32 %v2361_v0, %v234_v23  ;;  %v1258_v36 = vadd.f32 %v2364_v2, %v745_v25 }
  0x2f   : > { %1747 = vst [vmem:[%s2377_s25 + $0xd0] sm:$0xff] %v1235_v29  ;;  %v236_v29 = vld [vmem:[%s2359_s22 + $0x1a8] sm:$0xff]  ;;  %v748_v34 = vmul.f32 %v2361_v0, %v235_v26  ;;  %v1259_v39 = vadd.f32 %v2364_v2, %v746_v28 }
  0x30   : > { %1748 = vst [vmem:[%s2377_s25 + $0xd8] sm:$0xff] %v1236_v32  ;;  %v237_v32 = vld [vmem:[%s2359_s22 + $0x1b0] sm:$0xff]  ;;  %v749_v37 = vmul.f32 %v2361_v0, %v236_v29  ;;  %v1260_v42 = vadd.f32 %v2364_v2, %v747_v31 }
  0x31   : > { %1749 = vst [vmem:[%s2377_s25 + $0xe0] sm:$0xff] %v1237_v35  ;;  %v238_v35 = vld [vmem:[%s2359_s22 + $0x1b8] sm:$0xff]  ;;  %v750_v40 = vmul.f32 %v2361_v0, %v237_v32  ;;  %v1261_v45 = vadd.f32 %v2364_v2, %v748_v34 }
  0x32   : > { %1750 = vst [vmem:[%s2377_s25 + $0xe8] sm:$0xff] %v1238_v38  ;;  %v239_v38 = vld [vmem:[%s2359_s22 + $0x1c0] sm:$0xff]  ;;  %v751_v43 = vmul.f32 %v2361_v0, %v238_v35  ;;  %v1262_v48 = vadd.f32 %v2364_v2, %v749_v37 }
  0x33   : > { %1751 = vst [vmem:[%s2377_s25 + $0xf0] sm:$0xff] %v1239_v41  ;;  %v240_v41 = vld [vmem:[%s2359_s22 + $0x1c8] sm:$0xff]  ;;  %v752_v46 = vmul.f32 %v2361_v0, %v239_v38  ;;  %v1263_v51 = vadd.f32 %v2364_v2, %v750_v40 }
  0x34   : > { %1752 = vst [vmem:[%s2377_s25 + $0xf8] sm:$0xff] %v1240_v44  ;;  %v241_v44 = vld [vmem:[%s2359_s22 + $0x1d0] sm:$0xff]  ;;  %v753_v49 = vmul.f32 %v2361_v0, %v240_v41  ;;  %v1264_v54 = vadd.f32 %v2364_v2, %v751_v43 }
  0x35   : > { %1753 = vst [vmem:[%s2377_s25 + $0x100] sm:$0xff] %v1241_v47  ;;  %v242_v47 = vld [vmem:[%s2359_s22 + $0x1d8] sm:$0xff]  ;;  %v754_v52 = vmul.f32 %v2361_v0, %v241_v44  ;;  %v1265_v57 = vadd.f32 %v2364_v2, %v752_v46 }
  0x36   : > { %1754 = vst [vmem:[%s2377_s25 + $0x108] sm:$0xff] %v1242_v50  ;;  %v243_v50 = vld [vmem:[%s2359_s22 + $0x1e0] sm:$0xff]  ;;  %v755_v55 = vmul.f32 %v2361_v0, %v242_v47  ;;  %v1266_v60 = vadd.f32 %v2364_v2, %v753_v49 }
  0x37   : > { %1755 = vst [vmem:[%s2377_s25 + $0x110] sm:$0xff] %v1243_v53  ;;  %v244_v53 = vld [vmem:[%s2359_s22 + $0x1e8] sm:$0xff]  ;;  %v756_v58 = vmul.f32 %v2361_v0, %v243_v50  ;;  %v1267_v63 = vadd.f32 %v2364_v2, %v754_v52 }
  0x38   : > { %1756 = vst [vmem:[%s2377_s25 + $0x118] sm:$0xff] %v1244_v56  ;;  %v245_v56 = vld [vmem:[%s2359_s22 + $0x1f0] sm:$0xff]  ;;  %v757_v61 = vmul.f32 %v2361_v0, %v244_v53  ;;  %v1268_v4 = vadd.f32 %v2364_v2, %v755_v55 }
  0x39   : > { %1757 = vst [vmem:[%s2377_s25 + $0x120] sm:$0xff] %v1245_v59  ;;  %v246_v59 = vld [vmem:[%s2359_s22 + $0x1f8] sm:$0xff]  ;;  %v758_v1 = vmul.f32 %v2361_v0, %v245_v56  ;;  %v1269_v7 = vadd.f32 %v2364_v2, %v756_v58 }
  0x3a   : > { %1758 = vst [vmem:[%s2377_s25 + $0x128] sm:$0xff] %v1246_v62  ;;  %v247_v62 = vld [vmem:[%s2359_s22 + $0x200] sm:$0xff]  ;;  %v759_v5 = vmul.f32 %v2361_v0, %v246_v59  ;;  %v1270_v10 = vadd.f32 %v2364_v2, %v757_v61 }
  0x3b   : > { %1759 = vst [vmem:[%s2377_s25 + $0x130] sm:$0xff] %v1247_v3  ;;  %v248_v3 = vld [vmem:[%s2359_s22 + $0x208] sm:$0xff]  ;;  %v760_v8 = vmul.f32 %v2361_v0, %v247_v62  ;;  %v1271_v13 = vadd.f32 %v2364_v2, %v758_v1 }
  0x3c   : > { %1760 = vst [vmem:[%s2377_s25 + $0x138] sm:$0xff] %v1248_v6  ;;  %v249_v6 = vld [vmem:[%s2359_s22 + $0x210] sm:$0xff]  ;;  %v761_v11 = vmul.f32 %v2361_v0, %v248_v3  ;;  %v1272_v16 = vadd.f32 %v2364_v2, %v759_v5 }
  0x3d   : > { %1761 = vst [vmem:[%s2377_s25 + $0x140] sm:$0xff] %v1249_v9  ;;  %v250_v9 = vld [vmem:[%s2359_s22 + $0x218] sm:$0xff]  ;;  %v762_v14 = vmul.f32 %v2361_v0, %v249_v6  ;;  %v1273_v19 = vadd.f32 %v2364_v2, %v760_v8 }
  0x3e   : > { %1762 = vst [vmem:[%s2377_s25 + $0x148] sm:$0xff] %v1250_v12  ;;  %v251_v12 = vld [vmem:[%s2359_s22 + $0x220] sm:$0xff]  ;;  %v763_v17 = vmul.f32 %v2361_v0, %v250_v9  ;;  %v1274_v22 = vadd.f32 %v2364_v2, %v761_v11 }
  0x3f   : > { %1763 = vst [vmem:[%s2377_s25 + $0x150] sm:$0xff] %v1251_v15  ;;  %v252_v15 = vld [vmem:[%s2359_s22 + $0x228] sm:$0xff]  ;;  %v764_v20 = vmul.f32 %v2361_v0, %v251_v12  ;;  %v1275_v25 = vadd.f32 %v2364_v2, %v762_v14 }
  0x40   : > { %1764 = vst [vmem:[%s2377_s25 + $0x158] sm:$0xff] %v1252_v18  ;;  %v253_v18 = vld [vmem:[%s2359_s22 + $0x230] sm:$0xff]  ;;  %v765_v23 = vmul.f32 %v2361_v0, %v252_v15  ;;  %v1276_v28 = vadd.f32 %v2364_v2, %v763_v17 }
  0x41   : > { %1765 = vst [vmem:[%s2377_s25 + $0x160] sm:$0xff] %v1253_v21  ;;  %v254_v21 = vld [vmem:[%s2359_s22 + $0x238] sm:$0xff]  ;;  %v766_v26 = vmul.f32 %v2361_v0, %v253_v18  ;;  %v1277_v31 = vadd.f32 %v2364_v2, %v764_v20 }
  0x42   : > { %1766 = vst [vmem:[%s2377_s25 + $0x168] sm:$0xff] %v1254_v24  ;;  %v255_v24 = vld [vmem:[%s2359_s22 + $0x240] sm:$0xff]  ;;  %v767_v29 = vmul.f32 %v2361_v0, %v254_v21  ;;  %v1278_v34 = vadd.f32 %v2364_v2, %v765_v23 }
  0x43   : > { %1767 = vst [vmem:[%s2377_s25 + $0x170] sm:$0xff] %v1255_v27  ;;  %v256_v27 = vld [vmem:[%s2359_s22 + $0x248] sm:$0xff]  ;;  %v768_v32 = vmul.f32 %v2361_v0, %v255_v24  ;;  %v1279_v37 = vadd.f32 %v2364_v2, %v766_v26 }
  0x44   : > { %1768 = vst [vmem:[%s2377_s25 + $0x178] sm:$0xff] %v1256_v30  ;;  %v257_v30 = vld [vmem:[%s2359_s22 + $0x250] sm:$0xff]  ;;  %v769_v35 = vmul.f32 %v2361_v0, %v256_v27  ;;  %v1280_v40 = vadd.f32 %v2364_v2, %v767_v29 }
  0x45   : > { %1769 = vst [vmem:[%s2377_s25 + $0x180] sm:$0xff] %v1257_v33  ;;  %v258_v33 = vld [vmem:[%s2359_s22 + $0x258] sm:$0xff]  ;;  %v770_v38 = vmul.f32 %v2361_v0, %v257_v30  ;;  %v1281_v43 = vadd.f32 %v2364_v2, %v768_v32 }
  0x46   : > { %1770 = vst [vmem:[%s2377_s25 + $0x188] sm:$0xff] %v1258_v36  ;;  %v259_v36 = vld [vmem:[%s2359_s22 + $0x260] sm:$0xff]  ;;  %v771_v41 = vmul.f32 %v2361_v0, %v258_v33  ;;  %v1282_v46 = vadd.f32 %v2364_v2, %v769_v35 }
  0x47   : > { %1771 = vst [vmem:[%s2377_s25 + $0x190] sm:$0xff] %v1259_v39  ;;  %v260_v39 = vld [vmem:[%s2359_s22 + $0x268] sm:$0xff]  ;;  %v772_v44 = vmul.f32 %v2361_v0, %v259_v36  ;;  %v1283_v49 = vadd.f32 %v2364_v2, %v770_v38 }
  0x48   : > { %1772 = vst [vmem:[%s2377_s25 + $0x198] sm:$0xff] %v1260_v42  ;;  %v261_v42 = vld [vmem:[%s2359_s22 + $0x270] sm:$0xff]  ;;  %v773_v47 = vmul.f32 %v2361_v0, %v260_v39  ;;  %v1284_v52 = vadd.f32 %v2364_v2, %v771_v41 }
  0x49   : > { %1773 = vst [vmem:[%s2377_s25 + $0x1a0] sm:$0xff] %v1261_v45  ;;  %v262_v45 = vld [vmem:[%s2359_s22 + $0x278] sm:$0xff]  ;;  %v774_v50 = vmul.f32 %v2361_v0, %v261_v42  ;;  %v1285_v55 = vadd.f32 %v2364_v2, %v772_v44 }
  0x4a   : > { %1774 = vst [vmem:[%s2377_s25 + $0x1a8] sm:$0xff] %v1262_v48  ;;  %v263_v48 = vld [vmem:[%s2359_s22 + $0x280] sm:$0xff]  ;;  %v775_v53 = vmul.f32 %v2361_v0, %v262_v45  ;;  %v1286_v58 = vadd.f32 %v2364_v2, %v773_v47 }
  0x4b   : > { %1775 = vst [vmem:[%s2377_s25 + $0x1b0] sm:$0xff] %v1263_v51  ;;  %v264_v51 = vld [vmem:[%s2359_s22 + $0x288] sm:$0xff]  ;;  %v776_v56 = vmul.f32 %v2361_v0, %v263_v48  ;;  %v1287_v61 = vadd.f32 %v2364_v2, %v774_v50 }
  0x4c   : > { %1776 = vst [vmem:[%s2377_s25 + $0x1b8] sm:$0xff] %v1264_v54  ;;  %v265_v54 = vld [vmem:[%s2359_s22 + $0x290] sm:$0xff]  ;;  %v777_v59 = vmul.f32 %v2361_v0, %v264_v51  ;;  %v1288_v1 = vadd.f32 %v2364_v2, %v775_v53 }
  0x4d   : > { %1777 = vst [vmem:[%s2377_s25 + $0x1c0] sm:$0xff] %v1265_v57  ;;  %v266_v57 = vld [vmem:[%s2359_s22 + $0x298] sm:$0xff]  ;;  %v778_v62 = vmul.f32 %v2361_v0, %v265_v54  ;;  %v1289_v5 = vadd.f32 %v2364_v2, %v776_v56 }
  0x4e   : > { %1778 = vst [vmem:[%s2377_s25 + $0x1c8] sm:$0xff] %v1266_v60  ;;  %v267_v60 = vld [vmem:[%s2359_s22 + $0x2a0] sm:$0xff]  ;;  %v779_v3 = vmul.f32 %v2361_v0, %v266_v57  ;;  %v1290_v8 = vadd.f32 %v2364_v2, %v777_v59 }
  0x4f   : > { %1779 = vst [vmem:[%s2377_s25 + $0x1d0] sm:$0xff] %v1267_v63  ;;  %v268_v63 = vld [vmem:[%s2359_s22 + $0x2a8] sm:$0xff]  ;;  %v780_v6 = vmul.f32 %v2361_v0, %v267_v60  ;;  %v1291_v11 = vadd.f32 %v2364_v2, %v778_v62 }
  0x50   : > { %1780 = vst [vmem:[%s2377_s25 + $0x1d8] sm:$0xff] %v1268_v4  ;;  %v269_v4 = vld [vmem:[%s2359_s22 + $0x2b0] sm:$0xff]  ;;  %v781_v9 = vmul.f32 %v2361_v0, %v268_v63  ;;  %v1292_v14 = vadd.f32 %v2364_v2, %v779_v3 }
  0x51   : > { %1781 = vst [vmem:[%s2377_s25 + $0x1e0] sm:$0xff] %v1269_v7  ;;  %v270_v7 = vld [vmem:[%s2359_s22 + $0x2b8] sm:$0xff]  ;;  %v782_v12 = vmul.f32 %v2361_v0, %v269_v4  ;;  %v1293_v17 = vadd.f32 %v2364_v2, %v780_v6 }
  0x52   : > { %1782 = vst [vmem:[%s2377_s25 + $0x1e8] sm:$0xff] %v1270_v10  ;;  %v271_v10 = vld [vmem:[%s2359_s22 + $0x2c0] sm:$0xff]  ;;  %v783_v15 = vmul.f32 %v2361_v0, %v270_v7  ;;  %v1294_v20 = vadd.f32 %v2364_v2, %v781_v9 }
  0x53   : > { %1783 = vst [vmem:[%s2377_s25 + $0x1f0] sm:$0xff] %v1271_v13  ;;  %v272_v13 = vld [vmem:[%s2359_s22 + $0x2c8] sm:$0xff]  ;;  %v784_v18 = vmul.f32 %v2361_v0, %v271_v10  ;;  %v1295_v23 = vadd.f32 %v2364_v2, %v782_v12 }
  0x54   : > { %1784 = vst [vmem:[%s2377_s25 + $0x1f8] sm:$0xff] %v1272_v16  ;;  %v273_v16 = vld [vmem:[%s2359_s22 + $0x2d0] sm:$0xff]  ;;  %v785_v21 = vmul.f32 %v2361_v0, %v272_v13  ;;  %v1296_v26 = vadd.f32 %v2364_v2, %v783_v15 }
  0x55   : > { %1785 = vst [vmem:[%s2377_s25 + $0x200] sm:$0xff] %v1273_v19  ;;  %v274_v19 = vld [vmem:[%s2359_s22 + $0x2d8] sm:$0xff]  ;;  %v786_v24 = vmul.f32 %v2361_v0, %v273_v16  ;;  %v1297_v29 = vadd.f32 %v2364_v2, %v784_v18 }
  0x56   : > { %1786 = vst [vmem:[%s2377_s25 + $0x208] sm:$0xff] %v1274_v22  ;;  %v275_v22 = vld [vmem:[%s2359_s22 + $0x2e0] sm:$0xff]  ;;  %v787_v27 = vmul.f32 %v2361_v0, %v274_v19  ;;  %v1298_v32 = vadd.f32 %v2364_v2, %v785_v21 }
  0x57   : > { %1787 = vst [vmem:[%s2377_s25 + $0x210] sm:$0xff] %v1275_v25  ;;  %v276_v25 = vld [vmem:[%s2359_s22 + $0x2e8] sm:$0xff]  ;;  %v788_v30 = vmul.f32 %v2361_v0, %v275_v22  ;;  %v1299_v35 = vadd.f32 %v2364_v2, %v786_v24 }
  0x58   : > { %1788 = vst [vmem:[%s2377_s25 + $0x218] sm:$0xff] %v1276_v28  ;;  %v277_v28 = vld [vmem:[%s2359_s22 + $0x2f0] sm:$0xff]  ;;  %v789_v33 = vmul.f32 %v2361_v0, %v276_v25  ;;  %v1300_v38 = vadd.f32 %v2364_v2, %v787_v27 }
  0x59   : > { %1789 = vst [vmem:[%s2377_s25 + $0x220] sm:$0xff] %v1277_v31  ;;  %v278_v31 = vld [vmem:[%s2359_s22 + $0x2f8] sm:$0xff]  ;;  %v790_v36 = vmul.f32 %v2361_v0, %v277_v28  ;;  %v1301_v41 = vadd.f32 %v2364_v2, %v788_v30 }
  0x5a   : > { %1790 = vst [vmem:[%s2377_s25 + $0x228] sm:$0xff] %v1278_v34  ;;  %v279_v34 = vld [vmem:[%s2359_s22 + $0x300] sm:$0xff]  ;;  %v791_v39 = vmul.f32 %v2361_v0, %v278_v31  ;;  %v1302_v44 = vadd.f32 %v2364_v2, %v789_v33 }
  0x5b   : > { %1791 = vst [vmem:[%s2377_s25 + $0x230] sm:$0xff] %v1279_v37  ;;  %v280_v37 = vld [vmem:[%s2359_s22 + $0x308] sm:$0xff]  ;;  %v792_v42 = vmul.f32 %v2361_v0, %v279_v34  ;;  %v1303_v47 = vadd.f32 %v2364_v2, %v790_v36 }
  0x5c   : > { %1792 = vst [vmem:[%s2377_s25 + $0x238] sm:$0xff] %v1280_v40  ;;  %v281_v40 = vld [vmem:[%s2359_s22 + $0x310] sm:$0xff]  ;;  %v793_v45 = vmul.f32 %v2361_v0, %v280_v37  ;;  %v1304_v50 = vadd.f32 %v2364_v2, %v791_v39 }
  0x5d   : > { %1793 = vst [vmem:[%s2377_s25 + $0x240] sm:$0xff] %v1281_v43  ;;  %v282_v43 = vld [vmem:[%s2359_s22 + $0x318] sm:$0xff]  ;;  %v794_v48 = vmul.f32 %v2361_v0, %v281_v40  ;;  %v1305_v53 = vadd.f32 %v2364_v2, %v792_v42 }
  0x5e   : > { %1794 = vst [vmem:[%s2377_s25 + $0x248] sm:$0xff] %v1282_v46  ;;  %v283_v46 = vld [vmem:[%s2359_s22 + $0x320] sm:$0xff]  ;;  %v795_v51 = vmul.f32 %v2361_v0, %v282_v43  ;;  %v1306_v56 = vadd.f32 %v2364_v2, %v793_v45 }
  0x5f   : > { %1795 = vst [vmem:[%s2377_s25 + $0x250] sm:$0xff] %v1283_v49  ;;  %v284_v49 = vld [vmem:[%s2359_s22 + $0x328] sm:$0xff]  ;;  %v796_v54 = vmul.f32 %v2361_v0, %v283_v46  ;;  %v1307_v59 = vadd.f32 %v2364_v2, %v794_v48 }
  0x60   : > { %1796 = vst [vmem:[%s2377_s25 + $0x258] sm:$0xff] %v1284_v52  ;;  %v285_v52 = vld [vmem:[%s2359_s22 + $0x330] sm:$0xff]  ;;  %v797_v57 = vmul.f32 %v2361_v0, %v284_v49  ;;  %v1308_v62 = vadd.f32 %v2364_v2, %v795_v51 }
  0x61   : > { %1797 = vst [vmem:[%s2377_s25 + $0x260] sm:$0xff] %v1285_v55  ;;  %v286_v55 = vld [vmem:[%s2359_s22 + $0x338] sm:$0xff]  ;;  %v798_v60 = vmul.f32 %v2361_v0, %v285_v52  ;;  %v1309_v3 = vadd.f32 %v2364_v2, %v796_v54 }
  0x62   : > { %1798 = vst [vmem:[%s2377_s25 + $0x268] sm:$0xff] %v1286_v58  ;;  %v287_v58 = vld [vmem:[%s2359_s22 + $0x340] sm:$0xff]  ;;  %v799_v63 = vmul.f32 %v2361_v0, %v286_v55  ;;  %v1310_v6 = vadd.f32 %v2364_v2, %v797_v57 }
  0x63   : > { %1799 = vst [vmem:[%s2377_s25 + $0x270] sm:$0xff] %v1287_v61  ;;  %v288_v61 = vld [vmem:[%s2359_s22 + $0x348] sm:$0xff]  ;;  %v800_v4 = vmul.f32 %v2361_v0, %v287_v58  ;;  %v1311_v9 = vadd.f32 %v2364_v2, %v798_v60 }
  0x64   : > { %1800 = vst [vmem:[%s2377_s25 + $0x278] sm:$0xff] %v1288_v1  ;;  %v289_v1 = vld [vmem:[%s2359_s22 + $0x350] sm:$0xff]  ;;  %v801_v7 = vmul.f32 %v2361_v0, %v288_v61  ;;  %v1312_v12 = vadd.f32 %v2364_v2, %v799_v63 }
  0x65   : > { %1801 = vst [vmem:[%s2377_s25 + $0x280] sm:$0xff] %v1289_v5  ;;  %v290_v5 = vld [vmem:[%s2359_s22 + $0x358] sm:$0xff]  ;;  %v802_v10 = vmul.f32 %v2361_v0, %v289_v1  ;;  %v1313_v15 = vadd.f32 %v2364_v2, %v800_v4 }
  0x66   : > { %1802 = vst [vmem:[%s2377_s25 + $0x288] sm:$0xff] %v1290_v8  ;;  %v291_v8 = vld [vmem:[%s2359_s22 + $0x360] sm:$0xff]  ;;  %v803_v13 = vmul.f32 %v2361_v0, %v290_v5  ;;  %v1314_v18 = vadd.f32 %v2364_v2, %v801_v7 }
  0x67   : > { %1803 = vst [vmem:[%s2377_s25 + $0x290] sm:$0xff] %v1291_v11  ;;  %v292_v11 = vld [vmem:[%s2359_s22 + $0x368] sm:$0xff]  ;;  %v804_v16 = vmul.f32 %v2361_v0, %v291_v8  ;;  %v1315_v21 = vadd.f32 %v2364_v2, %v802_v10 }
  0x68   : > { %1804 = vst [vmem:[%s2377_s25 + $0x298] sm:$0xff] %v1292_v14  ;;  %v293_v14 = vld [vmem:[%s2359_s22 + $0x370] sm:$0xff]  ;;  %v805_v19 = vmul.f32 %v2361_v0, %v292_v11  ;;  %v1316_v24 = vadd.f32 %v2364_v2, %v803_v13 }
  0x69   : > { %1805 = vst [vmem:[%s2377_s25 + $0x2a0] sm:$0xff] %v1293_v17  ;;  %v294_v17 = vld [vmem:[%s2359_s22 + $0x378] sm:$0xff]  ;;  %v806_v22 = vmul.f32 %v2361_v0, %v293_v14  ;;  %v1317_v27 = vadd.f32 %v2364_v2, %v804_v16 }
  0x6a   : > { %1806 = vst [vmem:[%s2377_s25 + $0x2a8] sm:$0xff] %v1294_v20  ;;  %v295_v20 = vld [vmem:[%s2359_s22 + $0x380] sm:$0xff]  ;;  %v807_v25 = vmul.f32 %v2361_v0, %v294_v17  ;;  %v1318_v30 = vadd.f32 %v2364_v2, %v805_v19 }
  0x6b   : > { %1807 = vst [vmem:[%s2377_s25 + $0x2b0] sm:$0xff] %v1295_v23  ;;  %v296_v23 = vld [vmem:[%s2359_s22 + $0x388] sm:$0xff]  ;;  %v808_v28 = vmul.f32 %v2361_v0, %v295_v20  ;;  %v1319_v33 = vadd.f32 %v2364_v2, %v806_v22 }
  0x6c   : > { %1808 = vst [vmem:[%s2377_s25 + $0x2b8] sm:$0xff] %v1296_v26  ;;  %v297_v26 = vld [vmem:[%s2359_s22 + $0x390] sm:$0xff]  ;;  %v809_v31 = vmul.f32 %v2361_v0, %v296_v23  ;;  %v1320_v36 = vadd.f32 %v2364_v2, %v807_v25 }
  0x6d   : > { %1809 = vst [vmem:[%s2377_s25 + $0x2c0] sm:$0xff] %v1297_v29  ;;  %v298_v29 = vld [vmem:[%s2359_s22 + $0x398] sm:$0xff]  ;;  %v810_v34 = vmul.f32 %v2361_v0, %v297_v26  ;;  %v1321_v39 = vadd.f32 %v2364_v2, %v808_v28 }
  0x6e   : > { %1810 = vst [vmem:[%s2377_s25 + $0x2c8] sm:$0xff] %v1298_v32  ;;  %v299_v32 = vld [vmem:[%s2359_s22 + $0x3a0] sm:$0xff]  ;;  %v811_v37 = vmul.f32 %v2361_v0, %v298_v29  ;;  %v1322_v42 = vadd.f32 %v2364_v2, %v809_v31 }
  0x6f   : > { %1811 = vst [vmem:[%s2377_s25 + $0x2d0] sm:$0xff] %v1299_v35  ;;  %v300_v35 = vld [vmem:[%s2359_s22 + $0x3a8] sm:$0xff]  ;;  %v812_v40 = vmul.f32 %v2361_v0, %v299_v32  ;;  %v1323_v45 = vadd.f32 %v2364_v2, %v810_v34 }
  0x70   : > { %1812 = vst [vmem:[%s2377_s25 + $0x2d8] sm:$0xff] %v1300_v38  ;;  %v301_v38 = vld [vmem:[%s2359_s22 + $0x3b0] sm:$0xff]  ;;  %v813_v43 = vmul.f32 %v2361_v0, %v300_v35  ;;  %v1324_v48 = vadd.f32 %v2364_v2, %v811_v37 }
  0x71   : > { %1813 = vst [vmem:[%s2377_s25 + $0x2e0] sm:$0xff] %v1301_v41  ;;  %v302_v41 = vld [vmem:[%s2359_s22 + $0x3b8] sm:$0xff]  ;;  %v814_v46 = vmul.f32 %v2361_v0, %v301_v38  ;;  %v1325_v51 = vadd.f32 %v2364_v2, %v812_v40 }
  0x72   : > { %1814 = vst [vmem:[%s2377_s25 + $0x2e8] sm:$0xff] %v1302_v44  ;;  %v303_v44 = vld [vmem:[%s2359_s22 + $0x3c0] sm:$0xff]  ;;  %v815_v49 = vmul.f32 %v2361_v0, %v302_v41  ;;  %v1326_v54 = vadd.f32 %v2364_v2, %v813_v43 }
  0x73   : > { %1815 = vst [vmem:[%s2377_s25 + $0x2f0] sm:$0xff] %v1303_v47  ;;  %v304_v47 = vld [vmem:[%s2359_s22 + $0x3c8] sm:$0xff]  ;;  %v816_v52 = vmul.f32 %v2361_v0, %v303_v44  ;;  %v1327_v57 = vadd.f32 %v2364_v2, %v814_v46 }
  0x74   : > { %1816 = vst [vmem:[%s2377_s25 + $0x2f8] sm:$0xff] %v1304_v50  ;;  %v305_v50 = vld [vmem:[%s2359_s22 + $0x3d0] sm:$0xff]  ;;  %v817_v55 = vmul.f32 %v2361_v0, %v304_v47  ;;  %v1328_v60 = vadd.f32 %v2364_v2, %v815_v49 }
  0x75   : > { %1817 = vst [vmem:[%s2377_s25 + $0x300] sm:$0xff] %v1305_v53  ;;  %v306_v53 = vld [vmem:[%s2359_s22 + $0x3d8] sm:$0xff]  ;;  %v818_v58 = vmul.f32 %v2361_v0, %v305_v50  ;;  %v1329_v63 = vadd.f32 %v2364_v2, %v816_v52 }
  0x76   : > { %1818 = vst [vmem:[%s2377_s25 + $0x308] sm:$0xff] %v1306_v56  ;;  %v307_v56 = vld [vmem:[%s2359_s22 + $0x3e0] sm:$0xff]  ;;  %v819_v61 = vmul.f32 %v2361_v0, %v306_v53  ;;  %v1330_v4 = vadd.f32 %v2364_v2, %v817_v55 }
  0x77   : > { %1819 = vst [vmem:[%s2377_s25 + $0x310] sm:$0xff] %v1307_v59  ;;  %v308_v59 = vld [vmem:[%s2359_s22 + $0x3e8] sm:$0xff]  ;;  %v820_v1 = vmul.f32 %v2361_v0, %v307_v56  ;;  %v1331_v7 = vadd.f32 %v2364_v2, %v818_v58 }
  0x78   : > { %1820 = vst [vmem:[%s2377_s25 + $0x318] sm:$0xff] %v1308_v62  ;;  %v309_v62 = vld [vmem:[%s2359_s22 + $0x3f0] sm:$0xff]  ;;  %v821_v5 = vmul.f32 %v2361_v0, %v308_v59  ;;  %v1332_v10 = vadd.f32 %v2364_v2, %v819_v61 }
  0x79   : > { %1821 = vst [vmem:[%s2377_s25 + $0x320] sm:$0xff] %v1309_v3  ;;  %v310_v3 = vld [vmem:[%s2359_s22 + $0x3f8] sm:$0xff]  ;;  %v822_v8 = vmul.f32 %v2361_v0, %v309_v62  ;;  %v1333_v13 = vadd.f32 %v2364_v2, %v820_v1 }
  0x7a   : > { %1822 = vst [vmem:[%s2377_s25 + $0x328] sm:$0xff] %v1310_v6  ;;  %v311_v6 = vld [vmem:[%s2359_s22 + $0x400] sm:$0xff]  ;;  %v823_v11 = vmul.f32 %v2361_v0, %v310_v3  ;;  %v1334_v16 = vadd.f32 %v2364_v2, %v821_v5 }
  0x7b   : > { %1823 = vst [vmem:[%s2377_s25 + $0x330] sm:$0xff] %v1311_v9  ;;  %v312_v9 = vld [vmem:[%s2359_s22 + $0x408] sm:$0xff]  ;;  %v824_v14 = vmul.f32 %v2361_v0, %v311_v6  ;;  %v1335_v19 = vadd.f32 %v2364_v2, %v822_v8 }
  0x7c   : > { %1824 = vst [vmem:[%s2377_s25 + $0x338] sm:$0xff] %v1312_v12  ;;  %v313_v12 = vld [vmem:[%s2359_s22 + $0x410] sm:$0xff]  ;;  %v825_v17 = vmul.f32 %v2361_v0, %v312_v9  ;;  %v1336_v22 = vadd.f32 %v2364_v2, %v823_v11 }
  0x7d   : > { %1825 = vst [vmem:[%s2377_s25 + $0x340] sm:$0xff] %v1313_v15  ;;  %v314_v15 = vld [vmem:[%s2359_s22 + $0x418] sm:$0xff]  ;;  %v826_v20 = vmul.f32 %v2361_v0, %v313_v12  ;;  %v1337_v25 = vadd.f32 %v2364_v2, %v824_v14 }
  0x7e   : > { %1826 = vst [vmem:[%s2377_s25 + $0x348] sm:$0xff] %v1314_v18  ;;  %v315_v18 = vld [vmem:[%s2359_s22 + $0x420] sm:$0xff]  ;;  %v827_v23 = vmul.f32 %v2361_v0, %v314_v15  ;;  %v1338_v28 = vadd.f32 %v2364_v2, %v825_v17 }
  0x7f   : > { %1827 = vst [vmem:[%s2377_s25 + $0x350] sm:$0xff] %v1315_v21  ;;  %v316_v21 = vld [vmem:[%s2359_s22 + $0x428] sm:$0xff]  ;;  %v828_v26 = vmul.f32 %v2361_v0, %v315_v18  ;;  %v1339_v31 = vadd.f32 %v2364_v2, %v826_v20 }
  0x80   : > { %1828 = vst [vmem:[%s2377_s25 + $0x358] sm:$0xff] %v1316_v24  ;;  %v317_v24 = vld [vmem:[%s2359_s22 + $0x430] sm:$0xff]  ;;  %v829_v29 = vmul.f32 %v2361_v0, %v316_v21  ;;  %v1340_v34 = vadd.f32 %v2364_v2, %v827_v23 }
  0x81   : > { %1829 = vst [vmem:[%s2377_s25 + $0x360] sm:$0xff] %v1317_v27  ;;  %v318_v27 = vld [vmem:[%s2359_s22 + $0x438] sm:$0xff]  ;;  %v830_v32 = vmul.f32 %v2361_v0, %v317_v24  ;;  %v1341_v37 = vadd.f32 %v2364_v2, %v828_v26 }
  0x82   : > { %1830 = vst [vmem:[%s2377_s25 + $0x368] sm:$0xff] %v1318_v30  ;;  %v319_v30 = vld [vmem:[%s2359_s22 + $0x440] sm:$0xff]  ;;  %v831_v35 = vmul.f32 %v2361_v0, %v318_v27  ;;  %v1342_v40 = vadd.f32 %v2364_v2, %v829_v29 }
  0x83   : > { %1831 = vst [vmem:[%s2377_s25 + $0x370] sm:$0xff] %v1319_v33  ;;  %v320_v33 = vld [vmem:[%s2359_s22 + $0x448] sm:$0xff]  ;;  %v832_v38 = vmul.f32 %v2361_v0, %v319_v30  ;;  %v1343_v43 = vadd.f32 %v2364_v2, %v830_v32 }
  0x84   : > { %1832 = vst [vmem:[%s2377_s25 + $0x378] sm:$0xff] %v1320_v36  ;;  %v321_v36 = vld [vmem:[%s2359_s22 + $0x450] sm:$0xff]  ;;  %v833_v41 = vmul.f32 %v2361_v0, %v320_v33  ;;  %v1344_v46 = vadd.f32 %v2364_v2, %v831_v35 }
  0x85   : > { %1833 = vst [vmem:[%s2377_s25 + $0x380] sm:$0xff] %v1321_v39  ;;  %v322_v39 = vld [vmem:[%s2359_s22 + $0x458] sm:$0xff]  ;;  %v834_v44 = vmul.f32 %v2361_v0, %v321_v36  ;;  %v1345_v49 = vadd.f32 %v2364_v2, %v832_v38 }
  0x86   : > { %1834 = vst [vmem:[%s2377_s25 + $0x388] sm:$0xff] %v1322_v42  ;;  %v323_v42 = vld [vmem:[%s2359_s22 + $0x460] sm:$0xff]  ;;  %v835_v47 = vmul.f32 %v2361_v0, %v322_v39  ;;  %v1346_v52 = vadd.f32 %v2364_v2, %v833_v41 }
  0x87   : > { %1835 = vst [vmem:[%s2377_s25 + $0x390] sm:$0xff] %v1323_v45  ;;  %v324_v45 = vld [vmem:[%s2359_s22 + $0x468] sm:$0xff]  ;;  %v836_v50 = vmul.f32 %v2361_v0, %v323_v42  ;;  %v1347_v55 = vadd.f32 %v2364_v2, %v834_v44 }
  0x88   : > { %1836 = vst [vmem:[%s2377_s25 + $0x398] sm:$0xff] %v1324_v48  ;;  %v325_v48 = vld [vmem:[%s2359_s22 + $0x470] sm:$0xff]  ;;  %v837_v53 = vmul.f32 %v2361_v0, %v324_v45  ;;  %v1348_v58 = vadd.f32 %v2364_v2, %v835_v47 }
  0x89   : > { %1837 = vst [vmem:[%s2377_s25 + $0x3a0] sm:$0xff] %v1325_v51  ;;  %v326_v51 = vld [vmem:[%s2359_s22 + $0x478] sm:$0xff]  ;;  %v838_v56 = vmul.f32 %v2361_v0, %v325_v48  ;;  %v1349_v61 = vadd.f32 %v2364_v2, %v836_v50 }
  0x8a   : > { %1838 = vst [vmem:[%s2377_s25 + $0x3a8] sm:$0xff] %v1326_v54  ;;  %v327_v54 = vld [vmem:[%s2359_s22 + $0x480] sm:$0xff]  ;;  %v839_v59 = vmul.f32 %v2361_v0, %v326_v51  ;;  %v1350_v1 = vadd.f32 %v2364_v2, %v837_v53 }
  0x8b   : > { %1839 = vst [vmem:[%s2377_s25 + $0x3b0] sm:$0xff] %v1327_v57  ;;  %v328_v57 = vld [vmem:[%s2359_s22 + $0x488] sm:$0xff]  ;;  %v840_v62 = vmul.f32 %v2361_v0, %v327_v54  ;;  %v1351_v5 = vadd.f32 %v2364_v2, %v838_v56 }
  0x8c   : > { %1840 = vst [vmem:[%s2377_s25 + $0x3b8] sm:$0xff] %v1328_v60  ;;  %v329_v60 = vld [vmem:[%s2359_s22 + $0x490] sm:$0xff]  ;;  %v841_v3 = vmul.f32 %v2361_v0, %v328_v57  ;;  %v1352_v8 = vadd.f32 %v2364_v2, %v839_v59 }
  0x8d   : > { %1841 = vst [vmem:[%s2377_s25 + $0x3c0] sm:$0xff] %v1329_v63  ;;  %v330_v63 = vld [vmem:[%s2359_s22 + $0x498] sm:$0xff]  ;;  %v842_v6 = vmul.f32 %v2361_v0, %v329_v60  ;;  %v1353_v11 = vadd.f32 %v2364_v2, %v840_v62 }
  0x8e   : > { %1842 = vst [vmem:[%s2377_s25 + $0x3c8] sm:$0xff] %v1330_v4  ;;  %v331_v4 = vld [vmem:[%s2359_s22 + $0x4a0] sm:$0xff]  ;;  %v843_v9 = vmul.f32 %v2361_v0, %v330_v63  ;;  %v1354_v14 = vadd.f32 %v2364_v2, %v841_v3 }
  0x8f   : > { %1843 = vst [vmem:[%s2377_s25 + $0x3d0] sm:$0xff] %v1331_v7  ;;  %v332_v7 = vld [vmem:[%s2359_s22 + $0x4a8] sm:$0xff]  ;;  %v844_v12 = vmul.f32 %v2361_v0, %v331_v4  ;;  %v1355_v17 = vadd.f32 %v2364_v2, %v842_v6 }
  0x90   : > { %1844 = vst [vmem:[%s2377_s25 + $0x3d8] sm:$0xff] %v1332_v10  ;;  %v333_v10 = vld [vmem:[%s2359_s22 + $0x4b0] sm:$0xff]  ;;  %v845_v15 = vmul.f32 %v2361_v0, %v332_v7  ;;  %v1356_v20 = vadd.f32 %v2364_v2, %v843_v9 }
  0x91   : > { %1845 = vst [vmem:[%s2377_s25 + $0x3e0] sm:$0xff] %v1333_v13  ;;  %v334_v13 = vld [vmem:[%s2359_s22 + $0x4b8] sm:$0xff]  ;;  %v846_v18 = vmul.f32 %v2361_v0, %v333_v10  ;;  %v1357_v23 = vadd.f32 %v2364_v2, %v844_v12 }
  0x92   : > { %1846 = vst [vmem:[%s2377_s25 + $0x3e8] sm:$0xff] %v1334_v16  ;;  %v335_v16 = vld [vmem:[%s2359_s22 + $0x4c0] sm:$0xff]  ;;  %v847_v21 = vmul.f32 %v2361_v0, %v334_v13  ;;  %v1358_v26 = vadd.f32 %v2364_v2, %v845_v15 }
  0x93   : > { %1847 = vst [vmem:[%s2377_s25 + $0x3f0] sm:$0xff] %v1335_v19  ;;  %v336_v19 = vld [vmem:[%s2359_s22 + $0x4c8] sm:$0xff]  ;;  %v848_v24 = vmul.f32 %v2361_v0, %v335_v16  ;;  %v1359_v29 = vadd.f32 %v2364_v2, %v846_v18 }
  0x94   : > { %1848 = vst [vmem:[%s2377_s25 + $0x3f8] sm:$0xff] %v1336_v22  ;;  %v337_v22 = vld [vmem:[%s2359_s22 + $0x4d0] sm:$0xff]  ;;  %v849_v27 = vmul.f32 %v2361_v0, %v336_v19  ;;  %v1360_v32 = vadd.f32 %v2364_v2, %v847_v21 }
  0x95   : > { %1849 = vst [vmem:[%s2377_s25 + $0x400] sm:$0xff] %v1337_v25  ;;  %v338_v25 = vld [vmem:[%s2359_s22 + $0x4d8] sm:$0xff]  ;;  %v850_v30 = vmul.f32 %v2361_v0, %v337_v22  ;;  %v1361_v35 = vadd.f32 %v2364_v2, %v848_v24 }
  0x96   : > { %1850 = vst [vmem:[%s2377_s25 + $0x408] sm:$0xff] %v1338_v28  ;;  %v339_v28 = vld [vmem:[%s2359_s22 + $0x4e0] sm:$0xff]  ;;  %v851_v33 = vmul.f32 %v2361_v0, %v338_v25  ;;  %v1362_v38 = vadd.f32 %v2364_v2, %v849_v27 }
  0x97   : > { %1851 = vst [vmem:[%s2377_s25 + $0x410] sm:$0xff] %v1339_v31  ;;  %v340_v31 = vld [vmem:[%s2359_s22 + $0x4e8] sm:$0xff]  ;;  %v852_v36 = vmul.f32 %v2361_v0, %v339_v28  ;;  %v1363_v41 = vadd.f32 %v2364_v2, %v850_v30 }
  0x98   : > { %1852 = vst [vmem:[%s2377_s25 + $0x418] sm:$0xff] %v1340_v34  ;;  %v341_v34 = vld [vmem:[%s2359_s22 + $0x4f0] sm:$0xff]  ;;  %v853_v39 = vmul.f32 %v2361_v0, %v340_v31  ;;  %v1364_v44 = vadd.f32 %v2364_v2, %v851_v33 }
  0x99   : > { %1853 = vst [vmem:[%s2377_s25 + $0x420] sm:$0xff] %v1341_v37  ;;  %v342_v37 = vld [vmem:[%s2359_s22 + $0x4f8] sm:$0xff]  ;;  %v854_v42 = vmul.f32 %v2361_v0, %v341_v34  ;;  %v1365_v47 = vadd.f32 %v2364_v2, %v852_v36 }
  0x9a   : > { %1854 = vst [vmem:[%s2377_s25 + $0x428] sm:$0xff] %v1342_v40  ;;  %v343_v40 = vld [vmem:[%s2359_s22 + $0x500] sm:$0xff]  ;;  %v855_v45 = vmul.f32 %v2361_v0, %v342_v37  ;;  %v1366_v50 = vadd.f32 %v2364_v2, %v853_v39 }
  0x9b   : > { %1855 = vst [vmem:[%s2377_s25 + $0x430] sm:$0xff] %v1343_v43  ;;  %v344_v43 = vld [vmem:[%s2359_s22 + $0x508] sm:$0xff]  ;;  %v856_v48 = vmul.f32 %v2361_v0, %v343_v40  ;;  %v1367_v53 = vadd.f32 %v2364_v2, %v854_v42 }
  0x9c   : > { %1856 = vst [vmem:[%s2377_s25 + $0x438] sm:$0xff] %v1344_v46  ;;  %v345_v46 = vld [vmem:[%s2359_s22 + $0x510] sm:$0xff]  ;;  %v857_v51 = vmul.f32 %v2361_v0, %v344_v43  ;;  %v1368_v56 = vadd.f32 %v2364_v2, %v855_v45 }
  0x9d   : > { %1857 = vst [vmem:[%s2377_s25 + $0x440] sm:$0xff] %v1345_v49  ;;  %v346_v49 = vld [vmem:[%s2359_s22 + $0x518] sm:$0xff]  ;;  %v858_v54 = vmul.f32 %v2361_v0, %v345_v46  ;;  %v1369_v59 = vadd.f32 %v2364_v2, %v856_v48 }
  0x9e   : > { %1858 = vst [vmem:[%s2377_s25 + $0x448] sm:$0xff] %v1346_v52  ;;  %v347_v52 = vld [vmem:[%s2359_s22 + $0x520] sm:$0xff]  ;;  %v859_v57 = vmul.f32 %v2361_v0, %v346_v49  ;;  %v1370_v62 = vadd.f32 %v2364_v2, %v857_v51 }
  0x9f   : > { %1859 = vst [vmem:[%s2377_s25 + $0x450] sm:$0xff] %v1347_v55  ;;  %v348_v55 = vld [vmem:[%s2359_s22 + $0x528] sm:$0xff]  ;;  %v860_v60 = vmul.f32 %v2361_v0, %v347_v52  ;;  %v1371_v3 = vadd.f32 %v2364_v2, %v858_v54 }
  0xa0   : > { %1860 = vst [vmem:[%s2377_s25 + $0x458] sm:$0xff] %v1348_v58  ;;  %v349_v58 = vld [vmem:[%s2359_s22 + $0x530] sm:$0xff]  ;;  %v861_v63 = vmul.f32 %v2361_v0, %v348_v55  ;;  %v1372_v6 = vadd.f32 %v2364_v2, %v859_v57 }
  0xa1   : > { %1861 = vst [vmem:[%s2377_s25 + $0x460] sm:$0xff] %v1349_v61  ;;  %v350_v61 = vld [vmem:[%s2359_s22 + $0x538] sm:$0xff]  ;;  %v862_v4 = vmul.f32 %v2361_v0, %v349_v58  ;;  %v1373_v9 = vadd.f32 %v2364_v2, %v860_v60 }
  0xa2   : > { %1862 = vst [vmem:[%s2377_s25 + $0x468] sm:$0xff] %v1350_v1  ;;  %v351_v1 = vld [vmem:[%s2359_s22 + $0x540] sm:$0xff]  ;;  %v863_v7 = vmul.f32 %v2361_v0, %v350_v61  ;;  %v1374_v12 = vadd.f32 %v2364_v2, %v861_v63 }
  0xa3   : > { %1863 = vst [vmem:[%s2377_s25 + $0x470] sm:$0xff] %v1351_v5  ;;  %v352_v5 = vld [vmem:[%s2359_s22 + $0x548] sm:$0xff]  ;;  %v864_v10 = vmul.f32 %v2361_v0, %v351_v1  ;;  %v1375_v15 = vadd.f32 %v2364_v2, %v862_v4 }
  0xa4   : > { %1864 = vst [vmem:[%s2377_s25 + $0x478] sm:$0xff] %v1352_v8  ;;  %v353_v8 = vld [vmem:[%s2359_s22 + $0x550] sm:$0xff]  ;;  %v865_v13 = vmul.f32 %v2361_v0, %v352_v5  ;;  %v1376_v18 = vadd.f32 %v2364_v2, %v863_v7 }
  0xa5   : > { %1865 = vst [vmem:[%s2377_s25 + $0x480] sm:$0xff] %v1353_v11  ;;  %v354_v11 = vld [vmem:[%s2359_s22 + $0x558] sm:$0xff]  ;;  %v866_v16 = vmul.f32 %v2361_v0, %v353_v8  ;;  %v1377_v21 = vadd.f32 %v2364_v2, %v864_v10 }
  0xa6   : > { %1866 = vst [vmem:[%s2377_s25 + $0x488] sm:$0xff] %v1354_v14  ;;  %v355_v14 = vld [vmem:[%s2359_s22 + $0x560] sm:$0xff]  ;;  %v867_v19 = vmul.f32 %v2361_v0, %v354_v11  ;;  %v1378_v24 = vadd.f32 %v2364_v2, %v865_v13 }
  0xa7   : > { %1867 = vst [vmem:[%s2377_s25 + $0x490] sm:$0xff] %v1355_v17  ;;  %v356_v17 = vld [vmem:[%s2359_s22 + $0x568] sm:$0xff]  ;;  %v868_v22 = vmul.f32 %v2361_v0, %v355_v14  ;;  %v1379_v27 = vadd.f32 %v2364_v2, %v866_v16 }
  0xa8   : > { %1868 = vst [vmem:[%s2377_s25 + $0x498] sm:$0xff] %v1356_v20  ;;  %v357_v20 = vld [vmem:[%s2359_s22 + $0x570] sm:$0xff]  ;;  %v869_v25 = vmul.f32 %v2361_v0, %v356_v17  ;;  %v1380_v30 = vadd.f32 %v2364_v2, %v867_v19 }
  0xa9   : > { %1869 = vst [vmem:[%s2377_s25 + $0x4a0] sm:$0xff] %v1357_v23  ;;  %v358_v23 = vld [vmem:[%s2359_s22 + $0x578] sm:$0xff]  ;;  %v870_v28 = vmul.f32 %v2361_v0, %v357_v20  ;;  %v1381_v33 = vadd.f32 %v2364_v2, %v868_v22 }
  0xaa   : > { %1870 = vst [vmem:[%s2377_s25 + $0x4a8] sm:$0xff] %v1358_v26  ;;  %v359_v26 = vld [vmem:[%s2359_s22 + $0x580] sm:$0xff]  ;;  %v871_v31 = vmul.f32 %v2361_v0, %v358_v23  ;;  %v1382_v36 = vadd.f32 %v2364_v2, %v869_v25 }
  0xab   : > { %1871 = vst [vmem:[%s2377_s25 + $0x4b0] sm:$0xff] %v1359_v29  ;;  %v360_v29 = vld [vmem:[%s2359_s22 + $0x588] sm:$0xff]  ;;  %v872_v34 = vmul.f32 %v2361_v0, %v359_v26  ;;  %v1383_v39 = vadd.f32 %v2364_v2, %v870_v28 }
  0xac   : > { %1872 = vst [vmem:[%s2377_s25 + $0x4b8] sm:$0xff] %v1360_v32  ;;  %v361_v32 = vld [vmem:[%s2359_s22 + $0x590] sm:$0xff]  ;;  %v873_v37 = vmul.f32 %v2361_v0, %v360_v29  ;;  %v1384_v42 = vadd.f32 %v2364_v2, %v871_v31 }
  0xad   : > { %1873 = vst [vmem:[%s2377_s25 + $0x4c0] sm:$0xff] %v1361_v35  ;;  %v362_v35 = vld [vmem:[%s2359_s22 + $0x598] sm:$0xff]  ;;  %v874_v40 = vmul.f32 %v2361_v0, %v361_v32  ;;  %v1385_v45 = vadd.f32 %v2364_v2, %v872_v34 }
  0xae   : > { %1874 = vst [vmem:[%s2377_s25 + $0x4c8] sm:$0xff] %v1362_v38  ;;  %v363_v38 = vld [vmem:[%s2359_s22 + $0x5a0] sm:$0xff]  ;;  %v875_v43 = vmul.f32 %v2361_v0, %v362_v35  ;;  %v1386_v48 = vadd.f32 %v2364_v2, %v873_v37 }
  0xaf   : > { %1875 = vst [vmem:[%s2377_s25 + $0x4d0] sm:$0xff] %v1363_v41  ;;  %v364_v41 = vld [vmem:[%s2359_s22 + $0x5a8] sm:$0xff]  ;;  %v876_v46 = vmul.f32 %v2361_v0, %v363_v38  ;;  %v1387_v51 = vadd.f32 %v2364_v2, %v874_v40 }
  0xb0   : > { %1876 = vst [vmem:[%s2377_s25 + $0x4d8] sm:$0xff] %v1364_v44  ;;  %v365_v44 = vld [vmem:[%s2359_s22 + $0x5b0] sm:$0xff]  ;;  %v877_v49 = vmul.f32 %v2361_v0, %v364_v41  ;;  %v1388_v54 = vadd.f32 %v2364_v2, %v875_v43 }
  0xb1   : > { %1877 = vst [vmem:[%s2377_s25 + $0x4e0] sm:$0xff] %v1365_v47  ;;  %v366_v47 = vld [vmem:[%s2359_s22 + $0x5b8] sm:$0xff]  ;;  %v878_v52 = vmul.f32 %v2361_v0, %v365_v44  ;;  %v1389_v57 = vadd.f32 %v2364_v2, %v876_v46 }
  0xb2   : > { %1878 = vst [vmem:[%s2377_s25 + $0x4e8] sm:$0xff] %v1366_v50  ;;  %v367_v50 = vld [vmem:[%s2359_s22 + $0x5c0] sm:$0xff]  ;;  %v879_v55 = vmul.f32 %v2361_v0, %v366_v47  ;;  %v1390_v60 = vadd.f32 %v2364_v2, %v877_v49 }
  0xb3   : > { %1879 = vst [vmem:[%s2377_s25 + $0x4f0] sm:$0xff] %v1367_v53  ;;  %v368_v53 = vld [vmem:[%s2359_s22 + $0x5c8] sm:$0xff]  ;;  %v880_v58 = vmul.f32 %v2361_v0, %v367_v50  ;;  %v1391_v63 = vadd.f32 %v2364_v2, %v878_v52 }
  0xb4   : > { %1880 = vst [vmem:[%s2377_s25 + $0x4f8] sm:$0xff] %v1368_v56  ;;  %v369_v56 = vld [vmem:[%s2359_s22 + $0x5d0] sm:$0xff]  ;;  %v881_v61 = vmul.f32 %v2361_v0, %v368_v53  ;;  %v1392_v4 = vadd.f32 %v2364_v2, %v879_v55 }
  0xb5   : > { %1881 = vst [vmem:[%s2377_s25 + $0x500] sm:$0xff] %v1369_v59  ;;  %v370_v59 = vld [vmem:[%s2359_s22 + $0x5d8] sm:$0xff]  ;;  %v882_v1 = vmul.f32 %v2361_v0, %v369_v56  ;;  %v1393_v7 = vadd.f32 %v2364_v2, %v880_v58 }
  0xb6   : > { %1882 = vst [vmem:[%s2377_s25 + $0x508] sm:$0xff] %v1370_v62  ;;  %v371_v62 = vld [vmem:[%s2359_s22 + $0x5e0] sm:$0xff]  ;;  %v883_v5 = vmul.f32 %v2361_v0, %v370_v59  ;;  %v1394_v10 = vadd.f32 %v2364_v2, %v881_v61 }
  0xb7   : > { %1883 = vst [vmem:[%s2377_s25 + $0x510] sm:$0xff] %v1371_v3  ;;  %v372_v3 = vld [vmem:[%s2359_s22 + $0x5e8] sm:$0xff]  ;;  %v884_v8 = vmul.f32 %v2361_v0, %v371_v62  ;;  %v1395_v13 = vadd.f32 %v2364_v2, %v882_v1 }
  0xb8   : > { %1884 = vst [vmem:[%s2377_s25 + $0x518] sm:$0xff] %v1372_v6  ;;  %v373_v6 = vld [vmem:[%s2359_s22 + $0x5f0] sm:$0xff]  ;;  %v885_v11 = vmul.f32 %v2361_v0, %v372_v3  ;;  %v1396_v16 = vadd.f32 %v2364_v2, %v883_v5 }
  0xb9   : > { %1885 = vst [vmem:[%s2377_s25 + $0x520] sm:$0xff] %v1373_v9  ;;  %v374_v9 = vld [vmem:[%s2359_s22 + $0x5f8] sm:$0xff]  ;;  %v886_v14 = vmul.f32 %v2361_v0, %v373_v6  ;;  %v1397_v19 = vadd.f32 %v2364_v2, %v884_v8 }
  0xba   : > { %1886 = vst [vmem:[%s2377_s25 + $0x528] sm:$0xff] %v1374_v12  ;;  %v375_v12 = vld [vmem:[%s2359_s22 + $0x600] sm:$0xff]  ;;  %v887_v17 = vmul.f32 %v2361_v0, %v374_v9  ;;  %v1398_v22 = vadd.f32 %v2364_v2, %v885_v11 }
  0xbb   : > { %1887 = vst [vmem:[%s2377_s25 + $0x530] sm:$0xff] %v1375_v15  ;;  %v376_v15 = vld [vmem:[%s2359_s22 + $0x608] sm:$0xff]  ;;  %v888_v20 = vmul.f32 %v2361_v0, %v375_v12  ;;  %v1399_v25 = vadd.f32 %v2364_v2, %v886_v14 }
  0xbc   : > { %1888 = vst [vmem:[%s2377_s25 + $0x538] sm:$0xff] %v1376_v18  ;;  %v377_v18 = vld [vmem:[%s2359_s22 + $0x610] sm:$0xff]  ;;  %v889_v23 = vmul.f32 %v2361_v0, %v376_v15  ;;  %v1400_v28 = vadd.f32 %v2364_v2, %v887_v17 }
  0xbd   : > { %1889 = vst [vmem:[%s2377_s25 + $0x540] sm:$0xff] %v1377_v21  ;;  %v378_v21 = vld [vmem:[%s2359_s22 + $0x618] sm:$0xff]  ;;  %v890_v26 = vmul.f32 %v2361_v0, %v377_v18  ;;  %v1401_v31 = vadd.f32 %v2364_v2, %v888_v20 }
  0xbe   : > { %1890 = vst [vmem:[%s2377_s25 + $0x548] sm:$0xff] %v1378_v24  ;;  %v379_v24 = vld [vmem:[%s2359_s22 + $0x620] sm:$0xff]  ;;  %v891_v29 = vmul.f32 %v2361_v0, %v378_v21  ;;  %v1402_v34 = vadd.f32 %v2364_v2, %v889_v23 }
  0xbf   : > { %1891 = vst [vmem:[%s2377_s25 + $0x550] sm:$0xff] %v1379_v27  ;;  %v380_v27 = vld [vmem:[%s2359_s22 + $0x628] sm:$0xff]  ;;  %v892_v32 = vmul.f32 %v2361_v0, %v379_v24  ;;  %v1403_v37 = vadd.f32 %v2364_v2, %v890_v26 }
  0xc0   : > { %1892 = vst [vmem:[%s2377_s25 + $0x558] sm:$0xff] %v1380_v30  ;;  %v381_v30 = vld [vmem:[%s2359_s22 + $0x630] sm:$0xff]  ;;  %v893_v35 = vmul.f32 %v2361_v0, %v380_v27  ;;  %v1404_v40 = vadd.f32 %v2364_v2, %v891_v29 }
  0xc1   : > { %1893 = vst [vmem:[%s2377_s25 + $0x560] sm:$0xff] %v1381_v33  ;;  %v382_v33 = vld [vmem:[%s2359_s22 + $0x638] sm:$0xff]  ;;  %v894_v38 = vmul.f32 %v2361_v0, %v381_v30  ;;  %v1405_v43 = vadd.f32 %v2364_v2, %v892_v32 }
  0xc2   : > { %1894 = vst [vmem:[%s2377_s25 + $0x568] sm:$0xff] %v1382_v36  ;;  %v383_v36 = vld [vmem:[%s2359_s22 + $0x640] sm:$0xff]  ;;  %v895_v41 = vmul.f32 %v2361_v0, %v382_v33  ;;  %v1406_v46 = vadd.f32 %v2364_v2, %v893_v35 }
  0xc3   : > { %1895 = vst [vmem:[%s2377_s25 + $0x570] sm:$0xff] %v1383_v39  ;;  %v384_v39 = vld [vmem:[%s2359_s22 + $0x648] sm:$0xff]  ;;  %v896_v44 = vmul.f32 %v2361_v0, %v383_v36  ;;  %v1407_v49 = vadd.f32 %v2364_v2, %v894_v38 }
  0xc4   : > { %1896 = vst [vmem:[%s2377_s25 + $0x578] sm:$0xff] %v1384_v42  ;;  %v385_v42 = vld [vmem:[%s2359_s22 + $0x650] sm:$0xff]  ;;  %v897_v47 = vmul.f32 %v2361_v0, %v384_v39  ;;  %v1408_v52 = vadd.f32 %v2364_v2, %v895_v41 }
  0xc5   : > { %1897 = vst [vmem:[%s2377_s25 + $0x580] sm:$0xff] %v1385_v45  ;;  %v386_v45 = vld [vmem:[%s2359_s22 + $0x658] sm:$0xff]  ;;  %v898_v50 = vmul.f32 %v2361_v0, %v385_v42  ;;  %v1409_v55 = vadd.f32 %v2364_v2, %v896_v44 }
  0xc6   : > { %1898 = vst [vmem:[%s2377_s25 + $0x588] sm:$0xff] %v1386_v48  ;;  %v387_v48 = vld [vmem:[%s2359_s22 + $0x660] sm:$0xff]  ;;  %v899_v53 = vmul.f32 %v2361_v0, %v386_v45  ;;  %v1410_v58 = vadd.f32 %v2364_v2, %v897_v47 }
  0xc7   : > { %1899 = vst [vmem:[%s2377_s25 + $0x590] sm:$0xff] %v1387_v51  ;;  %v388_v51 = vld [vmem:[%s2359_s22 + $0x668] sm:$0xff]  ;;  %v900_v56 = vmul.f32 %v2361_v0, %v387_v48  ;;  %v1411_v61 = vadd.f32 %v2364_v2, %v898_v50 }
  0xc8   : > { %1900 = vst [vmem:[%s2377_s25 + $0x598] sm:$0xff] %v1388_v54  ;;  %v389_v54 = vld [vmem:[%s2359_s22 + $0x670] sm:$0xff]  ;;  %v901_v59 = vmul.f32 %v2361_v0, %v388_v51  ;;  %v1412_v1 = vadd.f32 %v2364_v2, %v899_v53 }
  0xc9   : > { %1901 = vst [vmem:[%s2377_s25 + $0x5a0] sm:$0xff] %v1389_v57  ;;  %v390_v57 = vld [vmem:[%s2359_s22 + $0x678] sm:$0xff]  ;;  %v902_v62 = vmul.f32 %v2361_v0, %v389_v54  ;;  %v1413_v5 = vadd.f32 %v2364_v2, %v900_v56 }
  0xca   : > { %1902 = vst [vmem:[%s2377_s25 + $0x5a8] sm:$0xff] %v1390_v60  ;;  %v391_v60 = vld [vmem:[%s2359_s22 + $0x680] sm:$0xff]  ;;  %v903_v3 = vmul.f32 %v2361_v0, %v390_v57  ;;  %v1414_v8 = vadd.f32 %v2364_v2, %v901_v59 }
  0xcb   : > { %1903 = vst [vmem:[%s2377_s25 + $0x5b0] sm:$0xff] %v1391_v63  ;;  %v392_v63 = vld [vmem:[%s2359_s22 + $0x688] sm:$0xff]  ;;  %v904_v6 = vmul.f32 %v2361_v0, %v391_v60  ;;  %v1415_v11 = vadd.f32 %v2364_v2, %v902_v62 }
  0xcc   : > { %1904 = vst [vmem:[%s2377_s25 + $0x5b8] sm:$0xff] %v1392_v4  ;;  %v393_v4 = vld [vmem:[%s2359_s22 + $0x690] sm:$0xff]  ;;  %v905_v9 = vmul.f32 %v2361_v0, %v392_v63  ;;  %v1416_v14 = vadd.f32 %v2364_v2, %v903_v3 }
  0xcd   : > { %1905 = vst [vmem:[%s2377_s25 + $0x5c0] sm:$0xff] %v1393_v7  ;;  %v394_v7 = vld [vmem:[%s2359_s22 + $0x698] sm:$0xff]  ;;  %v906_v12 = vmul.f32 %v2361_v0, %v393_v4  ;;  %v1417_v17 = vadd.f32 %v2364_v2, %v904_v6 }
  0xce   : > { %1906 = vst [vmem:[%s2377_s25 + $0x5c8] sm:$0xff] %v1394_v10  ;;  %v395_v10 = vld [vmem:[%s2359_s22 + $0x6a0] sm:$0xff]  ;;  %v907_v15 = vmul.f32 %v2361_v0, %v394_v7  ;;  %v1418_v20 = vadd.f32 %v2364_v2, %v905_v9 }
  0xcf   : > { %1907 = vst [vmem:[%s2377_s25 + $0x5d0] sm:$0xff] %v1395_v13  ;;  %v396_v13 = vld [vmem:[%s2359_s22 + $0x6a8] sm:$0xff]  ;;  %v908_v18 = vmul.f32 %v2361_v0, %v395_v10  ;;  %v1419_v23 = vadd.f32 %v2364_v2, %v906_v12 }
  0xd0   : > { %1908 = vst [vmem:[%s2377_s25 + $0x5d8] sm:$0xff] %v1396_v16  ;;  %v397_v16 = vld [vmem:[%s2359_s22 + $0x6b0] sm:$0xff]  ;;  %v909_v21 = vmul.f32 %v2361_v0, %v396_v13  ;;  %v1420_v26 = vadd.f32 %v2364_v2, %v907_v15 }
  0xd1   : > { %1909 = vst [vmem:[%s2377_s25 + $0x5e0] sm:$0xff] %v1397_v19  ;;  %v398_v19 = vld [vmem:[%s2359_s22 + $0x6b8] sm:$0xff]  ;;  %v910_v24 = vmul.f32 %v2361_v0, %v397_v16  ;;  %v1421_v29 = vadd.f32 %v2364_v2, %v908_v18 }
  0xd2   : > { %1910 = vst [vmem:[%s2377_s25 + $0x5e8] sm:$0xff] %v1398_v22  ;;  %v399_v22 = vld [vmem:[%s2359_s22 + $0x6c0] sm:$0xff]  ;;  %v911_v27 = vmul.f32 %v2361_v0, %v398_v19  ;;  %v1422_v32 = vadd.f32 %v2364_v2, %v909_v21 }
  0xd3   : > { %1911 = vst [vmem:[%s2377_s25 + $0x5f0] sm:$0xff] %v1399_v25  ;;  %v400_v25 = vld [vmem:[%s2359_s22 + $0x6c8] sm:$0xff]  ;;  %v912_v30 = vmul.f32 %v2361_v0, %v399_v22  ;;  %v1423_v35 = vadd.f32 %v2364_v2, %v910_v24 }
  0xd4   : > { %1912 = vst [vmem:[%s2377_s25 + $0x5f8] sm:$0xff] %v1400_v28  ;;  %v401_v28 = vld [vmem:[%s2359_s22 + $0x6d0] sm:$0xff]  ;;  %v913_v33 = vmul.f32 %v2361_v0, %v400_v25  ;;  %v1424_v38 = vadd.f32 %v2364_v2, %v911_v27 }
  0xd5   : > { %1913 = vst [vmem:[%s2377_s25 + $0x600] sm:$0xff] %v1401_v31  ;;  %v402_v31 = vld [vmem:[%s2359_s22 + $0x6d8] sm:$0xff]  ;;  %v914_v36 = vmul.f32 %v2361_v0, %v401_v28  ;;  %v1425_v41 = vadd.f32 %v2364_v2, %v912_v30 }
  0xd6   : > { %1914 = vst [vmem:[%s2377_s25 + $0x608] sm:$0xff] %v1402_v34  ;;  %v403_v34 = vld [vmem:[%s2359_s22 + $0x6e0] sm:$0xff]  ;;  %v915_v39 = vmul.f32 %v2361_v0, %v402_v31  ;;  %v1426_v44 = vadd.f32 %v2364_v2, %v913_v33 }
  0xd7   : > { %1915 = vst [vmem:[%s2377_s25 + $0x610] sm:$0xff] %v1403_v37  ;;  %v404_v37 = vld [vmem:[%s2359_s22 + $0x6e8] sm:$0xff]  ;;  %v916_v42 = vmul.f32 %v2361_v0, %v403_v34  ;;  %v1427_v47 = vadd.f32 %v2364_v2, %v914_v36 }
  0xd8   : > { %1916 = vst [vmem:[%s2377_s25 + $0x618] sm:$0xff] %v1404_v40  ;;  %v405_v40 = vld [vmem:[%s2359_s22 + $0x6f0] sm:$0xff]  ;;  %v917_v45 = vmul.f32 %v2361_v0, %v404_v37  ;;  %v1428_v50 = vadd.f32 %v2364_v2, %v915_v39 }
  0xd9   : > { %1917 = vst [vmem:[%s2377_s25 + $0x620] sm:$0xff] %v1405_v43  ;;  %v406_v43 = vld [vmem:[%s2359_s22 + $0x6f8] sm:$0xff]  ;;  %v918_v48 = vmul.f32 %v2361_v0, %v405_v40  ;;  %v1429_v53 = vadd.f32 %v2364_v2, %v916_v42 }
  0xda   : > { %1918 = vst [vmem:[%s2377_s25 + $0x628] sm:$0xff] %v1406_v46  ;;  %v407_v46 = vld [vmem:[%s2359_s22 + $0x700] sm:$0xff]  ;;  %v919_v51 = vmul.f32 %v2361_v0, %v406_v43  ;;  %v1430_v56 = vadd.f32 %v2364_v2, %v917_v45 }
  0xdb   : > { %1919 = vst [vmem:[%s2377_s25 + $0x630] sm:$0xff] %v1407_v49  ;;  %v408_v49 = vld [vmem:[%s2359_s22 + $0x708] sm:$0xff]  ;;  %v920_v54 = vmul.f32 %v2361_v0, %v407_v46  ;;  %v1431_v59 = vadd.f32 %v2364_v2, %v918_v48 }
  0xdc   : > { %1920 = vst [vmem:[%s2377_s25 + $0x638] sm:$0xff] %v1408_v52  ;;  %v409_v52 = vld [vmem:[%s2359_s22 + $0x710] sm:$0xff]  ;;  %v921_v57 = vmul.f32 %v2361_v0, %v408_v49  ;;  %v1432_v62 = vadd.f32 %v2364_v2, %v919_v51 }
  0xdd   : > { %1921 = vst [vmem:[%s2377_s25 + $0x640] sm:$0xff] %v1409_v55  ;;  %v410_v55 = vld [vmem:[%s2359_s22 + $0x718] sm:$0xff]  ;;  %v922_v60 = vmul.f32 %v2361_v0, %v409_v52  ;;  %v1433_v3 = vadd.f32 %v2364_v2, %v920_v54 }
  0xde   : > { %1922 = vst [vmem:[%s2377_s25 + $0x648] sm:$0xff] %v1410_v58  ;;  %v411_v58 = vld [vmem:[%s2359_s22 + $0x720] sm:$0xff]  ;;  %v923_v63 = vmul.f32 %v2361_v0, %v410_v55  ;;  %v1434_v6 = vadd.f32 %v2364_v2, %v921_v57 }
  0xdf   : > { %1923 = vst [vmem:[%s2377_s25 + $0x650] sm:$0xff] %v1411_v61  ;;  %v412_v61 = vld [vmem:[%s2359_s22 + $0x728] sm:$0xff]  ;;  %v924_v4 = vmul.f32 %v2361_v0, %v411_v58  ;;  %v1435_v9 = vadd.f32 %v2364_v2, %v922_v60 }
  0xe0   : > { %1924 = vst [vmem:[%s2377_s25 + $0x658] sm:$0xff] %v1412_v1  ;;  %v413_v1 = vld [vmem:[%s2359_s22 + $0x730] sm:$0xff]  ;;  %v925_v7 = vmul.f32 %v2361_v0, %v412_v61  ;;  %v1436_v12 = vadd.f32 %v2364_v2, %v923_v63 }
  0xe1   : > { %1925 = vst [vmem:[%s2377_s25 + $0x660] sm:$0xff] %v1413_v5  ;;  %v414_v5 = vld [vmem:[%s2359_s22 + $0x738] sm:$0xff]  ;;  %v926_v10 = vmul.f32 %v2361_v0, %v413_v1  ;;  %v1437_v15 = vadd.f32 %v2364_v2, %v924_v4 }
  0xe2   : > { %1926 = vst [vmem:[%s2377_s25 + $0x668] sm:$0xff] %v1414_v8  ;;  %v415_v8 = vld [vmem:[%s2359_s22 + $0x740] sm:$0xff]  ;;  %v927_v13 = vmul.f32 %v2361_v0, %v414_v5  ;;  %v1438_v18 = vadd.f32 %v2364_v2, %v925_v7 }
  0xe3   : > { %1927 = vst [vmem:[%s2377_s25 + $0x670] sm:$0xff] %v1415_v11  ;;  %v416_v11 = vld [vmem:[%s2359_s22 + $0x748] sm:$0xff]  ;;  %v928_v16 = vmul.f32 %v2361_v0, %v415_v8  ;;  %v1439_v21 = vadd.f32 %v2364_v2, %v926_v10 }
  0xe4   : > { %1928 = vst [vmem:[%s2377_s25 + $0x678] sm:$0xff] %v1416_v14  ;;  %v417_v14 = vld [vmem:[%s2359_s22 + $0x750] sm:$0xff]  ;;  %v929_v19 = vmul.f32 %v2361_v0, %v416_v11  ;;  %v1440_v24 = vadd.f32 %v2364_v2, %v927_v13 }
  0xe5   : > { %1929 = vst [vmem:[%s2377_s25 + $0x680] sm:$0xff] %v1417_v17  ;;  %v418_v17 = vld [vmem:[%s2359_s22 + $0x758] sm:$0xff]  ;;  %v930_v22 = vmul.f32 %v2361_v0, %v417_v14  ;;  %v1441_v27 = vadd.f32 %v2364_v2, %v928_v16 }
  0xe6   : > { %1930 = vst [vmem:[%s2377_s25 + $0x688] sm:$0xff] %v1418_v20  ;;  %v419_v20 = vld [vmem:[%s2359_s22 + $0x760] sm:$0xff]  ;;  %v931_v25 = vmul.f32 %v2361_v0, %v418_v17  ;;  %v1442_v30 = vadd.f32 %v2364_v2, %v929_v19 }
  0xe7   : > { %1931 = vst [vmem:[%s2377_s25 + $0x690] sm:$0xff] %v1419_v23  ;;  %v420_v23 = vld [vmem:[%s2359_s22 + $0x768] sm:$0xff]  ;;  %v932_v28 = vmul.f32 %v2361_v0, %v419_v20  ;;  %v1443_v33 = vadd.f32 %v2364_v2, %v930_v22 }
  0xe8   : > { %1932 = vst [vmem:[%s2377_s25 + $0x698] sm:$0xff] %v1420_v26  ;;  %v421_v26 = vld [vmem:[%s2359_s22 + $0x770] sm:$0xff]  ;;  %v933_v31 = vmul.f32 %v2361_v0, %v420_v23  ;;  %v1444_v36 = vadd.f32 %v2364_v2, %v931_v25 }
  0xe9   : > { %1933 = vst [vmem:[%s2377_s25 + $0x6a0] sm:$0xff] %v1421_v29  ;;  %v422_v29 = vld [vmem:[%s2359_s22 + $0x778] sm:$0xff]  ;;  %v934_v34 = vmul.f32 %v2361_v0, %v421_v26  ;;  %v1445_v39 = vadd.f32 %v2364_v2, %v932_v28 }
  0xea   : > { %1934 = vst [vmem:[%s2377_s25 + $0x6a8] sm:$0xff] %v1422_v32  ;;  %v423_v32 = vld [vmem:[%s2359_s22 + $0x780] sm:$0xff]  ;;  %v935_v37 = vmul.f32 %v2361_v0, %v422_v29  ;;  %v1446_v42 = vadd.f32 %v2364_v2, %v933_v31 }
  0xeb   : > { %1935 = vst [vmem:[%s2377_s25 + $0x6b0] sm:$0xff] %v1423_v35  ;;  %v424_v35 = vld [vmem:[%s2359_s22 + $0x788] sm:$0xff]  ;;  %v936_v40 = vmul.f32 %v2361_v0, %v423_v32  ;;  %v1447_v45 = vadd.f32 %v2364_v2, %v934_v34 }
  0xec   : > { %1936 = vst [vmem:[%s2377_s25 + $0x6b8] sm:$0xff] %v1424_v38  ;;  %v425_v38 = vld [vmem:[%s2359_s22 + $0x790] sm:$0xff]  ;;  %v937_v43 = vmul.f32 %v2361_v0, %v424_v35  ;;  %v1448_v48 = vadd.f32 %v2364_v2, %v935_v37 }
  0xed   : > { %1937 = vst [vmem:[%s2377_s25 + $0x6c0] sm:$0xff] %v1425_v41  ;;  %v426_v41 = vld [vmem:[%s2359_s22 + $0x798] sm:$0xff]  ;;  %v938_v46 = vmul.f32 %v2361_v0, %v425_v38  ;;  %v1449_v51 = vadd.f32 %v2364_v2, %v936_v40 }
  0xee   : > { %1938 = vst [vmem:[%s2377_s25 + $0x6c8] sm:$0xff] %v1426_v44  ;;  %v427_v44 = vld [vmem:[%s2359_s22 + $0x7a0] sm:$0xff]  ;;  %v939_v49 = vmul.f32 %v2361_v0, %v426_v41  ;;  %v1450_v54 = vadd.f32 %v2364_v2, %v937_v43 }
  0xef   : > { %1939 = vst [vmem:[%s2377_s25 + $0x6d0] sm:$0xff] %v1427_v47  ;;  %v428_v47 = vld [vmem:[%s2359_s22 + $0x7a8] sm:$0xff]  ;;  %v940_v52 = vmul.f32 %v2361_v0, %v427_v44  ;;  %v1451_v57 = vadd.f32 %v2364_v2, %v938_v46 }
  0xf0   : > { %1940 = vst [vmem:[%s2377_s25 + $0x6d8] sm:$0xff] %v1428_v50  ;;  %v429_v50 = vld [vmem:[%s2359_s22 + $0x7b0] sm:$0xff]  ;;  %v941_v55 = vmul.f32 %v2361_v0, %v428_v47  ;;  %v1452_v60 = vadd.f32 %v2364_v2, %v939_v49 }
  0xf1   : > { %1941 = vst [vmem:[%s2377_s25 + $0x6e0] sm:$0xff] %v1429_v53  ;;  %v430_v53 = vld [vmem:[%s2359_s22 + $0x7b8] sm:$0xff]  ;;  %v942_v58 = vmul.f32 %v2361_v0, %v429_v50  ;;  %v1453_v63 = vadd.f32 %v2364_v2, %v940_v52 }
  0xf2   : > { %1942 = vst [vmem:[%s2377_s25 + $0x6e8] sm:$0xff] %v1430_v56  ;;  %v431_v56 = vld [vmem:[%s2359_s22 + $0x7c0] sm:$0xff]  ;;  %v943_v61 = vmul.f32 %v2361_v0, %v430_v53  ;;  %v1454_v4 = vadd.f32 %v2364_v2, %v941_v55 }
  0xf3   : > { %1943 = vst [vmem:[%s2377_s25 + $0x6f0] sm:$0xff] %v1431_v59  ;;  %v432_v59 = vld [vmem:[%s2359_s22 + $0x7c8] sm:$0xff]  ;;  %v944_v1 = vmul.f32 %v2361_v0, %v431_v56  ;;  %v1455_v7 = vadd.f32 %v2364_v2, %v942_v58 }
  0xf4   : > { %1944 = vst [vmem:[%s2377_s25 + $0x6f8] sm:$0xff] %v1432_v62  ;;  %v433_v62 = vld [vmem:[%s2359_s22 + $0x7d0] sm:$0xff]  ;;  %v945_v5 = vmul.f32 %v2361_v0, %v432_v59  ;;  %v1456_v10 = vadd.f32 %v2364_v2, %v943_v61 }
  0xf5   : > { %1945 = vst [vmem:[%s2377_s25 + $0x700] sm:$0xff] %v1433_v3  ;;  %v434_v3 = vld [vmem:[%s2359_s22 + $0x7d8] sm:$0xff]  ;;  %v946_v8 = vmul.f32 %v2361_v0, %v433_v62  ;;  %v1457_v13 = vadd.f32 %v2364_v2, %v944_v1 }
  0xf6   : > { %1946 = vst [vmem:[%s2377_s25 + $0x708] sm:$0xff] %v1434_v6  ;;  %v435_v6 = vld [vmem:[%s2359_s22 + $0x7e0] sm:$0xff]  ;;  %v947_v11 = vmul.f32 %v2361_v0, %v434_v3  ;;  %v1458_v16 = vadd.f32 %v2364_v2, %v945_v5 }
  0xf7   : > { %1947 = vst [vmem:[%s2377_s25 + $0x710] sm:$0xff] %v1435_v9  ;;  %v436_v9 = vld [vmem:[%s2359_s22 + $0x7e8] sm:$0xff]  ;;  %v948_v14 = vmul.f32 %v2361_v0, %v435_v6  ;;  %v1459_v19 = vadd.f32 %v2364_v2, %v946_v8 }
  0xf8   : > { %1948 = vst [vmem:[%s2377_s25 + $0x718] sm:$0xff] %v1436_v12  ;;  %v437_v12 = vld [vmem:[%s2359_s22 + $0x7f0] sm:$0xff]  ;;  %v949_v17 = vmul.f32 %v2361_v0, %v436_v9  ;;  %v1460_v22 = vadd.f32 %v2364_v2, %v947_v11 }
  0xf9   : > { %1949 = vst [vmem:[%s2377_s25 + $0x720] sm:$0xff] %v1437_v15  ;;  %v438_v15 = vld [vmem:[%s2359_s22 + $0x7f8] sm:$0xff]  ;;  %v950_v20 = vmul.f32 %v2361_v0, %v437_v12  ;;  %v1461_v25 = vadd.f32 %v2364_v2, %v948_v14 }
  0xfa   : > { %1950 = vst [vmem:[%s2377_s25 + $0x728] sm:$0xff] %v1438_v18  ;;  %v439_v18 = vld [vmem:[%s2359_s22 + $0x800] sm:$0xff]  ;;  %v951_v23 = vmul.f32 %v2361_v0, %v438_v15  ;;  %v1462_v28 = vadd.f32 %v2364_v2, %v949_v17 }
  0xfb   : > { %1951 = vst [vmem:[%s2377_s25 + $0x730] sm:$0xff] %v1439_v21  ;;  %v440_v21 = vld [vmem:[%s2359_s22 + $0x808] sm:$0xff]  ;;  %v952_v26 = vmul.f32 %v2361_v0, %v439_v18  ;;  %v1463_v31 = vadd.f32 %v2364_v2, %v950_v20 }
  0xfc   : > { %1952 = vst [vmem:[%s2377_s25 + $0x738] sm:$0xff] %v1440_v24  ;;  %v441_v24 = vld [vmem:[%s2359_s22 + $0x810] sm:$0xff]  ;;  %v953_v29 = vmul.f32 %v2361_v0, %v440_v21  ;;  %v1464_v34 = vadd.f32 %v2364_v2, %v951_v23 }
  0xfd   : > { %1953 = vst [vmem:[%s2377_s25 + $0x740] sm:$0xff] %v1441_v27  ;;  %v442_v27 = vld [vmem:[%s2359_s22 + $0x818] sm:$0xff]  ;;  %v954_v32 = vmul.f32 %v2361_v0, %v441_v24  ;;  %v1465_v37 = vadd.f32 %v2364_v2, %v952_v26 }
  0xfe   : > { %1954 = vst [vmem:[%s2377_s25 + $0x748] sm:$0xff] %v1442_v30  ;;  %v443_v30 = vld [vmem:[%s2359_s22 + $0x820] sm:$0xff]  ;;  %v955_v35 = vmul.f32 %v2361_v0, %v442_v27  ;;  %v1466_v40 = vadd.f32 %v2364_v2, %v953_v29 }
  0xff   : > { %1955 = vst [vmem:[%s2377_s25 + $0x750] sm:$0xff] %v1443_v33  ;;  %v444_v33 = vld [vmem:[%s2359_s22 + $0x828] sm:$0xff]  ;;  %v956_v38 = vmul.f32 %v2361_v0, %v443_v30  ;;  %v1467_v43 = vadd.f32 %v2364_v2, %v954_v32 }
 0x100   : > { %1956 = vst [vmem:[%s2377_s25 + $0x758] sm:$0xff] %v1444_v36  ;;  %v445_v36 = vld [vmem:[%s2359_s22 + $0x830] sm:$0xff]  ;;  %v957_v41 = vmul.f32 %v2361_v0, %v444_v33  ;;  %v1468_v46 = vadd.f32 %v2364_v2, %v955_v35 }
 0x101   : > { %1957 = vst [vmem:[%s2377_s25 + $0x760] sm:$0xff] %v1445_v39  ;;  %v446_v39 = vld [vmem:[%s2359_s22 + $0x838] sm:$0xff]  ;;  %v958_v44 = vmul.f32 %v2361_v0, %v445_v36  ;;  %v1469_v49 = vadd.f32 %v2364_v2, %v956_v38 }
 0x102   : > { %1958 = vst [vmem:[%s2377_s25 + $0x768] sm:$0xff] %v1446_v42  ;;  %v447_v42 = vld [vmem:[%s2359_s22 + $0x840] sm:$0xff]  ;;  %v959_v47 = vmul.f32 %v2361_v0, %v446_v39  ;;  %v1470_v52 = vadd.f32 %v2364_v2, %v957_v41 }
 0x103   : > { %1959 = vst [vmem:[%s2377_s25 + $0x770] sm:$0xff] %v1447_v45  ;;  %v448_v45 = vld [vmem:[%s2359_s22 + $0x848] sm:$0xff]  ;;  %v960_v50 = vmul.f32 %v2361_v0, %v447_v42  ;;  %v1471_v55 = vadd.f32 %v2364_v2, %v958_v44 }
 0x104   : > { %1960 = vst [vmem:[%s2377_s25 + $0x778] sm:$0xff] %v1448_v48  ;;  %v449_v48 = vld [vmem:[%s2359_s22 + $0x850] sm:$0xff]  ;;  %v961_v53 = vmul.f32 %v2361_v0, %v448_v45  ;;  %v1472_v58 = vadd.f32 %v2364_v2, %v959_v47 }
 0x105   : > { %1961 = vst [vmem:[%s2377_s25 + $0x780] sm:$0xff] %v1449_v51  ;;  %v450_v51 = vld [vmem:[%s2359_s22 + $0x858] sm:$0xff]  ;;  %v962_v56 = vmul.f32 %v2361_v0, %v449_v48  ;;  %v1473_v61 = vadd.f32 %v2364_v2, %v960_v50 }
 0x106   : > { %1962 = vst [vmem:[%s2377_s25 + $0x788] sm:$0xff] %v1450_v54  ;;  %v451_v54 = vld [vmem:[%s2359_s22 + $0x860] sm:$0xff]  ;;  %v963_v59 = vmul.f32 %v2361_v0, %v450_v51  ;;  %v1474_v1 = vadd.f32 %v2364_v2, %v961_v53 }
 0x107   : > { %1963 = vst [vmem:[%s2377_s25 + $0x790] sm:$0xff] %v1451_v57  ;;  %v452_v57 = vld [vmem:[%s2359_s22 + $0x868] sm:$0xff]  ;;  %v964_v62 = vmul.f32 %v2361_v0, %v451_v54  ;;  %v1475_v5 = vadd.f32 %v2364_v2, %v962_v56 }
 0x108   : > { %1964 = vst [vmem:[%s2377_s25 + $0x798] sm:$0xff] %v1452_v60  ;;  %v453_v60 = vld [vmem:[%s2359_s22 + $0x870] sm:$0xff]  ;;  %v965_v3 = vmul.f32 %v2361_v0, %v452_v57  ;;  %v1476_v8 = vadd.f32 %v2364_v2, %v963_v59 }
 0x109   : > { %1965 = vst [vmem:[%s2377_s25 + $0x7a0] sm:$0xff] %v1453_v63  ;;  %v454_v63 = vld [vmem:[%s2359_s22 + $0x878] sm:$0xff]  ;;  %v966_v6 = vmul.f32 %v2361_v0, %v453_v60  ;;  %v1477_v11 = vadd.f32 %v2364_v2, %v964_v62 }
 0x10a   : > { %1966 = vst [vmem:[%s2377_s25 + $0x7a8] sm:$0xff] %v1454_v4  ;;  %v455_v4 = vld [vmem:[%s2359_s22 + $0x880] sm:$0xff]  ;;  %v967_v9 = vmul.f32 %v2361_v0, %v454_v63  ;;  %v1478_v14 = vadd.f32 %v2364_v2, %v965_v3 }
 0x10b   : > { %1967 = vst [vmem:[%s2377_s25 + $0x7b0] sm:$0xff] %v1455_v7  ;;  %v456_v7 = vld [vmem:[%s2359_s22 + $0x888] sm:$0xff]  ;;  %v968_v12 = vmul.f32 %v2361_v0, %v455_v4  ;;  %v1479_v17 = vadd.f32 %v2364_v2, %v966_v6 }
 0x10c   : > { %1968 = vst [vmem:[%s2377_s25 + $0x7b8] sm:$0xff] %v1456_v10  ;;  %v457_v10 = vld [vmem:[%s2359_s22 + $0x890] sm:$0xff]  ;;  %v969_v15 = vmul.f32 %v2361_v0, %v456_v7  ;;  %v1480_v20 = vadd.f32 %v2364_v2, %v967_v9 }
 0x10d   : > { %1969 = vst [vmem:[%s2377_s25 + $0x7c0] sm:$0xff] %v1457_v13  ;;  %v458_v13 = vld [vmem:[%s2359_s22 + $0x898] sm:$0xff]  ;;  %v970_v18 = vmul.f32 %v2361_v0, %v457_v10  ;;  %v1481_v23 = vadd.f32 %v2364_v2, %v968_v12 }
 0x10e   : > { %1970 = vst [vmem:[%s2377_s25 + $0x7c8] sm:$0xff] %v1458_v16  ;;  %v459_v16 = vld [vmem:[%s2359_s22 + $0x8a0] sm:$0xff]  ;;  %v971_v21 = vmul.f32 %v2361_v0, %v458_v13  ;;  %v1482_v26 = vadd.f32 %v2364_v2, %v969_v15 }
 0x10f   : > { %1971 = vst [vmem:[%s2377_s25 + $0x7d0] sm:$0xff] %v1459_v19  ;;  %v460_v19 = vld [vmem:[%s2359_s22 + $0x8a8] sm:$0xff]  ;;  %v972_v24 = vmul.f32 %v2361_v0, %v459_v16  ;;  %v1483_v29 = vadd.f32 %v2364_v2, %v970_v18 }
 0x110   : > { %1972 = vst [vmem:[%s2377_s25 + $0x7d8] sm:$0xff] %v1460_v22  ;;  %v461_v22 = vld [vmem:[%s2359_s22 + $0x8b0] sm:$0xff]  ;;  %v973_v27 = vmul.f32 %v2361_v0, %v460_v19  ;;  %v1484_v32 = vadd.f32 %v2364_v2, %v971_v21 }
 0x111   : > { %1973 = vst [vmem:[%s2377_s25 + $0x7e0] sm:$0xff] %v1461_v25  ;;  %v462_v25 = vld [vmem:[%s2359_s22 + $0x8b8] sm:$0xff]  ;;  %v974_v30 = vmul.f32 %v2361_v0, %v461_v22  ;;  %v1485_v35 = vadd.f32 %v2364_v2, %v972_v24 }
 0x112   : > { %1974 = vst [vmem:[%s2377_s25 + $0x7e8] sm:$0xff] %v1462_v28  ;;  %v463_v28 = vld [vmem:[%s2359_s22 + $0x8c0] sm:$0xff]  ;;  %v975_v33 = vmul.f32 %v2361_v0, %v462_v25  ;;  %v1486_v38 = vadd.f32 %v2364_v2, %v973_v27 }
 0x113   : > { %1975 = vst [vmem:[%s2377_s25 + $0x7f0] sm:$0xff] %v1463_v31  ;;  %v464_v31 = vld [vmem:[%s2359_s22 + $0x8c8] sm:$0xff]  ;;  %v976_v36 = vmul.f32 %v2361_v0, %v463_v28  ;;  %v1487_v41 = vadd.f32 %v2364_v2, %v974_v30 }
 0x114   : > { %1976 = vst [vmem:[%s2377_s25 + $0x7f8] sm:$0xff] %v1464_v34  ;;  %v465_v34 = vld [vmem:[%s2359_s22 + $0x8d0] sm:$0xff]  ;;  %v977_v39 = vmul.f32 %v2361_v0, %v464_v31  ;;  %v1488_v44 = vadd.f32 %v2364_v2, %v975_v33 }
 0x115   : > { %1977 = vst [vmem:[%s2377_s25 + $0x800] sm:$0xff] %v1465_v37  ;;  %v466_v37 = vld [vmem:[%s2359_s22 + $0x8d8] sm:$0xff]  ;;  %v978_v42 = vmul.f32 %v2361_v0, %v465_v34  ;;  %v1489_v47 = vadd.f32 %v2364_v2, %v976_v36 }
 0x116   : > { %1978 = vst [vmem:[%s2377_s25 + $0x808] sm:$0xff] %v1466_v40  ;;  %v467_v40 = vld [vmem:[%s2359_s22 + $0x8e0] sm:$0xff]  ;;  %v979_v45 = vmul.f32 %v2361_v0, %v466_v37  ;;  %v1490_v50 = vadd.f32 %v2364_v2, %v977_v39 }
 0x117   : > { %1979 = vst [vmem:[%s2377_s25 + $0x810] sm:$0xff] %v1467_v43  ;;  %v468_v43 = vld [vmem:[%s2359_s22 + $0x8e8] sm:$0xff]  ;;  %v980_v48 = vmul.f32 %v2361_v0, %v467_v40  ;;  %v1491_v53 = vadd.f32 %v2364_v2, %v978_v42 }
 0x118   : > { %1980 = vst [vmem:[%s2377_s25 + $0x818] sm:$0xff] %v1468_v46  ;;  %v469_v46 = vld [vmem:[%s2359_s22 + $0x8f0] sm:$0xff]  ;;  %v981_v51 = vmul.f32 %v2361_v0, %v468_v43  ;;  %v1492_v56 = vadd.f32 %v2364_v2, %v979_v45 }
 0x119   : > { %1981 = vst [vmem:[%s2377_s25 + $0x820] sm:$0xff] %v1469_v49  ;;  %v470_v49 = vld [vmem:[%s2359_s22 + $0x8f8] sm:$0xff]  ;;  %v982_v54 = vmul.f32 %v2361_v0, %v469_v46  ;;  %v1493_v59 = vadd.f32 %v2364_v2, %v980_v48 }
 0x11a   : > { %1982 = vst [vmem:[%s2377_s25 + $0x828] sm:$0xff] %v1470_v52  ;;  %v471_v52 = vld [vmem:[%s2359_s22 + $0x900] sm:$0xff]  ;;  %v983_v57 = vmul.f32 %v2361_v0, %v470_v49  ;;  %v1494_v62 = vadd.f32 %v2364_v2, %v981_v51 }
 0x11b   : > { %1983 = vst [vmem:[%s2377_s25 + $0x830] sm:$0xff] %v1471_v55  ;;  %v472_v55 = vld [vmem:[%s2359_s22 + $0x908] sm:$0xff]  ;;  %v984_v60 = vmul.f32 %v2361_v0, %v471_v52  ;;  %v1495_v3 = vadd.f32 %v2364_v2, %v982_v54 }
 0x11c   : > { %1984 = vst [vmem:[%s2377_s25 + $0x838] sm:$0xff] %v1472_v58  ;;  %v473_v58 = vld [vmem:[%s2359_s22 + $0x910] sm:$0xff]  ;;  %v985_v63 = vmul.f32 %v2361_v0, %v472_v55  ;;  %v1496_v6 = vadd.f32 %v2364_v2, %v983_v57 }
 0x11d   : > { %1985 = vst [vmem:[%s2377_s25 + $0x840] sm:$0xff] %v1473_v61  ;;  %v474_v61 = vld [vmem:[%s2359_s22 + $0x918] sm:$0xff]  ;;  %v986_v4 = vmul.f32 %v2361_v0, %v473_v58  ;;  %v1497_v9 = vadd.f32 %v2364_v2, %v984_v60 }
 0x11e   : > { %1986 = vst [vmem:[%s2377_s25 + $0x848] sm:$0xff] %v1474_v1  ;;  %v475_v1 = vld [vmem:[%s2359_s22 + $0x920] sm:$0xff]  ;;  %v987_v7 = vmul.f32 %v2361_v0, %v474_v61  ;;  %v1498_v12 = vadd.f32 %v2364_v2, %v985_v63 }
 0x11f   : > { %1987 = vst [vmem:[%s2377_s25 + $0x850] sm:$0xff] %v1475_v5  ;;  %v476_v5 = vld [vmem:[%s2359_s22 + $0x928] sm:$0xff]  ;;  %v988_v10 = vmul.f32 %v2361_v0, %v475_v1  ;;  %v1499_v15 = vadd.f32 %v2364_v2, %v986_v4 }
 0x120   : > { %1988 = vst [vmem:[%s2377_s25 + $0x858] sm:$0xff] %v1476_v8  ;;  %v477_v8 = vld [vmem:[%s2359_s22 + $0x930] sm:$0xff]  ;;  %v989_v13 = vmul.f32 %v2361_v0, %v476_v5  ;;  %v1500_v18 = vadd.f32 %v2364_v2, %v987_v7 }
 0x121   : > { %1989 = vst [vmem:[%s2377_s25 + $0x860] sm:$0xff] %v1477_v11  ;;  %v478_v11 = vld [vmem:[%s2359_s22 + $0x938] sm:$0xff]  ;;  %v990_v16 = vmul.f32 %v2361_v0, %v477_v8  ;;  %v1501_v21 = vadd.f32 %v2364_v2, %v988_v10 }
 0x122   : > { %1990 = vst [vmem:[%s2377_s25 + $0x868] sm:$0xff] %v1478_v14  ;;  %v479_v14 = vld [vmem:[%s2359_s22 + $0x940] sm:$0xff]  ;;  %v991_v19 = vmul.f32 %v2361_v0, %v478_v11  ;;  %v1502_v24 = vadd.f32 %v2364_v2, %v989_v13 }
 0x123   : > { %1991 = vst [vmem:[%s2377_s25 + $0x870] sm:$0xff] %v1479_v17  ;;  %v480_v17 = vld [vmem:[%s2359_s22 + $0x948] sm:$0xff]  ;;  %v992_v22 = vmul.f32 %v2361_v0, %v479_v14  ;;  %v1503_v27 = vadd.f32 %v2364_v2, %v990_v16 }
 0x124   : > { %1992 = vst [vmem:[%s2377_s25 + $0x878] sm:$0xff] %v1480_v20  ;;  %v481_v20 = vld [vmem:[%s2359_s22 + $0x950] sm:$0xff]  ;;  %v993_v25 = vmul.f32 %v2361_v0, %v480_v17  ;;  %v1504_v30 = vadd.f32 %v2364_v2, %v991_v19 }
 0x125   : > { %1993 = vst [vmem:[%s2377_s25 + $0x880] sm:$0xff] %v1481_v23  ;;  %v482_v23 = vld [vmem:[%s2359_s22 + $0x958] sm:$0xff]  ;;  %v994_v28 = vmul.f32 %v2361_v0, %v481_v20  ;;  %v1505_v33 = vadd.f32 %v2364_v2, %v992_v22 }
 0x126   : > { %1994 = vst [vmem:[%s2377_s25 + $0x888] sm:$0xff] %v1482_v26  ;;  %v483_v26 = vld [vmem:[%s2359_s22 + $0x960] sm:$0xff]  ;;  %v995_v31 = vmul.f32 %v2361_v0, %v482_v23  ;;  %v1506_v36 = vadd.f32 %v2364_v2, %v993_v25 }
 0x127   : > { %1995 = vst [vmem:[%s2377_s25 + $0x890] sm:$0xff] %v1483_v29  ;;  %v484_v29 = vld [vmem:[%s2359_s22 + $0x968] sm:$0xff]  ;;  %v996_v34 = vmul.f32 %v2361_v0, %v483_v26  ;;  %v1507_v39 = vadd.f32 %v2364_v2, %v994_v28 }
 0x128   : > { %1996 = vst [vmem:[%s2377_s25 + $0x898] sm:$0xff] %v1484_v32  ;;  %v485_v32 = vld [vmem:[%s2359_s22 + $0x970] sm:$0xff]  ;;  %v997_v37 = vmul.f32 %v2361_v0, %v484_v29  ;;  %v1508_v42 = vadd.f32 %v2364_v2, %v995_v31 }
 0x129   : > { %1997 = vst [vmem:[%s2377_s25 + $0x8a0] sm:$0xff] %v1485_v35  ;;  %v486_v35 = vld [vmem:[%s2359_s22 + $0x978] sm:$0xff]  ;;  %v998_v40 = vmul.f32 %v2361_v0, %v485_v32  ;;  %v1509_v45 = vadd.f32 %v2364_v2, %v996_v34 }
 0x12a   : > { %1998 = vst [vmem:[%s2377_s25 + $0x8a8] sm:$0xff] %v1486_v38  ;;  %v487_v38 = vld [vmem:[%s2359_s22 + $0x980] sm:$0xff]  ;;  %v999_v43 = vmul.f32 %v2361_v0, %v486_v35  ;;  %v1510_v48 = vadd.f32 %v2364_v2, %v997_v37 }
 0x12b   : > { %1999 = vst [vmem:[%s2377_s25 + $0x8b0] sm:$0xff] %v1487_v41  ;;  %v488_v41 = vld [vmem:[%s2359_s22 + $0x988] sm:$0xff]  ;;  %v1000_v46 = vmul.f32 %v2361_v0, %v487_v38  ;;  %v1511_v51 = vadd.f32 %v2364_v2, %v998_v40 }
 0x12c   : > { %2000 = vst [vmem:[%s2377_s25 + $0x8b8] sm:$0xff] %v1488_v44  ;;  %v489_v44 = vld [vmem:[%s2359_s22 + $0x990] sm:$0xff]  ;;  %v1001_v49 = vmul.f32 %v2361_v0, %v488_v41  ;;  %v1512_v54 = vadd.f32 %v2364_v2, %v999_v43 }
 0x12d   : > { %2001 = vst [vmem:[%s2377_s25 + $0x8c0] sm:$0xff] %v1489_v47  ;;  %v490_v47 = vld [vmem:[%s2359_s22 + $0x998] sm:$0xff]  ;;  %v1002_v52 = vmul.f32 %v2361_v0, %v489_v44  ;;  %v1513_v57 = vadd.f32 %v2364_v2, %v1000_v46 }
 0x12e   : > { %2002 = vst [vmem:[%s2377_s25 + $0x8c8] sm:$0xff] %v1490_v50  ;;  %v491_v50 = vld [vmem:[%s2359_s22 + $0x9a0] sm:$0xff]  ;;  %v1003_v55 = vmul.f32 %v2361_v0, %v490_v47  ;;  %v1514_v60 = vadd.f32 %v2364_v2, %v1001_v49 }
 0x12f   : > { %2003 = vst [vmem:[%s2377_s25 + $0x8d0] sm:$0xff] %v1491_v53  ;;  %v492_v53 = vld [vmem:[%s2359_s22 + $0x9a8] sm:$0xff]  ;;  %v1004_v58 = vmul.f32 %v2361_v0, %v491_v50  ;;  %v1515_v63 = vadd.f32 %v2364_v2, %v1002_v52 }
 0x130   : > { %2004 = vst [vmem:[%s2377_s25 + $0x8d8] sm:$0xff] %v1492_v56  ;;  %v493_v56 = vld [vmem:[%s2359_s22 + $0x9b0] sm:$0xff]  ;;  %v1005_v61 = vmul.f32 %v2361_v0, %v492_v53  ;;  %v1516_v4 = vadd.f32 %v2364_v2, %v1003_v55 }
 0x131   : > { %2005 = vst [vmem:[%s2377_s25 + $0x8e0] sm:$0xff] %v1493_v59  ;;  %v494_v59 = vld [vmem:[%s2359_s22 + $0x9b8] sm:$0xff]  ;;  %v1006_v1 = vmul.f32 %v2361_v0, %v493_v56  ;;  %v1517_v7 = vadd.f32 %v2364_v2, %v1004_v58 }
 0x132   : > { %2006 = vst [vmem:[%s2377_s25 + $0x8e8] sm:$0xff] %v1494_v62  ;;  %v495_v62 = vld [vmem:[%s2359_s22 + $0x9c0] sm:$0xff]  ;;  %v1007_v5 = vmul.f32 %v2361_v0, %v494_v59  ;;  %v1518_v10 = vadd.f32 %v2364_v2, %v1005_v61 }
 0x133   : > { %2007 = vst [vmem:[%s2377_s25 + $0x8f0] sm:$0xff] %v1495_v3  ;;  %v496_v3 = vld [vmem:[%s2359_s22 + $0x9c8] sm:$0xff]  ;;  %v1008_v8 = vmul.f32 %v2361_v0, %v495_v62  ;;  %v1519_v13 = vadd.f32 %v2364_v2, %v1006_v1 }
 0x134   : > { %2008 = vst [vmem:[%s2377_s25 + $0x8f8] sm:$0xff] %v1496_v6  ;;  %v497_v6 = vld [vmem:[%s2359_s22 + $0x9d0] sm:$0xff]  ;;  %v1009_v11 = vmul.f32 %v2361_v0, %v496_v3  ;;  %v1520_v16 = vadd.f32 %v2364_v2, %v1007_v5 }
 0x135   : > { %2009 = vst [vmem:[%s2377_s25 + $0x900] sm:$0xff] %v1497_v9  ;;  %v498_v9 = vld [vmem:[%s2359_s22 + $0x9d8] sm:$0xff]  ;;  %v1010_v14 = vmul.f32 %v2361_v0, %v497_v6  ;;  %v1521_v19 = vadd.f32 %v2364_v2, %v1008_v8 }
 0x136   : > { %2010 = vst [vmem:[%s2377_s25 + $0x908] sm:$0xff] %v1498_v12  ;;  %v499_v12 = vld [vmem:[%s2359_s22 + $0x9e0] sm:$0xff]  ;;  %v1011_v17 = vmul.f32 %v2361_v0, %v498_v9  ;;  %v1522_v22 = vadd.f32 %v2364_v2, %v1009_v11 }
 0x137   : > { %2011 = vst [vmem:[%s2377_s25 + $0x910] sm:$0xff] %v1499_v15  ;;  %v500_v15 = vld [vmem:[%s2359_s22 + $0x9e8] sm:$0xff]  ;;  %v1012_v20 = vmul.f32 %v2361_v0, %v499_v12  ;;  %v1523_v25 = vadd.f32 %v2364_v2, %v1010_v14 }
 0x138   : > { %2012 = vst [vmem:[%s2377_s25 + $0x918] sm:$0xff] %v1500_v18  ;;  %v501_v18 = vld [vmem:[%s2359_s22 + $0x9f0] sm:$0xff]  ;;  %v1013_v23 = vmul.f32 %v2361_v0, %v500_v15  ;;  %v1524_v28 = vadd.f32 %v2364_v2, %v1011_v17 }
 0x139   : > { %2013 = vst [vmem:[%s2377_s25 + $0x920] sm:$0xff] %v1501_v21  ;;  %v502_v21 = vld [vmem:[%s2359_s22 + $0x9f8] sm:$0xff]  ;;  %v1014_v26 = vmul.f32 %v2361_v0, %v501_v18  ;;  %v1525_v31 = vadd.f32 %v2364_v2, %v1012_v20 }
 0x13a   : > { %2014 = vst [vmem:[%s2377_s25 + $0x928] sm:$0xff] %v1502_v24  ;;  %v503_v24 = vld [vmem:[%s2359_s22 + $0xa00] sm:$0xff]  ;;  %v1015_v29 = vmul.f32 %v2361_v0, %v502_v21  ;;  %v1526_v34 = vadd.f32 %v2364_v2, %v1013_v23 }
 0x13b   : > { %2015 = vst [vmem:[%s2377_s25 + $0x930] sm:$0xff] %v1503_v27  ;;  %v504_v27 = vld [vmem:[%s2359_s22 + $0xa08] sm:$0xff]  ;;  %v1016_v32 = vmul.f32 %v2361_v0, %v503_v24  ;;  %v1527_v37 = vadd.f32 %v2364_v2, %v1014_v26 }
 0x13c   : > { %2016 = vst [vmem:[%s2377_s25 + $0x938] sm:$0xff] %v1504_v30  ;;  %v505_v30 = vld [vmem:[%s2359_s22 + $0xa10] sm:$0xff]  ;;  %v1017_v35 = vmul.f32 %v2361_v0, %v504_v27  ;;  %v1528_v40 = vadd.f32 %v2364_v2, %v1015_v29 }
 0x13d   : > { %2017 = vst [vmem:[%s2377_s25 + $0x940] sm:$0xff] %v1505_v33  ;;  %v506_v33 = vld [vmem:[%s2359_s22 + $0xa18] sm:$0xff]  ;;  %v1018_v38 = vmul.f32 %v2361_v0, %v505_v30  ;;  %v1529_v43 = vadd.f32 %v2364_v2, %v1016_v32 }
 0x13e   : > { %2018 = vst [vmem:[%s2377_s25 + $0x948] sm:$0xff] %v1506_v36  ;;  %v507_v36 = vld [vmem:[%s2359_s22 + $0xa20] sm:$0xff]  ;;  %v1019_v41 = vmul.f32 %v2361_v0, %v506_v33  ;;  %v1530_v46 = vadd.f32 %v2364_v2, %v1017_v35 }
 0x13f   : > { %2019 = vst [vmem:[%s2377_s25 + $0x950] sm:$0xff] %v1507_v39  ;;  %v508_v39 = vld [vmem:[%s2359_s22 + $0xa28] sm:$0xff]  ;;  %v1020_v44 = vmul.f32 %v2361_v0, %v507_v36  ;;  %v1531_v49 = vadd.f32 %v2364_v2, %v1018_v38 }
 0x140   : > { %2020 = vst [vmem:[%s2377_s25 + $0x958] sm:$0xff] %v1508_v42  ;;  %v509_v42 = vld [vmem:[%s2359_s22 + $0xa30] sm:$0xff]  ;;  %v1021_v47 = vmul.f32 %v2361_v0, %v508_v39  ;;  %v1532_v52 = vadd.f32 %v2364_v2, %v1019_v41 }
 0x141   : > { %2021 = vst [vmem:[%s2377_s25 + $0x960] sm:$0xff] %v1509_v45  ;;  %v510_v45 = vld [vmem:[%s2359_s22 + $0xa38] sm:$0xff]  ;;  %v1022_v50 = vmul.f32 %v2361_v0, %v509_v42  ;;  %v1533_v55 = vadd.f32 %v2364_v2, %v1020_v44 }
 0x142   : > { %2022 = vst [vmem:[%s2377_s25 + $0x968] sm:$0xff] %v1510_v48  ;;  %v511_v48 = vld [vmem:[%s2359_s22 + $0xa40] sm:$0xff]  ;;  %v1023_v53 = vmul.f32 %v2361_v0, %v510_v45  ;;  %v1534_v58 = vadd.f32 %v2364_v2, %v1021_v47 }
 0x143   : > { %2023 = vst [vmem:[%s2377_s25 + $0x970] sm:$0xff] %v1511_v51  ;;  %v512_v51 = vld [vmem:[%s2359_s22 + $0xa48] sm:$0xff]  ;;  %v1024_v56 = vmul.f32 %v2361_v0, %v511_v48  ;;  %v1535_v61 = vadd.f32 %v2364_v2, %v1022_v50 }
 0x144   : > { %2024 = vst [vmem:[%s2377_s25 + $0x978] sm:$0xff] %v1512_v54  ;;  %v513_v54 = vld [vmem:[%s2359_s22 + $0xa50] sm:$0xff]  ;;  %v1025_v59 = vmul.f32 %v2361_v0, %v512_v51  ;;  %v1536_v1 = vadd.f32 %v2364_v2, %v1023_v53 }
 0x145   : > { %2025 = vst [vmem:[%s2377_s25 + $0x980] sm:$0xff] %v1513_v57  ;;  %v514_v57 = vld [vmem:[%s2359_s22 + $0xa58] sm:$0xff]  ;;  %v1026_v62 = vmul.f32 %v2361_v0, %v513_v54  ;;  %v1537_v5 = vadd.f32 %v2364_v2, %v1024_v56 }
 0x146   : > { %2026 = vst [vmem:[%s2377_s25 + $0x988] sm:$0xff] %v1514_v60  ;;  %v515_v60 = vld [vmem:[%s2359_s22 + $0xa60] sm:$0xff]  ;;  %v1027_v3 = vmul.f32 %v2361_v0, %v514_v57  ;;  %v1538_v8 = vadd.f32 %v2364_v2, %v1025_v59 }
 0x147   : > { %2027 = vst [vmem:[%s2377_s25 + $0x990] sm:$0xff] %v1515_v63  ;;  %v516_v63 = vld [vmem:[%s2359_s22 + $0xa68] sm:$0xff]  ;;  %v1028_v6 = vmul.f32 %v2361_v0, %v515_v60  ;;  %v1539_v11 = vadd.f32 %v2364_v2, %v1026_v62 }
 0x148   : > { %2028 = vst [vmem:[%s2377_s25 + $0x998] sm:$0xff] %v1516_v4  ;;  %v517_v4 = vld [vmem:[%s2359_s22 + $0xa70] sm:$0xff]  ;;  %v1029_v9 = vmul.f32 %v2361_v0, %v516_v63  ;;  %v1540_v14 = vadd.f32 %v2364_v2, %v1027_v3 }
 0x149   : > { %2029 = vst [vmem:[%s2377_s25 + $0x9a0] sm:$0xff] %v1517_v7  ;;  %v518_v7 = vld [vmem:[%s2359_s22 + $0xa78] sm:$0xff]  ;;  %v1030_v12 = vmul.f32 %v2361_v0, %v517_v4  ;;  %v1541_v17 = vadd.f32 %v2364_v2, %v1028_v6 }
 0x14a   : > { %2030 = vst [vmem:[%s2377_s25 + $0x9a8] sm:$0xff] %v1518_v10  ;;  %v519_v10 = vld [vmem:[%s2359_s22 + $0xa80] sm:$0xff]  ;;  %v1031_v15 = vmul.f32 %v2361_v0, %v518_v7  ;;  %v1542_v20 = vadd.f32 %v2364_v2, %v1029_v9 }
 0x14b   : > { %2031 = vst [vmem:[%s2377_s25 + $0x9b0] sm:$0xff] %v1519_v13  ;;  %v520_v13 = vld [vmem:[%s2359_s22 + $0xa88] sm:$0xff]  ;;  %v1032_v18 = vmul.f32 %v2361_v0, %v519_v10  ;;  %v1543_v23 = vadd.f32 %v2364_v2, %v1030_v12 }
 0x14c   : > { %2032 = vst [vmem:[%s2377_s25 + $0x9b8] sm:$0xff] %v1520_v16  ;;  %v521_v16 = vld [vmem:[%s2359_s22 + $0xa90] sm:$0xff]  ;;  %v1033_v21 = vmul.f32 %v2361_v0, %v520_v13  ;;  %v1544_v26 = vadd.f32 %v2364_v2, %v1031_v15 }
 0x14d   : > { %2033 = vst [vmem:[%s2377_s25 + $0x9c0] sm:$0xff] %v1521_v19  ;;  %v522_v19 = vld [vmem:[%s2359_s22 + $0xa98] sm:$0xff]  ;;  %v1034_v24 = vmul.f32 %v2361_v0, %v521_v16  ;;  %v1545_v29 = vadd.f32 %v2364_v2, %v1032_v18 }
 0x14e   : > { %2034 = vst [vmem:[%s2377_s25 + $0x9c8] sm:$0xff] %v1522_v22  ;;  %v523_v22 = vld [vmem:[%s2359_s22 + $0xaa0] sm:$0xff]  ;;  %v1035_v27 = vmul.f32 %v2361_v0, %v522_v19  ;;  %v1546_v32 = vadd.f32 %v2364_v2, %v1033_v21 }
 0x14f   : > { %2035 = vst [vmem:[%s2377_s25 + $0x9d0] sm:$0xff] %v1523_v25  ;;  %v524_v25 = vld [vmem:[%s2359_s22 + $0xaa8] sm:$0xff]  ;;  %v1036_v30 = vmul.f32 %v2361_v0, %v523_v22  ;;  %v1547_v35 = vadd.f32 %v2364_v2, %v1034_v24 }
 0x150   : > { %2036 = vst [vmem:[%s2377_s25 + $0x9d8] sm:$0xff] %v1524_v28  ;;  %v525_v28 = vld [vmem:[%s2359_s22 + $0xab0] sm:$0xff]  ;;  %v1037_v33 = vmul.f32 %v2361_v0, %v524_v25  ;;  %v1548_v38 = vadd.f32 %v2364_v2, %v1035_v27 }
 0x151   : > { %2037 = vst [vmem:[%s2377_s25 + $0x9e0] sm:$0xff] %v1525_v31  ;;  %v526_v31 = vld [vmem:[%s2359_s22 + $0xab8] sm:$0xff]  ;;  %v1038_v36 = vmul.f32 %v2361_v0, %v525_v28  ;;  %v1549_v41 = vadd.f32 %v2364_v2, %v1036_v30 }
 0x152   : > { %2038 = vst [vmem:[%s2377_s25 + $0x9e8] sm:$0xff] %v1526_v34  ;;  %v527_v34 = vld [vmem:[%s2359_s22 + $0xac0] sm:$0xff]  ;;  %v1039_v39 = vmul.f32 %v2361_v0, %v526_v31  ;;  %v1550_v44 = vadd.f32 %v2364_v2, %v1037_v33 }
 0x153   : > { %2039 = vst [vmem:[%s2377_s25 + $0x9f0] sm:$0xff] %v1527_v37  ;;  %v528_v37 = vld [vmem:[%s2359_s22 + $0xac8] sm:$0xff]  ;;  %v1040_v42 = vmul.f32 %v2361_v0, %v527_v34  ;;  %v1551_v47 = vadd.f32 %v2364_v2, %v1038_v36 }
 0x154   : > { %2040 = vst [vmem:[%s2377_s25 + $0x9f8] sm:$0xff] %v1528_v40  ;;  %v529_v40 = vld [vmem:[%s2359_s22 + $0xad0] sm:$0xff]  ;;  %v1041_v45 = vmul.f32 %v2361_v0, %v528_v37  ;;  %v1552_v50 = vadd.f32 %v2364_v2, %v1039_v39 }
 0x155   : > { %2041 = vst [vmem:[%s2377_s25 + $0xa00] sm:$0xff] %v1529_v43  ;;  %v530_v43 = vld [vmem:[%s2359_s22 + $0xad8] sm:$0xff]  ;;  %v1042_v48 = vmul.f32 %v2361_v0, %v529_v40  ;;  %v1553_v53 = vadd.f32 %v2364_v2, %v1040_v42 }
 0x156   : > { %2042 = vst [vmem:[%s2377_s25 + $0xa08] sm:$0xff] %v1530_v46  ;;  %v531_v46 = vld [vmem:[%s2359_s22 + $0xae0] sm:$0xff]  ;;  %v1043_v51 = vmul.f32 %v2361_v0, %v530_v43  ;;  %v1554_v56 = vadd.f32 %v2364_v2, %v1041_v45 }
 0x157   : > { %2043 = vst [vmem:[%s2377_s25 + $0xa10] sm:$0xff] %v1531_v49  ;;  %v532_v49 = vld [vmem:[%s2359_s22 + $0xae8] sm:$0xff]  ;;  %v1044_v54 = vmul.f32 %v2361_v0, %v531_v46  ;;  %v1555_v59 = vadd.f32 %v2364_v2, %v1042_v48 }
 0x158   : > { %2044 = vst [vmem:[%s2377_s25 + $0xa18] sm:$0xff] %v1532_v52  ;;  %v533_v52 = vld [vmem:[%s2359_s22 + $0xaf0] sm:$0xff]  ;;  %v1045_v57 = vmul.f32 %v2361_v0, %v532_v49  ;;  %v1556_v62 = vadd.f32 %v2364_v2, %v1043_v51 }
 0x159   : > { %2045 = vst [vmem:[%s2377_s25 + $0xa20] sm:$0xff] %v1533_v55  ;;  %v534_v55 = vld [vmem:[%s2359_s22 + $0xaf8] sm:$0xff]  ;;  %v1046_v60 = vmul.f32 %v2361_v0, %v533_v52  ;;  %v1557_v3 = vadd.f32 %v2364_v2, %v1044_v54 }
 0x15a   : > { %2046 = vst [vmem:[%s2377_s25 + $0xa28] sm:$0xff] %v1534_v58  ;;  %v535_v58 = vld [vmem:[%s2359_s22 + $0xb00] sm:$0xff]  ;;  %v1047_v63 = vmul.f32 %v2361_v0, %v534_v55  ;;  %v1558_v6 = vadd.f32 %v2364_v2, %v1045_v57 }
 0x15b   : > { %2047 = vst [vmem:[%s2377_s25 + $0xa30] sm:$0xff] %v1535_v61  ;;  %v536_v61 = vld [vmem:[%s2359_s22 + $0xb08] sm:$0xff]  ;;  %v1048_v4 = vmul.f32 %v2361_v0, %v535_v58  ;;  %v1559_v9 = vadd.f32 %v2364_v2, %v1046_v60 }
 0x15c   : > { %2048 = vst [vmem:[%s2377_s25 + $0xa38] sm:$0xff] %v1536_v1  ;;  %v537_v1 = vld [vmem:[%s2359_s22 + $0xb10] sm:$0xff]  ;;  %v1049_v7 = vmul.f32 %v2361_v0, %v536_v61  ;;  %v1560_v12 = vadd.f32 %v2364_v2, %v1047_v63 }
 0x15d   : > { %2049 = vst [vmem:[%s2377_s25 + $0xa40] sm:$0xff] %v1537_v5  ;;  %v538_v5 = vld [vmem:[%s2359_s22 + $0xb18] sm:$0xff]  ;;  %v1050_v10 = vmul.f32 %v2361_v0, %v537_v1  ;;  %v1561_v15 = vadd.f32 %v2364_v2, %v1048_v4 }
 0x15e   : > { %2050 = vst [vmem:[%s2377_s25 + $0xa48] sm:$0xff] %v1538_v8  ;;  %v539_v8 = vld [vmem:[%s2359_s22 + $0xb20] sm:$0xff]  ;;  %v1051_v13 = vmul.f32 %v2361_v0, %v538_v5  ;;  %v1562_v18 = vadd.f32 %v2364_v2, %v1049_v7 }
 0x15f   : > { %2051 = vst [vmem:[%s2377_s25 + $0xa50] sm:$0xff] %v1539_v11  ;;  %v540_v11 = vld [vmem:[%s2359_s22 + $0xb28] sm:$0xff]  ;;  %v1052_v16 = vmul.f32 %v2361_v0, %v539_v8  ;;  %v1563_v21 = vadd.f32 %v2364_v2, %v1050_v10 }
 0x160   : > { %2052 = vst [vmem:[%s2377_s25 + $0xa58] sm:$0xff] %v1540_v14  ;;  %v541_v14 = vld [vmem:[%s2359_s22 + $0xb30] sm:$0xff]  ;;  %v1053_v19 = vmul.f32 %v2361_v0, %v540_v11  ;;  %v1564_v24 = vadd.f32 %v2364_v2, %v1051_v13 }
 0x161   : > { %2053 = vst [vmem:[%s2377_s25 + $0xa60] sm:$0xff] %v1541_v17  ;;  %v542_v17 = vld [vmem:[%s2359_s22 + $0xb38] sm:$0xff]  ;;  %v1054_v22 = vmul.f32 %v2361_v0, %v541_v14  ;;  %v1565_v27 = vadd.f32 %v2364_v2, %v1052_v16 }
 0x162   : > { %2054 = vst [vmem:[%s2377_s25 + $0xa68] sm:$0xff] %v1542_v20  ;;  %v543_v20 = vld [vmem:[%s2359_s22 + $0xb40] sm:$0xff]  ;;  %v1055_v25 = vmul.f32 %v2361_v0, %v542_v17  ;;  %v1566_v30 = vadd.f32 %v2364_v2, %v1053_v19 }
 0x163   : > { %2055 = vst [vmem:[%s2377_s25 + $0xa70] sm:$0xff] %v1543_v23  ;;  %v544_v23 = vld [vmem:[%s2359_s22 + $0xb48] sm:$0xff]  ;;  %v1056_v28 = vmul.f32 %v2361_v0, %v543_v20  ;;  %v1567_v33 = vadd.f32 %v2364_v2, %v1054_v22 }
 0x164   : > { %2056 = vst [vmem:[%s2377_s25 + $0xa78] sm:$0xff] %v1544_v26  ;;  %v545_v26 = vld [vmem:[%s2359_s22 + $0xb50] sm:$0xff]  ;;  %v1057_v31 = vmul.f32 %v2361_v0, %v544_v23  ;;  %v1568_v36 = vadd.f32 %v2364_v2, %v1055_v25 }
 0x165   : > { %2057 = vst [vmem:[%s2377_s25 + $0xa80] sm:$0xff] %v1545_v29  ;;  %v546_v29 = vld [vmem:[%s2359_s22 + $0xb58] sm:$0xff]  ;;  %v1058_v34 = vmul.f32 %v2361_v0, %v545_v26  ;;  %v1569_v39 = vadd.f32 %v2364_v2, %v1056_v28 }
 0x166   : > { %2058 = vst [vmem:[%s2377_s25 + $0xa88] sm:$0xff] %v1546_v32  ;;  %v547_v32 = vld [vmem:[%s2359_s22 + $0xb60] sm:$0xff]  ;;  %v1059_v37 = vmul.f32 %v2361_v0, %v546_v29  ;;  %v1570_v42 = vadd.f32 %v2364_v2, %v1057_v31 }
 0x167   : > { %2059 = vst [vmem:[%s2377_s25 + $0xa90] sm:$0xff] %v1547_v35  ;;  %v548_v35 = vld [vmem:[%s2359_s22 + $0xb68] sm:$0xff]  ;;  %v1060_v40 = vmul.f32 %v2361_v0, %v547_v32  ;;  %v1571_v45 = vadd.f32 %v2364_v2, %v1058_v34 }
 0x168   : > { %2060 = vst [vmem:[%s2377_s25 + $0xa98] sm:$0xff] %v1548_v38  ;;  %v549_v38 = vld [vmem:[%s2359_s22 + $0xb70] sm:$0xff]  ;;  %v1061_v43 = vmul.f32 %v2361_v0, %v548_v35  ;;  %v1572_v48 = vadd.f32 %v2364_v2, %v1059_v37 }
 0x169   : > { %2061 = vst [vmem:[%s2377_s25 + $0xaa0] sm:$0xff] %v1549_v41  ;;  %v550_v41 = vld [vmem:[%s2359_s22 + $0xb78] sm:$0xff]  ;;  %v1062_v46 = vmul.f32 %v2361_v0, %v549_v38  ;;  %v1573_v51 = vadd.f32 %v2364_v2, %v1060_v40 }
 0x16a   : > { %2062 = vst [vmem:[%s2377_s25 + $0xaa8] sm:$0xff] %v1550_v44  ;;  %v551_v44 = vld [vmem:[%s2359_s22 + $0xb80] sm:$0xff]  ;;  %v1063_v49 = vmul.f32 %v2361_v0, %v550_v41  ;;  %v1574_v54 = vadd.f32 %v2364_v2, %v1061_v43 }
 0x16b   : > { %2063 = vst [vmem:[%s2377_s25 + $0xab0] sm:$0xff] %v1551_v47  ;;  %v552_v47 = vld [vmem:[%s2359_s22 + $0xb88] sm:$0xff]  ;;  %v1064_v52 = vmul.f32 %v2361_v0, %v551_v44  ;;  %v1575_v57 = vadd.f32 %v2364_v2, %v1062_v46 }
 0x16c   : > { %2064 = vst [vmem:[%s2377_s25 + $0xab8] sm:$0xff] %v1552_v50  ;;  %v553_v50 = vld [vmem:[%s2359_s22 + $0xb90] sm:$0xff]  ;;  %v1065_v55 = vmul.f32 %v2361_v0, %v552_v47  ;;  %v1576_v60 = vadd.f32 %v2364_v2, %v1063_v49 }
 0x16d   : > { %2065 = vst [vmem:[%s2377_s25 + $0xac0] sm:$0xff] %v1553_v53  ;;  %v554_v53 = vld [vmem:[%s2359_s22 + $0xb98] sm:$0xff]  ;;  %v1066_v58 = vmul.f32 %v2361_v0, %v553_v50  ;;  %v1577_v63 = vadd.f32 %v2364_v2, %v1064_v52 }
 0x16e   : > { %2066 = vst [vmem:[%s2377_s25 + $0xac8] sm:$0xff] %v1554_v56  ;;  %v555_v56 = vld [vmem:[%s2359_s22 + $0xba0] sm:$0xff]  ;;  %v1067_v61 = vmul.f32 %v2361_v0, %v554_v53  ;;  %v1578_v4 = vadd.f32 %v2364_v2, %v1065_v55 }
 0x16f   : > { %2067 = vst [vmem:[%s2377_s25 + $0xad0] sm:$0xff] %v1555_v59  ;;  %v556_v59 = vld [vmem:[%s2359_s22 + $0xba8] sm:$0xff]  ;;  %v1068_v1 = vmul.f32 %v2361_v0, %v555_v56  ;;  %v1579_v7 = vadd.f32 %v2364_v2, %v1066_v58 }
 0x170   : > { %2068 = vst [vmem:[%s2377_s25 + $0xad8] sm:$0xff] %v1556_v62  ;;  %v557_v62 = vld [vmem:[%s2359_s22 + $0xbb0] sm:$0xff]  ;;  %v1069_v5 = vmul.f32 %v2361_v0, %v556_v59  ;;  %v1580_v10 = vadd.f32 %v2364_v2, %v1067_v61 }
 0x171   : > { %2069 = vst [vmem:[%s2377_s25 + $0xae0] sm:$0xff] %v1557_v3  ;;  %v558_v3 = vld [vmem:[%s2359_s22 + $0xbb8] sm:$0xff]  ;;  %v1070_v8 = vmul.f32 %v2361_v0, %v557_v62  ;;  %v1581_v13 = vadd.f32 %v2364_v2, %v1068_v1 }
 0x172   : > { %2070 = vst [vmem:[%s2377_s25 + $0xae8] sm:$0xff] %v1558_v6  ;;  %v559_v6 = vld [vmem:[%s2359_s22 + $0xbc0] sm:$0xff]  ;;  %v1071_v11 = vmul.f32 %v2361_v0, %v558_v3  ;;  %v1582_v16 = vadd.f32 %v2364_v2, %v1069_v5 }
 0x173   : > { %2071 = vst [vmem:[%s2377_s25 + $0xaf0] sm:$0xff] %v1559_v9  ;;  %v560_v9 = vld [vmem:[%s2359_s22 + $0xbc8] sm:$0xff]  ;;  %v1072_v14 = vmul.f32 %v2361_v0, %v559_v6  ;;  %v1583_v19 = vadd.f32 %v2364_v2, %v1070_v8 }
 0x174   : > { %2072 = vst [vmem:[%s2377_s25 + $0xaf8] sm:$0xff] %v1560_v12  ;;  %v561_v12 = vld [vmem:[%s2359_s22 + $0xbd0] sm:$0xff]  ;;  %v1073_v17 = vmul.f32 %v2361_v0, %v560_v9  ;;  %v1584_v22 = vadd.f32 %v2364_v2, %v1071_v11 }
 0x175   : > { %2073 = vst [vmem:[%s2377_s25 + $0xb00] sm:$0xff] %v1561_v15  ;;  %v562_v15 = vld [vmem:[%s2359_s22 + $0xbd8] sm:$0xff]  ;;  %v1074_v20 = vmul.f32 %v2361_v0, %v561_v12  ;;  %v1585_v25 = vadd.f32 %v2364_v2, %v1072_v14 }
 0x176   : > { %2074 = vst [vmem:[%s2377_s25 + $0xb08] sm:$0xff] %v1562_v18  ;;  %v563_v18 = vld [vmem:[%s2359_s22 + $0xbe0] sm:$0xff]  ;;  %v1075_v23 = vmul.f32 %v2361_v0, %v562_v15  ;;  %v1586_v28 = vadd.f32 %v2364_v2, %v1073_v17 }
 0x177   : > { %2075 = vst [vmem:[%s2377_s25 + $0xb10] sm:$0xff] %v1563_v21  ;;  %v564_v21 = vld [vmem:[%s2359_s22 + $0xbe8] sm:$0xff]  ;;  %v1076_v26 = vmul.f32 %v2361_v0, %v563_v18  ;;  %v1587_v31 = vadd.f32 %v2364_v2, %v1074_v20 }
 0x178   : > { %2076 = vst [vmem:[%s2377_s25 + $0xb18] sm:$0xff] %v1564_v24  ;;  %v565_v24 = vld [vmem:[%s2359_s22 + $0xbf0] sm:$0xff]  ;;  %v1077_v29 = vmul.f32 %v2361_v0, %v564_v21  ;;  %v1588_v34 = vadd.f32 %v2364_v2, %v1075_v23 }
 0x179   : > { %2077 = vst [vmem:[%s2377_s25 + $0xb20] sm:$0xff] %v1565_v27  ;;  %v566_v27 = vld [vmem:[%s2359_s22 + $0xbf8] sm:$0xff]  ;;  %v1078_v32 = vmul.f32 %v2361_v0, %v565_v24  ;;  %v1589_v37 = vadd.f32 %v2364_v2, %v1076_v26 }
 0x17a   : > { %2078 = vst [vmem:[%s2377_s25 + $0xb28] sm:$0xff] %v1566_v30  ;;  %v567_v30 = vld [vmem:[%s2359_s22 + $0xc00] sm:$0xff]  ;;  %v1079_v35 = vmul.f32 %v2361_v0, %v566_v27  ;;  %v1590_v40 = vadd.f32 %v2364_v2, %v1077_v29 }
 0x17b   : > { %2079 = vst [vmem:[%s2377_s25 + $0xb30] sm:$0xff] %v1567_v33  ;;  %v568_v33 = vld [vmem:[%s2359_s22 + $0xc08] sm:$0xff]  ;;  %v1080_v38 = vmul.f32 %v2361_v0, %v567_v30  ;;  %v1591_v43 = vadd.f32 %v2364_v2, %v1078_v32 }
 0x17c   : > { %2080 = vst [vmem:[%s2377_s25 + $0xb38] sm:$0xff] %v1568_v36  ;;  %v569_v36 = vld [vmem:[%s2359_s22 + $0xc10] sm:$0xff]  ;;  %v1081_v41 = vmul.f32 %v2361_v0, %v568_v33  ;;  %v1592_v46 = vadd.f32 %v2364_v2, %v1079_v35 }
 0x17d   : > { %2081 = vst [vmem:[%s2377_s25 + $0xb40] sm:$0xff] %v1569_v39  ;;  %v570_v39 = vld [vmem:[%s2359_s22 + $0xc18] sm:$0xff]  ;;  %v1082_v44 = vmul.f32 %v2361_v0, %v569_v36  ;;  %v1593_v49 = vadd.f32 %v2364_v2, %v1080_v38 }
 0x17e   : > { %2082 = vst [vmem:[%s2377_s25 + $0xb48] sm:$0xff] %v1570_v42  ;;  %v571_v42 = vld [vmem:[%s2359_s22 + $0xc20] sm:$0xff]  ;;  %v1083_v47 = vmul.f32 %v2361_v0, %v570_v39  ;;  %v1594_v52 = vadd.f32 %v2364_v2, %v1081_v41 }
 0x17f   : > { %2083 = vst [vmem:[%s2377_s25 + $0xb50] sm:$0xff] %v1571_v45  ;;  %v572_v45 = vld [vmem:[%s2359_s22 + $0xc28] sm:$0xff]  ;;  %v1084_v50 = vmul.f32 %v2361_v0, %v571_v42  ;;  %v1595_v55 = vadd.f32 %v2364_v2, %v1082_v44 }
 0x180   : > { %2084 = vst [vmem:[%s2377_s25 + $0xb58] sm:$0xff] %v1572_v48  ;;  %v573_v48 = vld [vmem:[%s2359_s22 + $0xc30] sm:$0xff]  ;;  %v1085_v53 = vmul.f32 %v2361_v0, %v572_v45  ;;  %v1596_v58 = vadd.f32 %v2364_v2, %v1083_v47 }
 0x181   : > { %2085 = vst [vmem:[%s2377_s25 + $0xb60] sm:$0xff] %v1573_v51  ;;  %v574_v51 = vld [vmem:[%s2359_s22 + $0xc38] sm:$0xff]  ;;  %v1086_v56 = vmul.f32 %v2361_v0, %v573_v48  ;;  %v1597_v61 = vadd.f32 %v2364_v2, %v1084_v50 }
 0x182   : > { %2086 = vst [vmem:[%s2377_s25 + $0xb68] sm:$0xff] %v1574_v54  ;;  %v575_v54 = vld [vmem:[%s2359_s22 + $0xc40] sm:$0xff]  ;;  %v1087_v59 = vmul.f32 %v2361_v0, %v574_v51  ;;  %v1598_v1 = vadd.f32 %v2364_v2, %v1085_v53 }
 0x183   : > { %2087 = vst [vmem:[%s2377_s25 + $0xb70] sm:$0xff] %v1575_v57  ;;  %v576_v57 = vld [vmem:[%s2359_s22 + $0xc48] sm:$0xff]  ;;  %v1088_v62 = vmul.f32 %v2361_v0, %v575_v54  ;;  %v1599_v5 = vadd.f32 %v2364_v2, %v1086_v56 }
 0x184   : > { %2088 = vst [vmem:[%s2377_s25 + $0xb78] sm:$0xff] %v1576_v60  ;;  %v577_v60 = vld [vmem:[%s2359_s22 + $0xc50] sm:$0xff]  ;;  %v1089_v3 = vmul.f32 %v2361_v0, %v576_v57  ;;  %v1600_v8 = vadd.f32 %v2364_v2, %v1087_v59 }
 0x185   : > { %2089 = vst [vmem:[%s2377_s25 + $0xb80] sm:$0xff] %v1577_v63  ;;  %v578_v63 = vld [vmem:[%s2359_s22 + $0xc58] sm:$0xff]  ;;  %v1090_v6 = vmul.f32 %v2361_v0, %v577_v60  ;;  %v1601_v11 = vadd.f32 %v2364_v2, %v1088_v62 }
 0x186   : > { %2090 = vst [vmem:[%s2377_s25 + $0xb88] sm:$0xff] %v1578_v4  ;;  %v579_v4 = vld [vmem:[%s2359_s22 + $0xc60] sm:$0xff]  ;;  %v1091_v9 = vmul.f32 %v2361_v0, %v578_v63  ;;  %v1602_v14 = vadd.f32 %v2364_v2, %v1089_v3 }
 0x187   : > { %2091 = vst [vmem:[%s2377_s25 + $0xb90] sm:$0xff] %v1579_v7  ;;  %v580_v7 = vld [vmem:[%s2359_s22 + $0xc68] sm:$0xff]  ;;  %v1092_v12 = vmul.f32 %v2361_v0, %v579_v4  ;;  %v1603_v17 = vadd.f32 %v2364_v2, %v1090_v6 }
 0x188   : > { %2092 = vst [vmem:[%s2377_s25 + $0xb98] sm:$0xff] %v1580_v10  ;;  %v581_v10 = vld [vmem:[%s2359_s22 + $0xc70] sm:$0xff]  ;;  %v1093_v15 = vmul.f32 %v2361_v0, %v580_v7  ;;  %v1604_v20 = vadd.f32 %v2364_v2, %v1091_v9 }
 0x189   : > { %2093 = vst [vmem:[%s2377_s25 + $0xba0] sm:$0xff] %v1581_v13  ;;  %v582_v13 = vld [vmem:[%s2359_s22 + $0xc78] sm:$0xff]  ;;  %v1094_v18 = vmul.f32 %v2361_v0, %v581_v10  ;;  %v1605_v23 = vadd.f32 %v2364_v2, %v1092_v12 }
 0x18a   : > { %2094 = vst [vmem:[%s2377_s25 + $0xba8] sm:$0xff] %v1582_v16  ;;  %v583_v16 = vld [vmem:[%s2359_s22 + $0xc80] sm:$0xff]  ;;  %v1095_v21 = vmul.f32 %v2361_v0, %v582_v13  ;;  %v1606_v26 = vadd.f32 %v2364_v2, %v1093_v15 }
 0x18b   : > { %2095 = vst [vmem:[%s2377_s25 + $0xbb0] sm:$0xff] %v1583_v19  ;;  %v584_v19 = vld [vmem:[%s2359_s22 + $0xc88] sm:$0xff]  ;;  %v1096_v24 = vmul.f32 %v2361_v0, %v583_v16  ;;  %v1607_v29 = vadd.f32 %v2364_v2, %v1094_v18 }
 0x18c   : > { %2096 = vst [vmem:[%s2377_s25 + $0xbb8] sm:$0xff] %v1584_v22  ;;  %v585_v22 = vld [vmem:[%s2359_s22 + $0xc90] sm:$0xff]  ;;  %v1097_v27 = vmul.f32 %v2361_v0, %v584_v19  ;;  %v1608_v32 = vadd.f32 %v2364_v2, %v1095_v21 }
 0x18d   : > { %2097 = vst [vmem:[%s2377_s25 + $0xbc0] sm:$0xff] %v1585_v25  ;;  %v586_v25 = vld [vmem:[%s2359_s22 + $0xc98] sm:$0xff]  ;;  %v1098_v30 = vmul.f32 %v2361_v0, %v585_v22  ;;  %v1609_v35 = vadd.f32 %v2364_v2, %v1096_v24 }
 0x18e   : > { %2098 = vst [vmem:[%s2377_s25 + $0xbc8] sm:$0xff] %v1586_v28  ;;  %v587_v28 = vld [vmem:[%s2359_s22 + $0xca0] sm:$0xff]  ;;  %v1099_v33 = vmul.f32 %v2361_v0, %v586_v25  ;;  %v1610_v38 = vadd.f32 %v2364_v2, %v1097_v27 }
 0x18f   : > { %2099 = vst [vmem:[%s2377_s25 + $0xbd0] sm:$0xff] %v1587_v31  ;;  %v588_v31 = vld [vmem:[%s2359_s22 + $0xca8] sm:$0xff]  ;;  %v1100_v36 = vmul.f32 %v2361_v0, %v587_v28  ;;  %v1611_v41 = vadd.f32 %v2364_v2, %v1098_v30 }
 0x190   : > { %2100 = vst [vmem:[%s2377_s25 + $0xbd8] sm:$0xff] %v1588_v34  ;;  %v589_v34 = vld [vmem:[%s2359_s22 + $0xcb0] sm:$0xff]  ;;  %v1101_v39 = vmul.f32 %v2361_v0, %v588_v31  ;;  %v1612_v44 = vadd.f32 %v2364_v2, %v1099_v33 }
 0x191   : > { %2101 = vst [vmem:[%s2377_s25 + $0xbe0] sm:$0xff] %v1589_v37  ;;  %v590_v37 = vld [vmem:[%s2359_s22 + $0xcb8] sm:$0xff]  ;;  %v1102_v42 = vmul.f32 %v2361_v0, %v589_v34  ;;  %v1613_v47 = vadd.f32 %v2364_v2, %v1100_v36 }
 0x192   : > { %2102 = vst [vmem:[%s2377_s25 + $0xbe8] sm:$0xff] %v1590_v40  ;;  %v591_v40 = vld [vmem:[%s2359_s22 + $0xcc0] sm:$0xff]  ;;  %v1103_v45 = vmul.f32 %v2361_v0, %v590_v37  ;;  %v1614_v50 = vadd.f32 %v2364_v2, %v1101_v39 }
 0x193   : > { %2103 = vst [vmem:[%s2377_s25 + $0xbf0] sm:$0xff] %v1591_v43  ;;  %v592_v43 = vld [vmem:[%s2359_s22 + $0xcc8] sm:$0xff]  ;;  %v1104_v48 = vmul.f32 %v2361_v0, %v591_v40  ;;  %v1615_v53 = vadd.f32 %v2364_v2, %v1102_v42 }
 0x194   : > { %2104 = vst [vmem:[%s2377_s25 + $0xbf8] sm:$0xff] %v1592_v46  ;;  %v593_v46 = vld [vmem:[%s2359_s22 + $0xcd0] sm:$0xff]  ;;  %v1105_v51 = vmul.f32 %v2361_v0, %v592_v43  ;;  %v1616_v56 = vadd.f32 %v2364_v2, %v1103_v45 }
 0x195   : > { %2105 = vst [vmem:[%s2377_s25 + $0xc00] sm:$0xff] %v1593_v49  ;;  %v594_v49 = vld [vmem:[%s2359_s22 + $0xcd8] sm:$0xff]  ;;  %v1106_v54 = vmul.f32 %v2361_v0, %v593_v46  ;;  %v1617_v59 = vadd.f32 %v2364_v2, %v1104_v48 }
 0x196   : > { %2106 = vst [vmem:[%s2377_s25 + $0xc08] sm:$0xff] %v1594_v52  ;;  %v595_v52 = vld [vmem:[%s2359_s22 + $0xce0] sm:$0xff]  ;;  %v1107_v57 = vmul.f32 %v2361_v0, %v594_v49  ;;  %v1618_v62 = vadd.f32 %v2364_v2, %v1105_v51 }
 0x197   : > { %2107 = vst [vmem:[%s2377_s25 + $0xc10] sm:$0xff] %v1595_v55  ;;  %v596_v55 = vld [vmem:[%s2359_s22 + $0xce8] sm:$0xff]  ;;  %v1108_v60 = vmul.f32 %v2361_v0, %v595_v52  ;;  %v1619_v3 = vadd.f32 %v2364_v2, %v1106_v54 }
 0x198   : > { %2108 = vst [vmem:[%s2377_s25 + $0xc18] sm:$0xff] %v1596_v58  ;;  %v597_v58 = vld [vmem:[%s2359_s22 + $0xcf0] sm:$0xff]  ;;  %v1109_v63 = vmul.f32 %v2361_v0, %v596_v55  ;;  %v1620_v6 = vadd.f32 %v2364_v2, %v1107_v57 }
 0x199   : > { %2109 = vst [vmem:[%s2377_s25 + $0xc20] sm:$0xff] %v1597_v61  ;;  %v598_v61 = vld [vmem:[%s2359_s22 + $0xcf8] sm:$0xff]  ;;  %v1110_v4 = vmul.f32 %v2361_v0, %v597_v58  ;;  %v1621_v9 = vadd.f32 %v2364_v2, %v1108_v60 }
 0x19a   : > { %2110 = vst [vmem:[%s2377_s25 + $0xc28] sm:$0xff] %v1598_v1  ;;  %v599_v1 = vld [vmem:[%s2359_s22 + $0xd00] sm:$0xff]  ;;  %v1111_v7 = vmul.f32 %v2361_v0, %v598_v61  ;;  %v1622_v12 = vadd.f32 %v2364_v2, %v1109_v63 }
 0x19b   : > { %2111 = vst [vmem:[%s2377_s25 + $0xc30] sm:$0xff] %v1599_v5  ;;  %v600_v5 = vld [vmem:[%s2359_s22 + $0xd08] sm:$0xff]  ;;  %v1112_v10 = vmul.f32 %v2361_v0, %v599_v1  ;;  %v1623_v15 = vadd.f32 %v2364_v2, %v1110_v4 }
 0x19c   : > { %2112 = vst [vmem:[%s2377_s25 + $0xc38] sm:$0xff] %v1600_v8  ;;  %v601_v8 = vld [vmem:[%s2359_s22 + $0xd10] sm:$0xff]  ;;  %v1113_v13 = vmul.f32 %v2361_v0, %v600_v5  ;;  %v1624_v18 = vadd.f32 %v2364_v2, %v1111_v7 }
 0x19d   : > { %2113 = vst [vmem:[%s2377_s25 + $0xc40] sm:$0xff] %v1601_v11  ;;  %v602_v11 = vld [vmem:[%s2359_s22 + $0xd18] sm:$0xff]  ;;  %v1114_v16 = vmul.f32 %v2361_v0, %v601_v8  ;;  %v1625_v21 = vadd.f32 %v2364_v2, %v1112_v10 }
 0x19e   : > { %2114 = vst [vmem:[%s2377_s25 + $0xc48] sm:$0xff] %v1602_v14  ;;  %v603_v14 = vld [vmem:[%s2359_s22 + $0xd20] sm:$0xff]  ;;  %v1115_v19 = vmul.f32 %v2361_v0, %v602_v11  ;;  %v1626_v24 = vadd.f32 %v2364_v2, %v1113_v13 }
 0x19f   : > { %2115 = vst [vmem:[%s2377_s25 + $0xc50] sm:$0xff] %v1603_v17  ;;  %v604_v17 = vld [vmem:[%s2359_s22 + $0xd28] sm:$0xff]  ;;  %v1116_v22 = vmul.f32 %v2361_v0, %v603_v14  ;;  %v1627_v27 = vadd.f32 %v2364_v2, %v1114_v16 }
 0x1a0   : > { %2116 = vst [vmem:[%s2377_s25 + $0xc58] sm:$0xff] %v1604_v20  ;;  %v605_v20 = vld [vmem:[%s2359_s22 + $0xd30] sm:$0xff]  ;;  %v1117_v25 = vmul.f32 %v2361_v0, %v604_v17  ;;  %v1628_v30 = vadd.f32 %v2364_v2, %v1115_v19 }
 0x1a1   : > { %2117 = vst [vmem:[%s2377_s25 + $0xc60] sm:$0xff] %v1605_v23  ;;  %v606_v23 = vld [vmem:[%s2359_s22 + $0xd38] sm:$0xff]  ;;  %v1118_v28 = vmul.f32 %v2361_v0, %v605_v20  ;;  %v1629_v33 = vadd.f32 %v2364_v2, %v1116_v22 }
 0x1a2   : > { %2118 = vst [vmem:[%s2377_s25 + $0xc68] sm:$0xff] %v1606_v26  ;;  %v607_v26 = vld [vmem:[%s2359_s22 + $0xd40] sm:$0xff]  ;;  %v1119_v31 = vmul.f32 %v2361_v0, %v606_v23  ;;  %v1630_v36 = vadd.f32 %v2364_v2, %v1117_v25 }
 0x1a3   : > { %2119 = vst [vmem:[%s2377_s25 + $0xc70] sm:$0xff] %v1607_v29  ;;  %v608_v29 = vld [vmem:[%s2359_s22 + $0xd48] sm:$0xff]  ;;  %v1120_v34 = vmul.f32 %v2361_v0, %v607_v26  ;;  %v1631_v39 = vadd.f32 %v2364_v2, %v1118_v28 }
 0x1a4   : > { %2120 = vst [vmem:[%s2377_s25 + $0xc78] sm:$0xff] %v1608_v32  ;;  %v609_v32 = vld [vmem:[%s2359_s22 + $0xd50] sm:$0xff]  ;;  %v1121_v37 = vmul.f32 %v2361_v0, %v608_v29  ;;  %v1632_v42 = vadd.f32 %v2364_v2, %v1119_v31 }
 0x1a5   : > { %2121 = vst [vmem:[%s2377_s25 + $0xc80] sm:$0xff] %v1609_v35  ;;  %v610_v35 = vld [vmem:[%s2359_s22 + $0xd58] sm:$0xff]  ;;  %v1122_v40 = vmul.f32 %v2361_v0, %v609_v32  ;;  %v1633_v45 = vadd.f32 %v2364_v2, %v1120_v34 }
 0x1a6   : > { %2122 = vst [vmem:[%s2377_s25 + $0xc88] sm:$0xff] %v1610_v38  ;;  %v611_v38 = vld [vmem:[%s2359_s22 + $0xd60] sm:$0xff]  ;;  %v1123_v43 = vmul.f32 %v2361_v0, %v610_v35  ;;  %v1634_v48 = vadd.f32 %v2364_v2, %v1121_v37 }
 0x1a7   : > { %2123 = vst [vmem:[%s2377_s25 + $0xc90] sm:$0xff] %v1611_v41  ;;  %v612_v41 = vld [vmem:[%s2359_s22 + $0xd68] sm:$0xff]  ;;  %v1124_v46 = vmul.f32 %v2361_v0, %v611_v38  ;;  %v1635_v51 = vadd.f32 %v2364_v2, %v1122_v40 }
 0x1a8   : > { %2124 = vst [vmem:[%s2377_s25 + $0xc98] sm:$0xff] %v1612_v44  ;;  %v613_v44 = vld [vmem:[%s2359_s22 + $0xd70] sm:$0xff]  ;;  %v1125_v49 = vmul.f32 %v2361_v0, %v612_v41  ;;  %v1636_v54 = vadd.f32 %v2364_v2, %v1123_v43 }
 0x1a9   : > { %2125 = vst [vmem:[%s2377_s25 + $0xca0] sm:$0xff] %v1613_v47  ;;  %v614_v47 = vld [vmem:[%s2359_s22 + $0xd78] sm:$0xff]  ;;  %v1126_v52 = vmul.f32 %v2361_v0, %v613_v44  ;;  %v1637_v57 = vadd.f32 %v2364_v2, %v1124_v46 }
 0x1aa   : > { %2126 = vst [vmem:[%s2377_s25 + $0xca8] sm:$0xff] %v1614_v50  ;;  %v615_v50 = vld [vmem:[%s2359_s22 + $0xd80] sm:$0xff]  ;;  %v1127_v55 = vmul.f32 %v2361_v0, %v614_v47  ;;  %v1638_v60 = vadd.f32 %v2364_v2, %v1125_v49 }
 0x1ab   : > { %2127 = vst [vmem:[%s2377_s25 + $0xcb0] sm:$0xff] %v1615_v53  ;;  %v616_v53 = vld [vmem:[%s2359_s22 + $0xd88] sm:$0xff]  ;;  %v1128_v58 = vmul.f32 %v2361_v0, %v615_v50  ;;  %v1639_v63 = vadd.f32 %v2364_v2, %v1126_v52 }
 0x1ac   : > { %2128 = vst [vmem:[%s2377_s25 + $0xcb8] sm:$0xff] %v1616_v56  ;;  %v617_v56 = vld [vmem:[%s2359_s22 + $0xd90] sm:$0xff]  ;;  %v1129_v61 = vmul.f32 %v2361_v0, %v616_v53  ;;  %v1640_v4 = vadd.f32 %v2364_v2, %v1127_v55 }
 0x1ad   : > { %2129 = vst [vmem:[%s2377_s25 + $0xcc0] sm:$0xff] %v1617_v59  ;;  %v618_v59 = vld [vmem:[%s2359_s22 + $0xd98] sm:$0xff]  ;;  %v1130_v1 = vmul.f32 %v2361_v0, %v617_v56  ;;  %v1641_v7 = vadd.f32 %v2364_v2, %v1128_v58 }
 0x1ae   : > { %2130 = vst [vmem:[%s2377_s25 + $0xcc8] sm:$0xff] %v1618_v62  ;;  %v619_v62 = vld [vmem:[%s2359_s22 + $0xda0] sm:$0xff]  ;;  %v1131_v5 = vmul.f32 %v2361_v0, %v618_v59  ;;  %v1642_v10 = vadd.f32 %v2364_v2, %v1129_v61 }
 0x1af   : > { %2131 = vst [vmem:[%s2377_s25 + $0xcd0] sm:$0xff] %v1619_v3  ;;  %v620_v3 = vld [vmem:[%s2359_s22 + $0xda8] sm:$0xff]  ;;  %v1132_v8 = vmul.f32 %v2361_v0, %v619_v62  ;;  %v1643_v13 = vadd.f32 %v2364_v2, %v1130_v1 }
 0x1b0   : > { %2132 = vst [vmem:[%s2377_s25 + $0xcd8] sm:$0xff] %v1620_v6  ;;  %v621_v6 = vld [vmem:[%s2359_s22 + $0xdb0] sm:$0xff]  ;;  %v1133_v11 = vmul.f32 %v2361_v0, %v620_v3  ;;  %v1644_v16 = vadd.f32 %v2364_v2, %v1131_v5 }
 0x1b1   : > { %2133 = vst [vmem:[%s2377_s25 + $0xce0] sm:$0xff] %v1621_v9  ;;  %v622_v9 = vld [vmem:[%s2359_s22 + $0xdb8] sm:$0xff]  ;;  %v1134_v14 = vmul.f32 %v2361_v0, %v621_v6  ;;  %v1645_v19 = vadd.f32 %v2364_v2, %v1132_v8 }
 0x1b2   : > { %2134 = vst [vmem:[%s2377_s25 + $0xce8] sm:$0xff] %v1622_v12  ;;  %v623_v12 = vld [vmem:[%s2359_s22 + $0xdc0] sm:$0xff]  ;;  %v1135_v17 = vmul.f32 %v2361_v0, %v622_v9  ;;  %v1646_v22 = vadd.f32 %v2364_v2, %v1133_v11 }
 0x1b3   : > { %2135 = vst [vmem:[%s2377_s25 + $0xcf0] sm:$0xff] %v1623_v15  ;;  %v624_v15 = vld [vmem:[%s2359_s22 + $0xdc8] sm:$0xff]  ;;  %v1136_v20 = vmul.f32 %v2361_v0, %v623_v12  ;;  %v1647_v25 = vadd.f32 %v2364_v2, %v1134_v14 }
 0x1b4   : > { %2136 = vst [vmem:[%s2377_s25 + $0xcf8] sm:$0xff] %v1624_v18  ;;  %v625_v18 = vld [vmem:[%s2359_s22 + $0xdd0] sm:$0xff]  ;;  %v1137_v23 = vmul.f32 %v2361_v0, %v624_v15  ;;  %v1648_v28 = vadd.f32 %v2364_v2, %v1135_v17 }
 0x1b5   : > { %2137 = vst [vmem:[%s2377_s25 + $0xd00] sm:$0xff] %v1625_v21  ;;  %v626_v21 = vld [vmem:[%s2359_s22 + $0xdd8] sm:$0xff]  ;;  %v1138_v26 = vmul.f32 %v2361_v0, %v625_v18  ;;  %v1649_v31 = vadd.f32 %v2364_v2, %v1136_v20 }
 0x1b6   : > { %2138 = vst [vmem:[%s2377_s25 + $0xd08] sm:$0xff] %v1626_v24  ;;  %v627_v24 = vld [vmem:[%s2359_s22 + $0xde0] sm:$0xff]  ;;  %v1139_v29 = vmul.f32 %v2361_v0, %v626_v21  ;;  %v1650_v34 = vadd.f32 %v2364_v2, %v1137_v23 }
 0x1b7   : > { %2139 = vst [vmem:[%s2377_s25 + $0xd10] sm:$0xff] %v1627_v27  ;;  %v628_v27 = vld [vmem:[%s2359_s22 + $0xde8] sm:$0xff]  ;;  %v1140_v32 = vmul.f32 %v2361_v0, %v627_v24  ;;  %v1651_v37 = vadd.f32 %v2364_v2, %v1138_v26 }
 0x1b8   : > { %2140 = vst [vmem:[%s2377_s25 + $0xd18] sm:$0xff] %v1628_v30  ;;  %v629_v30 = vld [vmem:[%s2359_s22 + $0xdf0] sm:$0xff]  ;;  %v1141_v35 = vmul.f32 %v2361_v0, %v628_v27  ;;  %v1652_v40 = vadd.f32 %v2364_v2, %v1139_v29 }
 0x1b9   : > { %2141 = vst [vmem:[%s2377_s25 + $0xd20] sm:$0xff] %v1629_v33  ;;  %v630_v33 = vld [vmem:[%s2359_s22 + $0xdf8] sm:$0xff]  ;;  %v1142_v38 = vmul.f32 %v2361_v0, %v629_v30  ;;  %v1653_v43 = vadd.f32 %v2364_v2, %v1140_v32 }
 0x1ba   : > { %2142 = vst [vmem:[%s2377_s25 + $0xd28] sm:$0xff] %v1630_v36  ;;  %v631_v36 = vld [vmem:[%s2359_s22 + $0xe00] sm:$0xff]  ;;  %v1143_v41 = vmul.f32 %v2361_v0, %v630_v33  ;;  %v1654_v46 = vadd.f32 %v2364_v2, %v1141_v35 }
 0x1bb   : > { %2143 = vst [vmem:[%s2377_s25 + $0xd30] sm:$0xff] %v1631_v39  ;;  %v632_v39 = vld [vmem:[%s2359_s22 + $0xe08] sm:$0xff]  ;;  %v1144_v44 = vmul.f32 %v2361_v0, %v631_v36  ;;  %v1655_v49 = vadd.f32 %v2364_v2, %v1142_v38 }
 0x1bc   : > { %2144 = vst [vmem:[%s2377_s25 + $0xd38] sm:$0xff] %v1632_v42  ;;  %v633_v42 = vld [vmem:[%s2359_s22 + $0xe10] sm:$0xff]  ;;  %v1145_v47 = vmul.f32 %v2361_v0, %v632_v39  ;;  %v1656_v52 = vadd.f32 %v2364_v2, %v1143_v41 }
 0x1bd   : > { %2145 = vst [vmem:[%s2377_s25 + $0xd40] sm:$0xff] %v1633_v45  ;;  %v634_v45 = vld [vmem:[%s2359_s22 + $0xe18] sm:$0xff]  ;;  %v1146_v50 = vmul.f32 %v2361_v0, %v633_v42  ;;  %v1657_v55 = vadd.f32 %v2364_v2, %v1144_v44 }
 0x1be   : > { %2146 = vst [vmem:[%s2377_s25 + $0xd48] sm:$0xff] %v1634_v48  ;;  %v635_v48 = vld [vmem:[%s2359_s22 + $0xe20] sm:$0xff]  ;;  %v1147_v53 = vmul.f32 %v2361_v0, %v634_v45  ;;  %v1658_v58 = vadd.f32 %v2364_v2, %v1145_v47 }
 0x1bf   : > { %2147 = vst [vmem:[%s2377_s25 + $0xd50] sm:$0xff] %v1635_v51  ;;  %v636_v51 = vld [vmem:[%s2359_s22 + $0xe28] sm:$0xff]  ;;  %v1148_v56 = vmul.f32 %v2361_v0, %v635_v48  ;;  %v1659_v61 = vadd.f32 %v2364_v2, %v1146_v50 }
 0x1c0   : > { %2148 = vst [vmem:[%s2377_s25 + $0xd58] sm:$0xff] %v1636_v54  ;;  %v637_v54 = vld [vmem:[%s2359_s22 + $0xe30] sm:$0xff]  ;;  %v1149_v59 = vmul.f32 %v2361_v0, %v636_v51  ;;  %v1660_v1 = vadd.f32 %v2364_v2, %v1147_v53 }
 0x1c1   : > { %2149 = vst [vmem:[%s2377_s25 + $0xd60] sm:$0xff] %v1637_v57  ;;  %v638_v57 = vld [vmem:[%s2359_s22 + $0xe38] sm:$0xff]  ;;  %v1150_v62 = vmul.f32 %v2361_v0, %v637_v54  ;;  %v1661_v5 = vadd.f32 %v2364_v2, %v1148_v56 }
 0x1c2   : > { %2150 = vst [vmem:[%s2377_s25 + $0xd68] sm:$0xff] %v1638_v60  ;;  %v639_v60 = vld [vmem:[%s2359_s22 + $0xe40] sm:$0xff]  ;;  %v1151_v3 = vmul.f32 %v2361_v0, %v638_v57  ;;  %v1662_v8 = vadd.f32 %v2364_v2, %v1149_v59 }
 0x1c3   : > { %2151 = vst [vmem:[%s2377_s25 + $0xd70] sm:$0xff] %v1639_v63  ;;  %v640_v63 = vld [vmem:[%s2359_s22 + $0xe48] sm:$0xff]  ;;  %v1152_v6 = vmul.f32 %v2361_v0, %v639_v60  ;;  %v1663_v11 = vadd.f32 %v2364_v2, %v1150_v62 }
 0x1c4   : > { %2152 = vst [vmem:[%s2377_s25 + $0xd78] sm:$0xff] %v1640_v4  ;;  %v641_v4 = vld [vmem:[%s2359_s22 + $0xe50] sm:$0xff]  ;;  %v1153_v9 = vmul.f32 %v2361_v0, %v640_v63  ;;  %v1664_v14 = vadd.f32 %v2364_v2, %v1151_v3 }
 0x1c5   : > { %2153 = vst [vmem:[%s2377_s25 + $0xd80] sm:$0xff] %v1641_v7  ;;  %v642_v7 = vld [vmem:[%s2359_s22 + $0xe58] sm:$0xff]  ;;  %v1154_v12 = vmul.f32 %v2361_v0, %v641_v4  ;;  %v1665_v17 = vadd.f32 %v2364_v2, %v1152_v6 }
 0x1c6   : > { %2154 = vst [vmem:[%s2377_s25 + $0xd88] sm:$0xff] %v1642_v10  ;;  %v643_v10 = vld [vmem:[%s2359_s22 + $0xe60] sm:$0xff]  ;;  %v1155_v15 = vmul.f32 %v2361_v0, %v642_v7  ;;  %v1666_v20 = vadd.f32 %v2364_v2, %v1153_v9 }
 0x1c7   : > { %2155 = vst [vmem:[%s2377_s25 + $0xd90] sm:$0xff] %v1643_v13  ;;  %v644_v13 = vld [vmem:[%s2359_s22 + $0xe68] sm:$0xff]  ;;  %v1156_v18 = vmul.f32 %v2361_v0, %v643_v10  ;;  %v1667_v23 = vadd.f32 %v2364_v2, %v1154_v12 }
 0x1c8   : > { %2156 = vst [vmem:[%s2377_s25 + $0xd98] sm:$0xff] %v1644_v16  ;;  %v645_v16 = vld [vmem:[%s2359_s22 + $0xe70] sm:$0xff]  ;;  %v1157_v21 = vmul.f32 %v2361_v0, %v644_v13  ;;  %v1668_v26 = vadd.f32 %v2364_v2, %v1155_v15 }
 0x1c9   : > { %2157 = vst [vmem:[%s2377_s25 + $0xda0] sm:$0xff] %v1645_v19  ;;  %v646_v19 = vld [vmem:[%s2359_s22 + $0xe78] sm:$0xff]  ;;  %v1158_v24 = vmul.f32 %v2361_v0, %v645_v16  ;;  %v1669_v29 = vadd.f32 %v2364_v2, %v1156_v18 }
 0x1ca   : > { %2158 = vst [vmem:[%s2377_s25 + $0xda8] sm:$0xff] %v1646_v22  ;;  %v647_v22 = vld [vmem:[%s2359_s22 + $0xe80] sm:$0xff]  ;;  %v1159_v27 = vmul.f32 %v2361_v0, %v646_v19  ;;  %v1670_v32 = vadd.f32 %v2364_v2, %v1157_v21 }
 0x1cb   : > { %2159 = vst [vmem:[%s2377_s25 + $0xdb0] sm:$0xff] %v1647_v25  ;;  %v648_v25 = vld [vmem:[%s2359_s22 + $0xe88] sm:$0xff]  ;;  %v1160_v30 = vmul.f32 %v2361_v0, %v647_v22  ;;  %v1671_v35 = vadd.f32 %v2364_v2, %v1158_v24 }
 0x1cc   : > { %2160 = vst [vmem:[%s2377_s25 + $0xdb8] sm:$0xff] %v1648_v28  ;;  %v649_v28 = vld [vmem:[%s2359_s22 + $0xe90] sm:$0xff]  ;;  %v1161_v33 = vmul.f32 %v2361_v0, %v648_v25  ;;  %v1672_v38 = vadd.f32 %v2364_v2, %v1159_v27 }
 0x1cd   : > { %2161 = vst [vmem:[%s2377_s25 + $0xdc0] sm:$0xff] %v1649_v31  ;;  %v650_v31 = vld [vmem:[%s2359_s22 + $0xe98] sm:$0xff]  ;;  %v1162_v36 = vmul.f32 %v2361_v0, %v649_v28  ;;  %v1673_v41 = vadd.f32 %v2364_v2, %v1160_v30 }
 0x1ce   : > { %2162 = vst [vmem:[%s2377_s25 + $0xdc8] sm:$0xff] %v1650_v34  ;;  %v651_v34 = vld [vmem:[%s2359_s22 + $0xea0] sm:$0xff]  ;;  %v1163_v39 = vmul.f32 %v2361_v0, %v650_v31  ;;  %v1674_v44 = vadd.f32 %v2364_v2, %v1161_v33 }
 0x1cf   : > { %2163 = vst [vmem:[%s2377_s25 + $0xdd0] sm:$0xff] %v1651_v37  ;;  %v652_v37 = vld [vmem:[%s2359_s22 + $0xea8] sm:$0xff]  ;;  %v1164_v42 = vmul.f32 %v2361_v0, %v651_v34  ;;  %v1675_v47 = vadd.f32 %v2364_v2, %v1162_v36 }
 0x1d0   : > { %2164 = vst [vmem:[%s2377_s25 + $0xdd8] sm:$0xff] %v1652_v40  ;;  %v653_v40 = vld [vmem:[%s2359_s22 + $0xeb0] sm:$0xff]  ;;  %v1165_v45 = vmul.f32 %v2361_v0, %v652_v37  ;;  %v1676_v50 = vadd.f32 %v2364_v2, %v1163_v39 }
 0x1d1   : > { %2165 = vst [vmem:[%s2377_s25 + $0xde0] sm:$0xff] %v1653_v43  ;;  %v654_v43 = vld [vmem:[%s2359_s22 + $0xeb8] sm:$0xff]  ;;  %v1166_v48 = vmul.f32 %v2361_v0, %v653_v40  ;;  %v1677_v53 = vadd.f32 %v2364_v2, %v1164_v42 }
 0x1d2   : > { %2166 = vst [vmem:[%s2377_s25 + $0xde8] sm:$0xff] %v1654_v46  ;;  %v655_v46 = vld [vmem:[%s2359_s22 + $0xec0] sm:$0xff]  ;;  %v1167_v51 = vmul.f32 %v2361_v0, %v654_v43  ;;  %v1678_v56 = vadd.f32 %v2364_v2, %v1165_v45 }
 0x1d3   : > { %2167 = vst [vmem:[%s2377_s25 + $0xdf0] sm:$0xff] %v1655_v49  ;;  %v656_v49 = vld [vmem:[%s2359_s22 + $0xec8] sm:$0xff]  ;;  %v1168_v54 = vmul.f32 %v2361_v0, %v655_v46  ;;  %v1679_v59 = vadd.f32 %v2364_v2, %v1166_v48 }
 0x1d4   : > { %2168 = vst [vmem:[%s2377_s25 + $0xdf8] sm:$0xff] %v1656_v52  ;;  %v657_v52 = vld [vmem:[%s2359_s22 + $0xed0] sm:$0xff]  ;;  %v1169_v57 = vmul.f32 %v2361_v0, %v656_v49  ;;  %v1680_v62 = vadd.f32 %v2364_v2, %v1167_v51 }
 0x1d5   : > { %2169 = vst [vmem:[%s2377_s25 + $0xe00] sm:$0xff] %v1657_v55  ;;  %v658_v55 = vld [vmem:[%s2359_s22 + $0xed8] sm:$0xff]  ;;  %v1170_v60 = vmul.f32 %v2361_v0, %v657_v52  ;;  %v1681_v3 = vadd.f32 %v2364_v2, %v1168_v54 }
 0x1d6   : > { %2170 = vst [vmem:[%s2377_s25 + $0xe08] sm:$0xff] %v1658_v58  ;;  %v659_v58 = vld [vmem:[%s2359_s22 + $0xee0] sm:$0xff]  ;;  %v1171_v63 = vmul.f32 %v2361_v0, %v658_v55  ;;  %v1682_v6 = vadd.f32 %v2364_v2, %v1169_v57 }
 0x1d7   : > { %2171 = vst [vmem:[%s2377_s25 + $0xe10] sm:$0xff] %v1659_v61  ;;  %v660_v61 = vld [vmem:[%s2359_s22 + $0xee8] sm:$0xff]  ;;  %v1172_v4 = vmul.f32 %v2361_v0, %v659_v58  ;;  %v1683_v9 = vadd.f32 %v2364_v2, %v1170_v60 }
 0x1d8   : > { %2172 = vst [vmem:[%s2377_s25 + $0xe18] sm:$0xff] %v1660_v1  ;;  %v661_v1 = vld [vmem:[%s2359_s22 + $0xef0] sm:$0xff]  ;;  %v1173_v7 = vmul.f32 %v2361_v0, %v660_v61  ;;  %v1684_v12 = vadd.f32 %v2364_v2, %v1171_v63 }
 0x1d9   : > { %2173 = vst [vmem:[%s2377_s25 + $0xe20] sm:$0xff] %v1661_v5  ;;  %v662_v5 = vld [vmem:[%s2359_s22 + $0xef8] sm:$0xff]  ;;  %v1174_v10 = vmul.f32 %v2361_v0, %v661_v1  ;;  %v1685_v15 = vadd.f32 %v2364_v2, %v1172_v4 }
 0x1da   : > { %2174 = vst [vmem:[%s2377_s25 + $0xe28] sm:$0xff] %v1662_v8  ;;  %v663_v8 = vld [vmem:[%s2359_s22 + $0xf00] sm:$0xff]  ;;  %v1175_v13 = vmul.f32 %v2361_v0, %v662_v5  ;;  %v1686_v18 = vadd.f32 %v2364_v2, %v1173_v7 }
 0x1db   : > { %2175 = vst [vmem:[%s2377_s25 + $0xe30] sm:$0xff] %v1663_v11  ;;  %v664_v11 = vld [vmem:[%s2359_s22 + $0xf08] sm:$0xff]  ;;  %v1176_v16 = vmul.f32 %v2361_v0, %v663_v8  ;;  %v1687_v21 = vadd.f32 %v2364_v2, %v1174_v10 }
 0x1dc   : > { %2176 = vst [vmem:[%s2377_s25 + $0xe38] sm:$0xff] %v1664_v14  ;;  %v665_v14 = vld [vmem:[%s2359_s22 + $0xf10] sm:$0xff]  ;;  %v1177_v19 = vmul.f32 %v2361_v0, %v664_v11  ;;  %v1688_v24 = vadd.f32 %v2364_v2, %v1175_v13 }
 0x1dd   : > { %2177 = vst [vmem:[%s2377_s25 + $0xe40] sm:$0xff] %v1665_v17  ;;  %v666_v17 = vld [vmem:[%s2359_s22 + $0xf18] sm:$0xff]  ;;  %v1178_v22 = vmul.f32 %v2361_v0, %v665_v14  ;;  %v1689_v27 = vadd.f32 %v2364_v2, %v1176_v16 }
 0x1de   : > { %2178 = vst [vmem:[%s2377_s25 + $0xe48] sm:$0xff] %v1666_v20  ;;  %v667_v20 = vld [vmem:[%s2359_s22 + $0xf20] sm:$0xff]  ;;  %v1179_v25 = vmul.f32 %v2361_v0, %v666_v17  ;;  %v1690_v30 = vadd.f32 %v2364_v2, %v1177_v19 }
 0x1df   : > { %2179 = vst [vmem:[%s2377_s25 + $0xe50] sm:$0xff] %v1667_v23  ;;  %v668_v23 = vld [vmem:[%s2359_s22 + $0xf28] sm:$0xff]  ;;  %v1180_v28 = vmul.f32 %v2361_v0, %v667_v20  ;;  %v1691_v33 = vadd.f32 %v2364_v2, %v1178_v22 }
 0x1e0   : > { %2180 = vst [vmem:[%s2377_s25 + $0xe58] sm:$0xff] %v1668_v26  ;;  %v669_v26 = vld [vmem:[%s2359_s22 + $0xf30] sm:$0xff]  ;;  %v1181_v31 = vmul.f32 %v2361_v0, %v668_v23  ;;  %v1692_v36 = vadd.f32 %v2364_v2, %v1179_v25 }
 0x1e1   : > { %2181 = vst [vmem:[%s2377_s25 + $0xe60] sm:$0xff] %v1669_v29  ;;  %v670_v29 = vld [vmem:[%s2359_s22 + $0xf38] sm:$0xff]  ;;  %v1182_v34 = vmul.f32 %v2361_v0, %v669_v26  ;;  %v1693_v39 = vadd.f32 %v2364_v2, %v1180_v28 }
 0x1e2   : > { %2182 = vst [vmem:[%s2377_s25 + $0xe68] sm:$0xff] %v1670_v32  ;;  %v671_v32 = vld [vmem:[%s2359_s22 + $0xf40] sm:$0xff]  ;;  %v1183_v37 = vmul.f32 %v2361_v0, %v670_v29  ;;  %v1694_v42 = vadd.f32 %v2364_v2, %v1181_v31 }
 0x1e3   : > { %2183 = vst [vmem:[%s2377_s25 + $0xe70] sm:$0xff] %v1671_v35  ;;  %v672_v35 = vld [vmem:[%s2359_s22 + $0xf48] sm:$0xff]  ;;  %v1184_v40 = vmul.f32 %v2361_v0, %v671_v32  ;;  %v1695_v45 = vadd.f32 %v2364_v2, %v1182_v34 }
 0x1e4   : > { %2184 = vst [vmem:[%s2377_s25 + $0xe78] sm:$0xff] %v1672_v38  ;;  %v673_v38 = vld [vmem:[%s2359_s22 + $0xf50] sm:$0xff]  ;;  %v1185_v43 = vmul.f32 %v2361_v0, %v672_v35  ;;  %v1696_v48 = vadd.f32 %v2364_v2, %v1183_v37 }
 0x1e5   : > { %2185 = vst [vmem:[%s2377_s25 + $0xe80] sm:$0xff] %v1673_v41  ;;  %v674_v41 = vld [vmem:[%s2359_s22 + $0xf58] sm:$0xff]  ;;  %v1186_v46 = vmul.f32 %v2361_v0, %v673_v38  ;;  %v1697_v51 = vadd.f32 %v2364_v2, %v1184_v40 }
 0x1e6   : > { %2186 = vst [vmem:[%s2377_s25 + $0xe88] sm:$0xff] %v1674_v44  ;;  %v675_v44 = vld [vmem:[%s2359_s22 + $0xf60] sm:$0xff]  ;;  %v1187_v49 = vmul.f32 %v2361_v0, %v674_v41  ;;  %v1698_v54 = vadd.f32 %v2364_v2, %v1185_v43 }
 0x1e7   : > { %2187 = vst [vmem:[%s2377_s25 + $0xe90] sm:$0xff] %v1675_v47  ;;  %v676_v47 = vld [vmem:[%s2359_s22 + $0xf68] sm:$0xff]  ;;  %v1188_v52 = vmul.f32 %v2361_v0, %v675_v44  ;;  %v1699_v57 = vadd.f32 %v2364_v2, %v1186_v46 }
 0x1e8   : > { %2188 = vst [vmem:[%s2377_s25 + $0xe98] sm:$0xff] %v1676_v50  ;;  %v677_v50 = vld [vmem:[%s2359_s22 + $0xf70] sm:$0xff]  ;;  %v1189_v55 = vmul.f32 %v2361_v0, %v676_v47  ;;  %v1700_v60 = vadd.f32 %v2364_v2, %v1187_v49 }
 0x1e9   : > { %2189 = vst [vmem:[%s2377_s25 + $0xea0] sm:$0xff] %v1677_v53  ;;  %v678_v53 = vld [vmem:[%s2359_s22 + $0xf78] sm:$0xff]  ;;  %v1190_v58 = vmul.f32 %v2361_v0, %v677_v50  ;;  %v1701_v63 = vadd.f32 %v2364_v2, %v1188_v52 }
 0x1ea   : > { %2190 = vst [vmem:[%s2377_s25 + $0xea8] sm:$0xff] %v1678_v56  ;;  %v679_v56 = vld [vmem:[%s2359_s22 + $0xf80] sm:$0xff]  ;;  %v1191_v61 = vmul.f32 %v2361_v0, %v678_v53  ;;  %v1702_v4 = vadd.f32 %v2364_v2, %v1189_v55 }
 0x1eb   : > { %2191 = vst [vmem:[%s2377_s25 + $0xeb0] sm:$0xff] %v1679_v59  ;;  %v680_v59 = vld [vmem:[%s2359_s22 + $0xf88] sm:$0xff]  ;;  %v1192_v1 = vmul.f32 %v2361_v0, %v679_v56  ;;  %v1703_v7 = vadd.f32 %v2364_v2, %v1190_v58 }
 0x1ec   : > { %2192 = vst [vmem:[%s2377_s25 + $0xeb8] sm:$0xff] %v1680_v62  ;;  %v681_v62 = vld [vmem:[%s2359_s22 + $0xf90] sm:$0xff]  ;;  %v1193_v5 = vmul.f32 %v2361_v0, %v680_v59  ;;  %v1704_v10 = vadd.f32 %v2364_v2, %v1191_v61 }
 0x1ed   : > { %2193 = vst [vmem:[%s2377_s25 + $0xec0] sm:$0xff] %v1681_v3  ;;  %v682_v3 = vld [vmem:[%s2359_s22 + $0xf98] sm:$0xff]  ;;  %v1194_v8 = vmul.f32 %v2361_v0, %v681_v62  ;;  %v1705_v13 = vadd.f32 %v2364_v2, %v1192_v1 }
 0x1ee   : > { %2194 = vst [vmem:[%s2377_s25 + $0xec8] sm:$0xff] %v1682_v6  ;;  %v683_v6 = vld [vmem:[%s2359_s22 + $0xfa0] sm:$0xff]  ;;  %v1195_v11 = vmul.f32 %v2361_v0, %v682_v3  ;;  %v1706_v16 = vadd.f32 %v2364_v2, %v1193_v5 }
 0x1ef   : > { %2195 = vst [vmem:[%s2377_s25 + $0xed0] sm:$0xff] %v1683_v9  ;;  %v684_v9 = vld [vmem:[%s2359_s22 + $0xfa8] sm:$0xff]  ;;  %v1196_v14 = vmul.f32 %v2361_v0, %v683_v6  ;;  %v1707_v19 = vadd.f32 %v2364_v2, %v1194_v8 }
 0x1f0   : > { %2196 = vst [vmem:[%s2377_s25 + $0xed8] sm:$0xff] %v1684_v12  ;;  %v685_v12 = vld [vmem:[%s2359_s22 + $0xfb0] sm:$0xff]  ;;  %v1197_v17 = vmul.f32 %v2361_v0, %v684_v9  ;;  %v1708_v22 = vadd.f32 %v2364_v2, %v1195_v11 }
 0x1f1   : > { %2197 = vst [vmem:[%s2377_s25 + $0xee0] sm:$0xff] %v1685_v15  ;;  %v686_v15 = vld [vmem:[%s2359_s22 + $0xfb8] sm:$0xff]  ;;  %v1198_v20 = vmul.f32 %v2361_v0, %v685_v12  ;;  %v1709_v25 = vadd.f32 %v2364_v2, %v1196_v14 }
 0x1f2   : > { %2198 = vst [vmem:[%s2377_s25 + $0xee8] sm:$0xff] %v1686_v18  ;;  %v687_v18 = vld [vmem:[%s2359_s22 + $0xfc0] sm:$0xff]  ;;  %v1199_v23 = vmul.f32 %v2361_v0, %v686_v15  ;;  %v1710_v28 = vadd.f32 %v2364_v2, %v1197_v17 }
 0x1f3   : > { %2199 = vst [vmem:[%s2377_s25 + $0xef0] sm:$0xff] %v1687_v21  ;;  %v688_v21 = vld [vmem:[%s2359_s22 + $0xfc8] sm:$0xff]  ;;  %v1200_v26 = vmul.f32 %v2361_v0, %v687_v18  ;;  %v1711_v31 = vadd.f32 %v2364_v2, %v1198_v20 }
 0x1f4   : > { %2200 = vst [vmem:[%s2377_s25 + $0xef8] sm:$0xff] %v1688_v24  ;;  %v689_v24 = vld [vmem:[%s2359_s22 + $0xfd0] sm:$0xff]  ;;  %v1201_v29 = vmul.f32 %v2361_v0, %v688_v21  ;;  %v1712_v34 = vadd.f32 %v2364_v2, %v1199_v23 }
 0x1f5   : > { %2201 = vst [vmem:[%s2377_s25 + $0xf00] sm:$0xff] %v1689_v27  ;;  %v690_v27 = vld [vmem:[%s2359_s22 + $0xfd8] sm:$0xff]  ;;  %v1202_v32 = vmul.f32 %v2361_v0, %v689_v24  ;;  %v1713_v37 = vadd.f32 %v2364_v2, %v1200_v26 }
 0x1f6   : > { %2202 = vst [vmem:[%s2377_s25 + $0xf08] sm:$0xff] %v1690_v30  ;;  %v691_v30 = vld [vmem:[%s2359_s22 + $0xfe0] sm:$0xff]  ;;  %v1203_v35 = vmul.f32 %v2361_v0, %v690_v27  ;;  %v1714_v40 = vadd.f32 %v2364_v2, %v1201_v29 }
 0x1f7   : > { %2203 = vst [vmem:[%s2377_s25 + $0xf10] sm:$0xff] %v1691_v33  ;;  %v692_v33 = vld [vmem:[%s2359_s22 + $0xfe8] sm:$0xff]  ;;  %v1204_v38 = vmul.f32 %v2361_v0, %v691_v30 }
 0x1f8   : > { %2204 = vst [vmem:[%s2377_s25 + $0xf18] sm:$0xff] %v1692_v36  ;;  %v693_v36 = vld [vmem:[%s2359_s22 + $0xff0] sm:$0xff]  ;;  %v1205_v41 = vmul.f32 %v2361_v0, %v692_v33  ;;  %v1716_v44 = vadd.f32 %v2364_v2, %v1203_v35 }
 0x1f9   : > { %2205 = vst [vmem:[%s2377_s25 + $0xf20] sm:$0xff] %v1693_v39  ;;  %v694_v39 = vld [vmem:[%s2359_s22 + $0xff8] sm:$0xff]  ;;  %v1206_v43 = vmul.f32 %v2361_v0, %v693_v36  ;;  %v1717_v46 = vadd.f32 %v2364_v2, %v1204_v38 }
 0x1fa   : > { %2206 = vst [vmem:[%s2377_s25 + $0xf28] sm:$0xff] %v1694_v42  ;;  %v1715_v42 = vadd.f32 %v2364_v2, %v1202_v32  ;;  %v1718_v47 = vadd.f32 %v2364_v2, %v1205_v41 }
 0x1fb   : > { %2207 = vst [vmem:[%s2377_s25 + $0xf30] sm:$0xff] %v1695_v45  ;;  %v1207_v45 = vmul.f32 %v2361_v0, %v694_v39 }
 0x1fc   : > { %2208 = vst [vmem:[%s2377_s25 + $0xf38] sm:$0xff] %v1696_v48  ;;  %v1719_v48 = vadd.f32 %v2364_v2, %v1206_v43 }
 0x1fd   : > { %2209 = vst [vmem:[%s2377_s25 + $0xf40] sm:$0xff] %v1697_v51  ;;  %v1720_v49 = vadd.f32 %v2364_v2, %v1207_v45 }
 0x1fe   : > { %2210 = vst [vmem:[%s2377_s25 + $0xf48] sm:$0xff] %v1698_v54 }
 0x1ff   : > { %2211 = vst [vmem:[%s2377_s25 + $0xf50] sm:$0xff] %v1699_v57 }
 0x200   : > { %2212 = vst [vmem:[%s2377_s25 + $0xf58] sm:$0xff] %v1700_v60 }
 0x201   : > { %2213 = vst [vmem:[%s2377_s25 + $0xf60] sm:$0xff] %v1701_v63 }
 0x202   : > { %2214 = vst [vmem:[%s2377_s25 + $0xf68] sm:$0xff] %v1702_v4 }
 0x203   : > { %2215 = vst [vmem:[%s2377_s25 + $0xf70] sm:$0xff] %v1703_v7 }
 0x204   : > { %2216 = vst [vmem:[%s2377_s25 + $0xf78] sm:$0xff] %v1704_v10 }
 0x205   : > { %2217 = vst [vmem:[%s2377_s25 + $0xf80] sm:$0xff] %v1705_v13 }
 0x206   : > { %2218 = vst [vmem:[%s2377_s25 + $0xf88] sm:$0xff] %v1706_v16 }
 0x207   : > { %2219 = vst [vmem:[%s2377_s25 + $0xf90] sm:$0xff] %v1707_v19 }
 0x208   : > { %2220 = vst [vmem:[%s2377_s25 + $0xf98] sm:$0xff] %v1708_v22 }
 0x209   : > { %2221 = vst [vmem:[%s2377_s25 + $0xfa0] sm:$0xff] %v1709_v25 }
 0x20a   : > { %2222 = vst [vmem:[%s2377_s25 + $0xfa8] sm:$0xff] %v1710_v28 }
 0x20b   : > { %2223 = vst [vmem:[%s2377_s25 + $0xfb0] sm:$0xff] %v1711_v31 }
 0x20c   : > { %2224 = vst [vmem:[%s2377_s25 + $0xfb8] sm:$0xff] %v1712_v34 }
 0x20d   : > { %2225 = vst [vmem:[%s2377_s25 + $0xfc0] sm:$0xff] %v1713_v37 }
 0x20e   : > { %2226 = vst [vmem:[%s2377_s25 + $0xfc8] sm:$0xff] %v1714_v40 }
 0x20f   : > { %2227 = vst [vmem:[%s2377_s25 + $0xfd0] sm:$0xff] %v1715_v42 }
 0x210   : > { %2228 = vst [vmem:[%s2377_s25 + $0xfd8] sm:$0xff] %v1716_v44 }
 0x211   : > { %2229 = vst [vmem:[%s2377_s25 + $0xfe0] sm:$0xff] %v1717_v46 }
 0x212   : > { %2230 = vst [vmem:[%s2377_s25 + $0xfe8] sm:$0xff] %v1718_v47 }
 0x213   : > { %2231 = vst [vmem:[%s2377_s25 + $0xff0] sm:$0xff] %v1719_v48 }
 0x214   : > { %2232 = vst [vmem:[%s2377_s25 + $0xff8] sm:$0xff] %v1720_v49 }
 0x215 PF: > { %s15_s16 = sadd.s32 1, %s2320_s16  }
 0x216   : > { %p12_p4 = scmp.ge.s32.totalorder %s15_s16, 6  }
 0x218   :  { %14 = sbr.rel (!%p12_p4) target bundleno = 3 (0x3), region = 62 }

</bundles_post_ra>
